<compile_context>
chip_gen: v7x
topology: tpu7x:2x2x1
jax: 0.10.0
libtpu: 0.0.40
codegen_flags: <defaults>
</compile_context>

<pallas_src>
import functools

import jax
import jax.numpy as jnp
from jax.experimental import pallas as pl
from jax.experimental.pallas import tpu as pltpu
import numpy as np

LANE = 128                      # TPU vreg lane width: feature dims padded to this.
SUBLANE = 8                     # sublane granularity for row tiles.
VMEM_LIMIT = 48 * 1024 * 1024   # <= 64 MiB/TC on v7x; comfortable on v5e/v6e.


def _round_up(x, m):
    return ((x + m - 1) // m) * m


def _pad2d(a, rows, cols):
    r, c = a.shape
    return jnp.pad(a, ((0, rows - r), (0, cols - c)))


def _choose_tiles(n, mlp_tile, seg_tile):
    """Pick (mlp_row_tile, seg_tile, padded_rows) such that seg | mlp | padded."""
    seg = min(seg_tile, _round_up(n, SUBLANE))
    rt = seg * max(1, mlp_tile // seg)
    rt = min(rt, _round_up(n, seg))
    padded = _round_up(n, rt)
    return rt, seg, padded


# ---------------------------------------------------------------------------
# Pallas kernels
# ---------------------------------------------------------------------------
def _mlp_kernel(x_ref, *refs, num_layers, use_ln, ln_valid, residual_lanes):
    """Fused MLP on one row-tile of a single lane-packed 128-wide input.

    bf16 matmul operands, f32 accumulation.  Optional masked LayerNorm (statistics
    over the first `ln_valid` lanes; padded lanes of h are exactly zero by
    construction) and fused residual add from lanes [0, residual_lanes) of the input.
    """
    out_ref = refs[-1]
    prm = refs[:-1]

    x = x_ref[...]
    h = jnp.dot(x.astype(jnp.bfloat16), prm[0][...],
                preferred_element_type=jnp.float32) + prm[1][...]
    pos = 2
    for _ in range(1, num_layers):
        h = jnp.maximum(h, 0.0)
        h = jnp.dot(h.astype(jnp.bfloat16), prm[pos][...],
                    preferred_element_type=jnp.float32) + prm[pos + 1][...]
        pos += 2

    lane = None
    if use_ln or residual_lanes is not None:
        lane = jax.lax.broadcasted_iota(jnp.int32, h.shape, dimension=1)

    if use_ln:
        gamma = prm[pos][...]
        beta = prm[pos + 1][...]
        pos += 2
        # Padded output lanes of h are exactly zero, so sum(h) is already the sum
        # over valid lanes; only the variance terms need masking.
        maskf = (lane < ln_valid).astype(jnp.float32)
        mean = jnp.sum(h, axis=-1, keepdims=True) * (1.0 / ln_valid)
        diff = (h - mean) * maskf
        var = jnp.sum(diff * diff, axis=-1, keepdims=True) * (1.0 / ln_valid)
        h = diff * jax.lax.rsqrt(var + 1e-5) * gamma + beta

    if residual_lanes is not None:
        rmask = (lane < residual_lanes).astype(jnp.float32)
        h = h + x.astype(jnp.float32) * rmask

    out_ref[...] = h.astype(out_ref.dtype)


def mlp_pallas(x, mp, *, row_tile, residual_lanes=None, out_dtype=jnp.bfloat16):
    """Apply a lane-padded MLP to a row-aligned (rows, 128k) packed input."""
    n_rows, f_in = x.shape
    assert n_rows % row_tile == 0
    num_layers = len(mp["w"])
    f_out = mp["w"][-1].shape[1]

    args = [x]
    specs = [pl.BlockSpec((row_tile, f_in), lambda i: (i, 0))]
    for w, b in zip(mp["w"], mp["b"]):
        args += [w, b]
        specs += [pl.BlockSpec(w.shape, lambda i: (0, 0)),
                  pl.BlockSpec(b.shape, lambda i: (0, 0))]
    if mp["ln"] is not None:
        g, bt = mp["ln"]
        args += [g, bt]
        specs += [pl.BlockSpec(g.shape, lambda i: (0, 0)),
                  pl.BlockSpec(bt.shape, lambda i: (0, 0))]

    kernel = functools.partial(
        _mlp_kernel, num_layers=num_layers, use_ln=mp["ln"] is not None,
        ln_valid=mp["ln_valid"], residual_lanes=residual_lanes)

    return pl.pallas_call(
        kernel,
        out_shape=jax.ShapeDtypeStruct((n_rows, f_out), out_dtype),
        grid=(n_rows // row_tile,),
        in_specs=specs,
        out_specs=pl.BlockSpec((row_tile, f_out), lambda i: (i, 0)),
        compiler_params=pltpu.CompilerParams(
            dimension_semantics=("parallel",),
            vmem_limit_bytes=VMEM_LIMIT),
    )(*args)


def _segment_sum_kernel(recv_ref, msg_ref, out_ref, acc_ref, *, node_tile):
    """aggregated[n_tile] += onehot(n_tile, e_tile) @ msg[e_tile]  (bf16 MXU, f32 acc).

    The one-hot block is built in-kernel from the receiver row: node ids
    (program_id(0)*node_tile + iota) compared against receivers.  Padded edges
    carry receiver -1 and therefore all-zero columns (garbage messages masked).
    """
    @pl.when(pl.program_id(1) == 0)
    def _():
        acc_ref[...] = jnp.zeros_like(acc_ref)

    edge_tile = recv_ref.shape[1]
    node_ids = (pl.program_id(0) * node_tile
                + jax.lax.broadcasted_iota(jnp.int32, (node_tile, edge_tile), 0))
    onehot = jnp.where(node_ids == recv_ref[...], 1.0, 0.0).astype(jnp.bfloat16)
    acc_ref[...] += jnp.dot(onehot, msg_ref[...].astype(jnp.bfloat16),
                            preferred_element_type=jnp.float32)

    @pl.when(pl.program_id(1) == pl.num_programs(1) - 1)
    def _():
        out_ref[...] = acc_ref[...].astype(out_ref.dtype)


def segment_sum_pallas(recv_row, messages, *, node_rows, node_tile, edge_tile):
    """Scatter-add edge messages to receiver nodes via a blocked MXU matmul."""
    _, e_pad = recv_row.shape
    latent_pad = messages.shape[1]
    assert node_rows % node_tile == 0 and e_pad % edge_tile == 0
    kernel = functools.partial(_segment_sum_kernel, node_tile=node_tile)
    return pl.pallas_call(
        kernel,
        out_shape=jax.ShapeDtypeStruct((node_rows, latent_pad), jnp.bfloat16),
        grid=(node_rows // node_tile, e_pad // edge_tile),
        in_specs=[pl.BlockSpec((1, edge_tile), lambda i, j: (0, j)),
                  pl.BlockSpec((edge_tile, latent_pad), lambda i, j: (j, 0))],
        out_specs=pl.BlockSpec((node_tile, latent_pad), lambda i, j: (i, 0)),
        scratch_shapes=[pltpu.VMEM((node_tile, latent_pad), jnp.float32)],
        compiler_params=pltpu.CompilerParams(
            dimension_semantics=("parallel", "arbitrary"),
            vmem_limit_bytes=VMEM_LIMIT),
    )(recv_row, messages)


# ---------------------------------------------------------------------------
# Parameter construction (unpadded, f32) + padded/bf16 preparation for Pallas
# ---------------------------------------------------------------------------
def init_linear(key, f_in, f_out):
    k1, k2 = jax.random.split(key)
    w = jax.random.normal(k1, (f_in, f_out), jnp.float32) / jnp.sqrt(float(f_in))
    b = 0.01 * jax.random.normal(k2, (1, f_out), jnp.float32)
    return w, b


def init_mlp(key, f_in, latent, f_out, num_hidden, layernorm):
    dims = [f_in] + [latent] * num_hidden + [f_out]
    keys = jax.random.split(key, len(dims) - 1)
    weights, biases = [], []
    for k, din, dout in zip(keys, dims[:-1], dims[1:]):
        w, b = init_linear(k, din, dout)
        weights.append(w)
        biases.append(b)
    ln = None
    if layernorm:
        ln = (jnp.ones((1, f_out), jnp.float32), jnp.zeros((1, f_out), jnp.float32))
    return {"w": weights, "b": biases, "ln": ln}


def init_meshgraphnet(key, node_feat, edge_feat, out_size, latent, num_mlp_layers,
                      steps):
    keys = jax.random.split(key, 3 + 2 * steps)
    params = {
        "enc_node": init_mlp(keys[0], node_feat, latent, latent, num_mlp_layers, True),
        "enc_edge": init_mlp(keys[1], edge_feat, latent, latent, num_mlp_layers, True),
        "proc": [],
        "dec": init_mlp(keys[2], latent, latent, out_size, num_mlp_layers, False),
    }
    for s in range(steps):
        params["proc"].append({
            "edge": init_mlp(keys[3 + 2 * s], 3 * latent, latent, latent,
                             num_mlp_layers, True),
            "node": init_mlp(keys[4 + 2 * s], 2 * latent, latent, latent,
                             num_mlp_layers, True),
        })
    return params


def prepare_mlp_params(p, in_splits, pack_order=None):
    """Lane-pad an MLP to 128-wide tiles; restack the first-layer weight row blocks
    to match the lane-packed kernel input order; pre-cast weights to bf16, keep
    bias/LayerNorm params in f32 (zero-padded so padded lanes stay exactly zero)."""
    weights, biases, ln = p["w"], p["b"], p["ln"]
    w0 = weights[0]
    offs = np.cumsum([0] + list(in_splits))
    assert int(offs[-1]) == w0.shape[0]
    blocks = [w0[int(offs[i]):int(offs[i + 1])] for i in range(len(in_splits))]
    if pack_order is not None:
        blocks = [blocks[i] for i in pack_order]
    w0_packed = jnp.concatenate(blocks, axis=0) if len(blocks) > 1 else blocks[0]

    in_pad = _round_up(w0_packed.shape[0], LANE)
    hid_pad = _round_up(w0.shape[1], LANE)
    ws = [_pad2d(w0_packed, in_pad, hid_pad).astype(jnp.bfloat16)]
    bs = [_pad2d(biases[0], 1, hid_pad)]
    for w, b in zip(weights[1:], biases[1:]):
        ws.append(_pad2d(w, _round_up(w.shape[0], LANE),
                         _round_up(w.shape[1], LANE)).astype(jnp.bfloat16))
        bs.append(_pad2d(b, 1, _round_up(w.shape[1], LANE)))

    out = {"w": ws, "b": bs, "ln": None, "ln_valid": weights[-1].shape[1]}
    if ln is not None:
        g, bt = ln
        fp = _round_up(g.shape[1], LANE)
        out["ln"] = (_pad2d(g, 1, fp), _pad2d(bt, 1, fp))
    return out


def prepare_params(params, node_feat, edge_feat, latent):
    return {
        "enc_node": prepare_mlp_params(params["enc_node"], [node_feat]),
        "enc_edge": prepare_mlp_params(params["enc_edge"], [edge_feat]),
        # Edge MLP packed lane order is [e | x_src | x_dst] (residual e at lanes 0-31),
        # while the reference concat order is [x_src, x_dst, e] -> reorder row blocks.
        "proc": [{"edge": prepare_mlp_params(sp["edge"], [latent] * 3,
                                             pack_order=(2, 0, 1)),
                  "node": prepare_mlp_params(sp["node"], [latent] * 2)}
                 for sp in params["proc"]],
        "dec": prepare_mlp_params(params["dec"], [latent]),
    }


# ---------------------------------------------------------------------------
# Pallas forward pass
# ---------------------------------------------------------------------------
def meshgraphnet_forward_pallas(pparams, node_x, edge_attr, senders, receivers, *,
                                output_size, latent_size,
                                mlp_row_tile=2048, seg_node_tile=512,
                                seg_edge_tile=512):
    num_nodes, nf = node_x.shape
    num_edges, ef = edge_attr.shape
    lat = latent_size

    node_rt, n_st, n_pad = _choose_tiles(num_nodes, mlp_row_tile, seg_node_tile)
    edge_rt, e_st, e_pad = _choose_tiles(num_edges, mlp_row_tile, seg_edge_tile)

    # Encoder inputs: lane-pad to 128, cast to bf16 (matmul operands are bf16 anyway).
    x_in = _pad2d(node_x, n_pad, _round_up(nf, LANE)).astype(jnp.bfloat16)
    e_in = _pad2d(edge_attr, e_pad, _round_up(ef, LANE)).astype(jnp.bfloat16)

    # Gather indices (padded edges gather node 0 but are masked in the aggregation).
    send_g = jnp.pad(senders.astype(jnp.int32), (0, e_pad - num_edges))
    recv_g = jnp.pad(receivers.astype(jnp.int32), (0, e_pad - num_edges))
    # Receiver row for the in-kernel one-hot: padded edges get -1 (all-zero columns).
    recv_row = jnp.pad(receivers.astype(jnp.int32), (0, e_pad - num_edges),
                       constant_values=-1)[None, :]

    # Encoder (outputs bf16, lanes [0, lat) valid, rest exactly zero).
    x = mlp_pallas(x_in, pparams["enc_node"], row_tile=node_rt)
    e = mlp_pallas(e_in, pparams["enc_edge"], row_tile=edge_rt)

    # Lane-packing glue (hoisted zero pads).
    pack_e_w = _round_up(3 * lat, LANE)
    pack_n_w = _round_up(2 * lat, LANE)
    zeros_e = jnp.zeros((e_pad, pack_e_w - 3 * lat), jnp.bfloat16)
    zeros_n = jnp.zeros((n_pad, pack_n_w - 2 * lat), jnp.bfloat16)

    # Processor
    for sp in pparams["proc"]:
        # TODO(synk): fold these gathers + packing into the edge-MLP kernel via
        # scalar-prefetched senders/receivers and a VMEM-resident bf16 node table.
        x_lat = x[:, :lat]
        x_src = jnp.take(x_lat, send_g, axis=0)
        x_dst = jnp.take(x_lat, recv_g, axis=0)
        # e' = e + LN(MLP([x_src, x_dst, e])) -- packed lanes [e | x_src | x_dst],
        # residual (e) read back from lanes 0..lat-1 inside the kernel.
        packed_e = jnp.concatenate([e[:, :lat], x_src, x_dst, zeros_e], axis=-1)
        e = mlp_pallas(packed_e, sp["edge"], row_tile=edge_rt, residual_lanes=lat)
        # agg[n] = sum over edges with receiver n of e'  (in-kernel one-hot, bf16 MXU).
        agg = segment_sum_pallas(recv_row, e, node_rows=n_pad,
                                 node_tile=n_st, edge_tile=e_st)
        # x' = x + LN(MLP([x, agg]))
        packed_n = jnp.concatenate([x[:, :lat], agg[:, :lat], zeros_n], axis=-1)
        x = mlp_pallas(packed_n, sp["node"], row_tile=node_rt, residual_lanes=lat)

    # Decoder (no LayerNorm); f32 output, slice away row/lane padding.
    out = mlp_pallas(x, pparams["dec"], row_tile=node_rt, out_dtype=jnp.float32)
    return out[:num_nodes, :output_size]


# ---------------------------------------------------------------------------
# Pure-JAX reference (original concat/segment_sum formulation, mirroring the Pallas
# precision policy: bf16 matmul operands + bf16 inter-stage activations, f32
# accumulation / LayerNorm / residual math)
# ---------------------------------------------------------------------------
def _mlp_ref(x, p):
    h = x.astype(jnp.float32)
    for i, (w, b) in enumerate(zip(p["w"], p["b"])):
        h = jnp.dot(h.astype(jnp.bfloat16), w.astype(jnp.bfloat16),
                    preferred_element_type=jnp.float32) + b
        if i < len(p["w"]) - 1:
            h = jnp.maximum(h, 0.0)
    if p["ln"] is not None:
        g, bt = p["ln"]
        mean = jnp.mean(h, axis=-1, keepdims=True)
        var = jnp.mean(jnp.square(h - mean), axis=-1, keepdims=True)
        h = (h - mean) * jax.lax.rsqrt(var + 1e-5) * g + bt
    return h


def meshgraphnet_forward_ref(params, node_x, edge_attr, senders, receivers):
    num_nodes = node_x.shape[0]
    x = _mlp_ref(node_x, params["enc_node"]).astype(jnp.bfloat16)
    e = _mlp_ref(edge_attr, params["enc_edge"]).astype(jnp.bfloat16)
    for sp in params["proc"]:
        x_src = jnp.take(x, senders, axis=0)
        x_dst = jnp.take(x, receivers, axis=0)
        upd = _mlp_ref(jnp.concatenate([x_src, x_dst, e], axis=-1), sp["edge"])
        e = (e.astype(jnp.float32) + upd).astype(jnp.bfloat16)
        agg = jax.ops.segment_sum(e.astype(jnp.float32), receivers,
                                  num_segments=num_nodes).astype(jnp.bfloat16)
        upd = _mlp_ref(jnp.concatenate([x, agg], axis=-1), sp["node"])
        x = (x.astype(jnp.float32) + upd).astype(jnp.bfloat16)
    return _mlp_ref(x, params["dec"])


# ---------------------------------------------------------------------------
if __name__ == "__main__":
    # Model hyper-parameters (small, consistent with the module's __init__).
    node_features_size = 4
    edge_features_size = 3
    output_size = 3
    latent_size = 32
    num_mlp_layers = 2
    message_passing_steps = 2

    # Graph sizes deliberately NOT multiples of 8 to exercise the padding path.
    num_nodes = 30
    num_edges = 70

    key = jax.random.PRNGKey(0)
    k_param, k_node, k_edge, k_send, k_recv = jax.random.split(key, 5)

    params = init_meshgraphnet(k_param, node_features_size, edge_features_size,
                               output_size, latent_size, num_mlp_layers,
                               message_passing_steps)
    pparams = prepare_params(params, node_features_size, edge_features_size,
                             latent_size)

    node_x = jax.random.normal(k_node, (num_nodes, node_features_size), jnp.float32)
    edge_attr = jax.random.normal(k_edge, (num_edges, edge_features_size), jnp.float32)
    senders = jax.random.randint(k_send, (num_edges,), 0, num_nodes)
    receivers = jax.random.randint(k_recv, (num_edges,), 0, num_nodes)

    # Pallas forward (params closed over so static metadata stays Python-static).
    fwd = jax.jit(lambda nx, ea, s, r: meshgraphnet_forward_pallas(
        pparams, nx, ea, s, r, output_size=output_size, latent_size=latent_size))
    pred = jax.block_until_ready(fwd(node_x, edge_attr, senders, receivers))

    # Pure-JAX reference for correctness.
    ref = jax.block_until_ready(
        meshgraphnet_forward_ref(params, node_x, edge_attr, senders, receivers))

    assert pred.shape == (num_nodes, output_size)
    np.testing.assert_allclose(np.asarray(pred), np.asarray(ref),
                               rtol=2e-3, atol=2e-3)
    print("KERNEL_OK")
</pallas_src>

<mosaic_0001>
module attributes {stable_mosaic.version = 11 : i64} {
  func.func @_mlp_kernel(%arg0: i32, %arg1: memref<32x128xbf16, #tpu.memory_space<vmem>>, %arg2: memref<128x128xbf16, #tpu.memory_space<vmem>>, %arg3: memref<1x128xf32, #tpu.memory_space<vmem>>, %arg4: memref<128x128xbf16, #tpu.memory_space<vmem>>, %arg5: memref<1x128xf32, #tpu.memory_space<vmem>>, %arg6: memref<128x128xbf16, #tpu.memory_space<vmem>>, %arg7: memref<1x128xf32, #tpu.memory_space<vmem>>, %arg8: memref<1x128xf32, #tpu.memory_space<vmem>>, %arg9: memref<1x128xf32, #tpu.memory_space<vmem>>, %arg10: memref<32x128xbf16, #tpu.memory_space<vmem>>) attributes {dimension_semantics = [#tpu.dimension_semantics<parallel>], iteration_bounds = array<i64: 1>, scalar_prefetch = 0 : i64, scratch_operands = 0 : i64, tpu.core_type = #tpu.core_type<tc>, window_params = [{transform_indices = @transform_0, window_bounds = array<i64: 32, 128>}, {pipeline_mode = #tpu.pipeline_mode<synchronous>, transform_indices = @transform_1, window_bounds = array<i64: 128, 128>}, {pipeline_mode = #tpu.pipeline_mode<synchronous>, transform_indices = @transform_2, window_bounds = array<i64: 1, 128>}, {pipeline_mode = #tpu.pipeline_mode<synchronous>, transform_indices = @transform_3, window_bounds = array<i64: 128, 128>}, {pipeline_mode = #tpu.pipeline_mode<synchronous>, transform_indices = @transform_4, window_bounds = array<i64: 1, 128>}, {pipeline_mode = #tpu.pipeline_mode<synchronous>, transform_indices = @transform_5, window_bounds = array<i64: 128, 128>}, {pipeline_mode = #tpu.pipeline_mode<synchronous>, transform_indices = @transform_6, window_bounds = array<i64: 1, 128>}, {pipeline_mode = #tpu.pipeline_mode<synchronous>, transform_indices = @transform_7, window_bounds = array<i64: 1, 128>}, {pipeline_mode = #tpu.pipeline_mode<synchronous>, transform_indices = @transform_8, window_bounds = array<i64: 1, 128>}, {transform_indices = @transform_9, window_bounds = array<i64: 32, 128>}]} {
    %c0 = arith.constant 0 : index
    %c0_0 = arith.constant 0 : index
    %0 = vector.load %arg1[%c0, %c0_0] : memref<32x128xbf16, #tpu.memory_space<vmem>>, vector<32x128xbf16>
    %c0_1 = arith.constant 0 : index
    %c0_2 = arith.constant 0 : index
    %1 = vector.load %arg2[%c0_1, %c0_2] : memref<128x128xbf16, #tpu.memory_space<vmem>>, vector<128x128xbf16>
    %cst = arith.constant dense<0.000000e+00> : vector<32x128xf32>
    %2 = tpu.matmul %0, %1, %cst {dimension_numbers = #tpu.dot_dimension_numbers<[1], [0], [0], [1], [0, 0, 1, 1], [], []>} : vector<32x128xbf16>, vector<128x128xbf16>, vector<32x128xf32> -> vector<32x128xf32>
    %c0_3 = arith.constant 0 : index
    %c0_4 = arith.constant 0 : index
    %3 = vector.load %arg3[%c0_3, %c0_4] : memref<1x128xf32, #tpu.memory_space<vmem>>, vector<1x128xf32>
    %4 = vector.broadcast %3 : vector<1x128xf32> to vector<32x128xf32>
    %5 = arith.addf %2, %4 : vector<32x128xf32>
    %cst_5 = arith.constant 0.000000e+00 : f32
    %6 = vector.broadcast %cst_5 : f32 to vector<32x128xf32>
    %7 = arith.maximumf %5, %6 : vector<32x128xf32>
    %8 = arith.truncf %7 : vector<32x128xf32> to vector<32x128xbf16>
    %c0_6 = arith.constant 0 : index
    %c0_7 = arith.constant 0 : index
    %9 = vector.load %arg4[%c0_6, %c0_7] : memref<128x128xbf16, #tpu.memory_space<vmem>>, vector<128x128xbf16>
    %cst_8 = arith.constant dense<0.000000e+00> : vector<32x128xf32>
    %10 = tpu.matmul %8, %9, %cst_8 {dimension_numbers = #tpu.dot_dimension_numbers<[1], [0], [0], [1], [0, 0, 1, 1], [], []>} : vector<32x128xbf16>, vector<128x128xbf16>, vector<32x128xf32> -> vector<32x128xf32>
    %c0_9 = arith.constant 0 : index
    %c0_10 = arith.constant 0 : index
    %11 = vector.load %arg5[%c0_9, %c0_10] : memref<1x128xf32, #tpu.memory_space<vmem>>, vector<1x128xf32>
    %12 = vector.broadcast %11 : vector<1x128xf32> to vector<32x128xf32>
    %13 = arith.addf %10, %12 : vector<32x128xf32>
    %cst_11 = arith.constant 0.000000e+00 : f32
    %14 = vector.broadcast %cst_11 : f32 to vector<32x128xf32>
    %15 = arith.maximumf %13, %14 : vector<32x128xf32>
    %16 = arith.truncf %15 : vector<32x128xf32> to vector<32x128xbf16>
    %c0_12 = arith.constant 0 : index
    %c0_13 = arith.constant 0 : index
    %17 = vector.load %arg6[%c0_12, %c0_13] : memref<128x128xbf16, #tpu.memory_space<vmem>>, vector<128x128xbf16>
    %cst_14 = arith.constant dense<0.000000e+00> : vector<32x128xf32>
    %18 = tpu.matmul %16, %17, %cst_14 {dimension_numbers = #tpu.dot_dimension_numbers<[1], [0], [0], [1], [0, 0, 1, 1], [], []>} : vector<32x128xbf16>, vector<128x128xbf16>, vector<32x128xf32> -> vector<32x128xf32>
    %c0_15 = arith.constant 0 : index
    %c0_16 = arith.constant 0 : index
    %19 = vector.load %arg7[%c0_15, %c0_16] : memref<1x128xf32, #tpu.memory_space<vmem>>, vector<1x128xf32>
    %20 = vector.broadcast %19 : vector<1x128xf32> to vector<32x128xf32>
    %21 = arith.addf %18, %20 : vector<32x128xf32>
    %22 = tpu.iota {dimensions = array<i32: 1>} : vector<32x128xi32>
    %c0_17 = arith.constant 0 : index
    %c0_18 = arith.constant 0 : index
    %23 = vector.load %arg8[%c0_17, %c0_18] : memref<1x128xf32, #tpu.memory_space<vmem>>, vector<1x128xf32>
    %c0_19 = arith.constant 0 : index
    %c0_20 = arith.constant 0 : index
    %24 = vector.load %arg9[%c0_19, %c0_20] : memref<1x128xf32, #tpu.memory_space<vmem>>, vector<1x128xf32>
    %c32_i32 = arith.constant 32 : i32
    %25 = vector.broadcast %c32_i32 : i32 to vector<32x128xi32>
    %26 = arith.cmpi slt, %22, %25 : vector<32x128xi32>
    %27 = arith.extui %26 : vector<32x128xi1> to vector<32x128xi32>
    %28 = arith.sitofp %27 : vector<32x128xi32> to vector<32x128xf32>
    %cst_21 = arith.constant dense<0.000000e+00> : vector<32xf32>
    %29 = vector.multi_reduction <add>, %21, %cst_21 [1] : vector<32x128xf32> to vector<32xf32>
    %30 = vector.shape_cast %29 : vector<32xf32> to vector<32x1xf32>
    %cst_22 = arith.constant 3.125000e-02 : f32
    %31 = vector.broadcast %cst_22 : f32 to vector<32x1xf32>
    %32 = arith.mulf %30, %31 : vector<32x1xf32>
    %33 = vector.broadcast %32 : vector<32x1xf32> to vector<32x128xf32>
    %34 = arith.subf %21, %33 : vector<32x128xf32>
    %35 = arith.mulf %34, %28 : vector<32x128xf32>
    %36 = arith.mulf %35, %35 : vector<32x128xf32>
    %cst_23 = arith.constant dense<0.000000e+00> : vector<32xf32>
    %37 = vector.multi_reduction <add>, %36, %cst_23 [1] : vector<32x128xf32> to vector<32xf32>
    %38 = vector.shape_cast %37 : vector<32xf32> to vector<32x1xf32>
    %cst_24 = arith.constant 3.125000e-02 : f32
    %39 = vector.broadcast %cst_24 : f32 to vector<32x1xf32>
    %40 = arith.mulf %38, %39 : vector<32x1xf32>
    %cst_25 = arith.constant 9.99999974E-6 : f32
    %41 = vector.broadcast %cst_25 : f32 to vector<32x1xf32>
    %42 = arith.addf %40, %41 : vector<32x1xf32>
    %43 = math.rsqrt %42 : vector<32x1xf32>
    %44 = vector.broadcast %43 : vector<32x1xf32> to vector<32x128xf32>
    %45 = arith.mulf %35, %44 : vector<32x128xf32>
    %46 = vector.broadcast %23 : vector<1x128xf32> to vector<32x128xf32>
    %47 = arith.mulf %45, %46 : vector<32x128xf32>
    %48 = vector.broadcast %24 : vector<1x128xf32> to vector<32x128xf32>
    %49 = arith.addf %47, %48 : vector<32x128xf32>
    %50 = arith.truncf %49 : vector<32x128xf32> to vector<32x128xbf16>
    %c0_26 = arith.constant 0 : index
    %c0_27 = arith.constant 0 : index
    %51 = vector.load %arg10[%c0_26, %c0_27] : memref<32x128xbf16, #tpu.memory_space<vmem>>, vector<32x128xbf16>
    tpu.vector_store %arg10[%c0_26, %c0_27], %50 {strides = array<i32>} : memref<32x128xbf16, #tpu.memory_space<vmem>>, vector<32x128xbf16>,
    return
  }
  func.func @transform_0(%arg0: i32) -> (i32, i32) {
    %c0_i32 = arith.constant 0 : i32
    %c0_i32_0 = arith.constant 0 : i32
    return %arg0, %c0_i32 : i32, i32
  }
  func.func @transform_1(%arg0: i32) -> (i32, i32) {
    %c0_i32 = arith.constant 0 : i32
    %c0_i32_0 = arith.constant 0 : i32
    %c0_i32_1 = arith.constant 0 : i32
    return %c0_i32, %c0_i32_0 : i32, i32
  }
  func.func @transform_2(%arg0: i32) -> (i32, i32) {
    %c0_i32 = arith.constant 0 : i32
    %c0_i32_0 = arith.constant 0 : i32
    %c0_i32_1 = arith.constant 0 : i32
    return %c0_i32, %c0_i32_0 : i32, i32
  }
  func.func @transform_3(%arg0: i32) -> (i32, i32) {
    %c0_i32 = arith.constant 0 : i32
    %c0_i32_0 = arith.constant 0 : i32
    %c0_i32_1 = arith.constant 0 : i32
    return %c0_i32, %c0_i32_0 : i32, i32
  }
  func.func @transform_4(%arg0: i32) -> (i32, i32) {
    %c0_i32 = arith.constant 0 : i32
    %c0_i32_0 = arith.constant 0 : i32
    %c0_i32_1 = arith.constant 0 : i32
    return %c0_i32, %c0_i32_0 : i32, i32
  }
  func.func @transform_5(%arg0: i32) -> (i32, i32) {
    %c0_i32 = arith.constant 0 : i32
    %c0_i32_0 = arith.constant 0 : i32
    %c0_i32_1 = arith.constant 0 : i32
    return %c0_i32, %c0_i32_0 : i32, i32
  }
  func.func @transform_6(%arg0: i32) -> (i32, i32) {
    %c0_i32 = arith.constant 0 : i32
    %c0_i32_0 = arith.constant 0 : i32
    %c0_i32_1 = arith.constant 0 : i32
    return %c0_i32, %c0_i32_0 : i32, i32
  }
  func.func @transform_7(%arg0: i32) -> (i32, i32) {
    %c0_i32 = arith.constant 0 : i32
    %c0_i32_0 = arith.constant 0 : i32
    %c0_i32_1 = arith.constant 0 : i32
    return %c0_i32, %c0_i32_0 : i32, i32
  }
  func.func @transform_8(%arg0: i32) -> (i32, i32) {
    %c0_i32 = arith.constant 0 : i32
    %c0_i32_0 = arith.constant 0 : i32
    %c0_i32_1 = arith.constant 0 : i32
    return %c0_i32, %c0_i32_0 : i32, i32
  }
  func.func @transform_9(%arg0: i32) -> (i32, i32) {
    %c0_i32 = arith.constant 0 : i32
    %c0_i32_0 = arith.constant 0 : i32
    return %arg0, %c0_i32 : i32, i32
  }
}

module attributes {stable_mosaic.version = 11 : i64} {
  func.func @_mlp_kernel(%arg0: i32, %arg1: memref<72x128xbf16, #tpu.memory_space<vmem>>, %arg2: memref<128x128xbf16, #tpu.memory_space<vmem>>, %arg3: memref<1x128xf32, #tpu.memory_space<vmem>>, %arg4: memref<128x128xbf16, #tpu.memory_space<vmem>>, %arg5: memref<1x128xf32, #tpu.memory_space<vmem>>, %arg6: memref<128x128xbf16, #tpu.memory_space<vmem>>, %arg7: memref<1x128xf32, #tpu.memory_space<vmem>>, %arg8: memref<1x128xf32, #tpu.memory_space<vmem>>, %arg9: memref<1x128xf32, #tpu.memory_space<vmem>>, %arg10: memref<72x128xbf16, #tpu.memory_space<vmem>>) attributes {dimension_semantics = [#tpu.dimension_semantics<parallel>], iteration_bounds = array<i64: 1>, scalar_prefetch = 0 : i64, scratch_operands = 0 : i64, tpu.core_type = #tpu.core_type<tc>, window_params = [{transform_indices = @transform_0, window_bounds = array<i64: 72, 128>}, {pipeline_mode = #tpu.pipeline_mode<synchronous>, transform_indices = @transform_1, window_bounds = array<i64: 128, 128>}, {pipeline_mode = #tpu.pipeline_mode<synchronous>, transform_indices = @transform_2, window_bounds = array<i64: 1, 128>}, {pipeline_mode = #tpu.pipeline_mode<synchronous>, transform_indices = @transform_3, window_bounds = array<i64: 128, 128>}, {pipeline_mode = #tpu.pipeline_mode<synchronous>, transform_indices = @transform_4, window_bounds = array<i64: 1, 128>}, {pipeline_mode = #tpu.pipeline_mode<synchronous>, transform_indices = @transform_5, window_bounds = array<i64: 128, 128>}, {pipeline_mode = #tpu.pipeline_mode<synchronous>, transform_indices = @transform_6, window_bounds = array<i64: 1, 128>}, {pipeline_mode = #tpu.pipeline_mode<synchronous>, transform_indices = @transform_7, window_bounds = array<i64: 1, 128>}, {pipeline_mode = #tpu.pipeline_mode<synchronous>, transform_indices = @transform_8, window_bounds = array<i64: 1, 128>}, {transform_indices = @transform_9, window_bounds = array<i64: 72, 128>}]} {
    %c0 = arith.constant 0 : index
    %c0_0 = arith.constant 0 : index
    %0 = vector.load %arg1[%c0, %c0_0] : memref<72x128xbf16, #tpu.memory_space<vmem>>, vector<72x128xbf16>
    %c0_1 = arith.constant 0 : index
    %c0_2 = arith.constant 0 : index
    %1 = vector.load %arg2[%c0_1, %c0_2] : memref<128x128xbf16, #tpu.memory_space<vmem>>, vector<128x128xbf16>
    %cst = arith.constant dense<0.000000e+00> : vector<72x128xf32>
    %2 = tpu.matmul %0, %1, %cst {dimension_numbers = #tpu.dot_dimension_numbers<[1], [0], [0], [1], [0, 0, 1, 1], [], []>} : vector<72x128xbf16>, vector<128x128xbf16>, vector<72x128xf32> -> vector<72x128xf32>
    %c0_3 = arith.constant 0 : index
    %c0_4 = arith.constant 0 : index
    %3 = vector.load %arg3[%c0_3, %c0_4] : memref<1x128xf32, #tpu.memory_space<vmem>>, vector<1x128xf32>
    %4 = vector.broadcast %3 : vector<1x128xf32> to vector<72x128xf32>
    %5 = arith.addf %2, %4 : vector<72x128xf32>
    %cst_5 = arith.constant 0.000000e+00 : f32
    %6 = vector.broadcast %cst_5 : f32 to vector<72x128xf32>
    %7 = arith.maximumf %5, %6 : vector<72x128xf32>
    %8 = arith.truncf %7 : vector<72x128xf32> to vector<72x128xbf16>
    %c0_6 = arith.constant 0 : index
    %c0_7 = arith.constant 0 : index
    %9 = vector.load %arg4[%c0_6, %c0_7] : memref<128x128xbf16, #tpu.memory_space<vmem>>, vector<128x128xbf16>
    %cst_8 = arith.constant dense<0.000000e+00> : vector<72x128xf32>
    %10 = tpu.matmul %8, %9, %cst_8 {dimension_numbers = #tpu.dot_dimension_numbers<[1], [0], [0], [1], [0, 0, 1, 1], [], []>} : vector<72x128xbf16>, vector<128x128xbf16>, vector<72x128xf32> -> vector<72x128xf32>
    %c0_9 = arith.constant 0 : index
    %c0_10 = arith.constant 0 : index
    %11 = vector.load %arg5[%c0_9, %c0_10] : memref<1x128xf32, #tpu.memory_space<vmem>>, vector<1x128xf32>
    %12 = vector.broadcast %11 : vector<1x128xf32> to vector<72x128xf32>
    %13 = arith.addf %10, %12 : vector<72x128xf32>
    %cst_11 = arith.constant 0.000000e+00 : f32
    %14 = vector.broadcast %cst_11 : f32 to vector<72x128xf32>
    %15 = arith.maximumf %13, %14 : vector<72x128xf32>
    %16 = arith.truncf %15 : vector<72x128xf32> to vector<72x128xbf16>
    %c0_12 = arith.constant 0 : index
    %c0_13 = arith.constant 0 : index
    %17 = vector.load %arg6[%c0_12, %c0_13] : memref<128x128xbf16, #tpu.memory_space<vmem>>, vector<128x128xbf16>
    %cst_14 = arith.constant dense<0.000000e+00> : vector<72x128xf32>
    %18 = tpu.matmul %16, %17, %cst_14 {dimension_numbers = #tpu.dot_dimension_numbers<[1], [0], [0], [1], [0, 0, 1, 1], [], []>} : vector<72x128xbf16>, vector<128x128xbf16>, vector<72x128xf32> -> vector<72x128xf32>
    %c0_15 = arith.constant 0 : index
    %c0_16 = arith.constant 0 : index
    %19 = vector.load %arg7[%c0_15, %c0_16] : memref<1x128xf32, #tpu.memory_space<vmem>>, vector<1x128xf32>
    %20 = vector.broadcast %19 : vector<1x128xf32> to vector<72x128xf32>
    %21 = arith.addf %18, %20 : vector<72x128xf32>
    %22 = tpu.iota {dimensions = array<i32: 1>} : vector<72x128xi32>
    %c0_17 = arith.constant 0 : index
    %c0_18 = arith.constant 0 : index
    %23 = vector.load %arg8[%c0_17, %c0_18] : memref<1x128xf32, #tpu.memory_space<vmem>>, vector<1x128xf32>
    %c0_19 = arith.constant 0 : index
    %c0_20 = arith.constant 0 : index
    %24 = vector.load %arg9[%c0_19, %c0_20] : memref<1x128xf32, #tpu.memory_space<vmem>>, vector<1x128xf32>
    %c32_i32 = arith.constant 32 : i32
    %25 = vector.broadcast %c32_i32 : i32 to vector<72x128xi32>
    %26 = arith.cmpi slt, %22, %25 : vector<72x128xi32>
    %27 = arith.extui %26 : vector<72x128xi1> to vector<72x128xi32>
    %28 = arith.sitofp %27 : vector<72x128xi32> to vector<72x128xf32>
    %cst_21 = arith.constant dense<0.000000e+00> : vector<72xf32>
    %29 = vector.multi_reduction <add>, %21, %cst_21 [1] : vector<72x128xf32> to vector<72xf32>
    %30 = vector.shape_cast %29 : vector<72xf32> to vector<72x1xf32>
    %cst_22 = arith.constant 3.125000e-02 : f32
    %31 = vector.broadcast %cst_22 : f32 to vector<72x1xf32>
    %32 = arith.mulf %30, %31 : vector<72x1xf32>
    %33 = vector.broadcast %32 : vector<72x1xf32> to vector<72x128xf32>
    %34 = arith.subf %21, %33 : vector<72x128xf32>
    %35 = arith.mulf %34, %28 : vector<72x128xf32>
    %36 = arith.mulf %35, %35 : vector<72x128xf32>
    %cst_23 = arith.constant dense<0.000000e+00> : vector<72xf32>
    %37 = vector.multi_reduction <add>, %36, %cst_23 [1] : vector<72x128xf32> to vector<72xf32>
    %38 = vector.shape_cast %37 : vector<72xf32> to vector<72x1xf32>
    %cst_24 = arith.constant 3.125000e-02 : f32
    %39 = vector.broadcast %cst_24 : f32 to vector<72x1xf32>
    %40 = arith.mulf %38, %39 : vector<72x1xf32>
    %cst_25 = arith.constant 9.99999974E-6 : f32
    %41 = vector.broadcast %cst_25 : f32 to vector<72x1xf32>
    %42 = arith.addf %40, %41 : vector<72x1xf32>
    %43 = math.rsqrt %42 : vector<72x1xf32>
    %44 = vector.broadcast %43 : vector<72x1xf32> to vector<72x128xf32>
    %45 = arith.mulf %35, %44 : vector<72x128xf32>
    %46 = vector.broadcast %23 : vector<1x128xf32> to vector<72x128xf32>
    %47 = arith.mulf %45, %46 : vector<72x128xf32>
    %48 = vector.broadcast %24 : vector<1x128xf32> to vector<72x128xf32>
    %49 = arith.addf %47, %48 : vector<72x128xf32>
    %50 = arith.truncf %49 : vector<72x128xf32> to vector<72x128xbf16>
    %c0_26 = arith.constant 0 : index
    %c0_27 = arith.constant 0 : index
    %51 = vector.load %arg10[%c0_26, %c0_27] : memref<72x128xbf16, #tpu.memory_space<vmem>>, vector<72x128xbf16>
    tpu.vector_store %arg10[%c0_26, %c0_27], %50 {strides = array<i32>} : memref<72x128xbf16, #tpu.memory_space<vmem>>, vector<72x128xbf16>,
    return
  }
  func.func @transform_0(%arg0: i32) -> (i32, i32) {
    %c0_i32 = arith.constant 0 : i32
    %c0_i32_0 = arith.constant 0 : i32
    return %arg0, %c0_i32 : i32, i32
  }
  func.func @transform_1(%arg0: i32) -> (i32, i32) {
    %c0_i32 = arith.constant 0 : i32
    %c0_i32_0 = arith.constant 0 : i32
    %c0_i32_1 = arith.constant 0 : i32
    return %c0_i32, %c0_i32_0 : i32, i32
  }
  func.func @transform_2(%arg0: i32) -> (i32, i32) {
    %c0_i32 = arith.constant 0 : i32
    %c0_i32_0 = arith.constant 0 : i32
    %c0_i32_1 = arith.constant 0 : i32
    return %c0_i32, %c0_i32_0 : i32, i32
  }
  func.func @transform_3(%arg0: i32) -> (i32, i32) {
    %c0_i32 = arith.constant 0 : i32
    %c0_i32_0 = arith.constant 0 : i32
    %c0_i32_1 = arith.constant 0 : i32
    return %c0_i32, %c0_i32_0 : i32, i32
  }
  func.func @transform_4(%arg0: i32) -> (i32, i32) {
    %c0_i32 = arith.constant 0 : i32
    %c0_i32_0 = arith.constant 0 : i32
    %c0_i32_1 = arith.constant 0 : i32
    return %c0_i32, %c0_i32_0 : i32, i32
  }
  func.func @transform_5(%arg0: i32) -> (i32, i32) {
    %c0_i32 = arith.constant 0 : i32
    %c0_i32_0 = arith.constant 0 : i32
    %c0_i32_1 = arith.constant 0 : i32
    return %c0_i32, %c0_i32_0 : i32, i32
  }
  func.func @transform_6(%arg0: i32) -> (i32, i32) {
    %c0_i32 = arith.constant 0 : i32
    %c0_i32_0 = arith.constant 0 : i32
    %c0_i32_1 = arith.constant 0 : i32
    return %c0_i32, %c0_i32_0 : i32, i32
  }
  func.func @transform_7(%arg0: i32) -> (i32, i32) {
    %c0_i32 = arith.constant 0 : i32
    %c0_i32_0 = arith.constant 0 : i32
    %c0_i32_1 = arith.constant 0 : i32
    return %c0_i32, %c0_i32_0 : i32, i32
  }
  func.func @transform_8(%arg0: i32) -> (i32, i32) {
    %c0_i32 = arith.constant 0 : i32
    %c0_i32_0 = arith.constant 0 : i32
    %c0_i32_1 = arith.constant 0 : i32
    return %c0_i32, %c0_i32_0 : i32, i32
  }
  func.func @transform_9(%arg0: i32) -> (i32, i32) {
    %c0_i32 = arith.constant 0 : i32
    %c0_i32_0 = arith.constant 0 : i32
    return %arg0, %c0_i32 : i32, i32
  }
}

module attributes {stable_mosaic.version = 11 : i64} {
  func.func @_mlp_kernel(%arg0: i32, %arg1: memref<72x128xbf16, #tpu.memory_space<vmem>>, %arg2: memref<128x128xbf16, #tpu.memory_space<vmem>>, %arg3: memref<1x128xf32, #tpu.memory_space<vmem>>, %arg4: memref<128x128xbf16, #tpu.memory_space<vmem>>, %arg5: memref<1x128xf32, #tpu.memory_space<vmem>>, %arg6: memref<128x128xbf16, #tpu.memory_space<vmem>>, %arg7: memref<1x128xf32, #tpu.memory_space<vmem>>, %arg8: memref<1x128xf32, #tpu.memory_space<vmem>>, %arg9: memref<1x128xf32, #tpu.memory_space<vmem>>, %arg10: memref<72x128xbf16, #tpu.memory_space<vmem>>) attributes {dimension_semantics = [#tpu.dimension_semantics<parallel>], iteration_bounds = array<i64: 1>, scalar_prefetch = 0 : i64, scratch_operands = 0 : i64, tpu.core_type = #tpu.core_type<tc>, window_params = [{transform_indices = @transform_0, window_bounds = array<i64: 72, 128>}, {pipeline_mode = #tpu.pipeline_mode<synchronous>, transform_indices = @transform_1, window_bounds = array<i64: 128, 128>}, {pipeline_mode = #tpu.pipeline_mode<synchronous>, transform_indices = @transform_2, window_bounds = array<i64: 1, 128>}, {pipeline_mode = #tpu.pipeline_mode<synchronous>, transform_indices = @transform_3, window_bounds = array<i64: 128, 128>}, {pipeline_mode = #tpu.pipeline_mode<synchronous>, transform_indices = @transform_4, window_bounds = array<i64: 1, 128>}, {pipeline_mode = #tpu.pipeline_mode<synchronous>, transform_indices = @transform_5, window_bounds = array<i64: 128, 128>}, {pipeline_mode = #tpu.pipeline_mode<synchronous>, transform_indices = @transform_6, window_bounds = array<i64: 1, 128>}, {pipeline_mode = #tpu.pipeline_mode<synchronous>, transform_indices = @transform_7, window_bounds = array<i64: 1, 128>}, {pipeline_mode = #tpu.pipeline_mode<synchronous>, transform_indices = @transform_8, window_bounds = array<i64: 1, 128>}, {transform_indices = @transform_9, window_bounds = array<i64: 72, 128>}]} {
    %c0 = arith.constant 0 : index
    %c0_0 = arith.constant 0 : index
    %0 = vector.load %arg1[%c0, %c0_0] : memref<72x128xbf16, #tpu.memory_space<vmem>>, vector<72x128xbf16>
    %c0_1 = arith.constant 0 : index
    %c0_2 = arith.constant 0 : index
    %1 = vector.load %arg2[%c0_1, %c0_2] : memref<128x128xbf16, #tpu.memory_space<vmem>>, vector<128x128xbf16>
    %cst = arith.constant dense<0.000000e+00> : vector<72x128xf32>
    %2 = tpu.matmul %0, %1, %cst {dimension_numbers = #tpu.dot_dimension_numbers<[1], [0], [0], [1], [0, 0, 1, 1], [], []>} : vector<72x128xbf16>, vector<128x128xbf16>, vector<72x128xf32> -> vector<72x128xf32>
    %c0_3 = arith.constant 0 : index
    %c0_4 = arith.constant 0 : index
    %3 = vector.load %arg3[%c0_3, %c0_4] : memref<1x128xf32, #tpu.memory_space<vmem>>, vector<1x128xf32>
    %4 = vector.broadcast %3 : vector<1x128xf32> to vector<72x128xf32>
    %5 = arith.addf %2, %4 : vector<72x128xf32>
    %cst_5 = arith.constant 0.000000e+00 : f32
    %6 = vector.broadcast %cst_5 : f32 to vector<72x128xf32>
    %7 = arith.maximumf %5, %6 : vector<72x128xf32>
    %8 = arith.truncf %7 : vector<72x128xf32> to vector<72x128xbf16>
    %c0_6 = arith.constant 0 : index
    %c0_7 = arith.constant 0 : index
    %9 = vector.load %arg4[%c0_6, %c0_7] : memref<128x128xbf16, #tpu.memory_space<vmem>>, vector<128x128xbf16>
    %cst_8 = arith.constant dense<0.000000e+00> : vector<72x128xf32>
    %10 = tpu.matmul %8, %9, %cst_8 {dimension_numbers = #tpu.dot_dimension_numbers<[1], [0], [0], [1], [0, 0, 1, 1], [], []>} : vector<72x128xbf16>, vector<128x128xbf16>, vector<72x128xf32> -> vector<72x128xf32>
    %c0_9 = arith.constant 0 : index
    %c0_10 = arith.constant 0 : index
    %11 = vector.load %arg5[%c0_9, %c0_10] : memref<1x128xf32, #tpu.memory_space<vmem>>, vector<1x128xf32>
    %12 = vector.broadcast %11 : vector<1x128xf32> to vector<72x128xf32>
    %13 = arith.addf %10, %12 : vector<72x128xf32>
    %cst_11 = arith.constant 0.000000e+00 : f32
    %14 = vector.broadcast %cst_11 : f32 to vector<72x128xf32>
    %15 = arith.maximumf %13, %14 : vector<72x128xf32>
    %16 = arith.truncf %15 : vector<72x128xf32> to vector<72x128xbf16>
    %c0_12 = arith.constant 0 : index
    %c0_13 = arith.constant 0 : index
    %17 = vector.load %arg6[%c0_12, %c0_13] : memref<128x128xbf16, #tpu.memory_space<vmem>>, vector<128x128xbf16>
    %cst_14 = arith.constant dense<0.000000e+00> : vector<72x128xf32>
    %18 = tpu.matmul %16, %17, %cst_14 {dimension_numbers = #tpu.dot_dimension_numbers<[1], [0], [0], [1], [0, 0, 1, 1], [], []>} : vector<72x128xbf16>, vector<128x128xbf16>, vector<72x128xf32> -> vector<72x128xf32>
    %c0_15 = arith.constant 0 : index
    %c0_16 = arith.constant 0 : index
    %19 = vector.load %arg7[%c0_15, %c0_16] : memref<1x128xf32, #tpu.memory_space<vmem>>, vector<1x128xf32>
    %20 = vector.broadcast %19 : vector<1x128xf32> to vector<72x128xf32>
    %21 = arith.addf %18, %20 : vector<72x128xf32>
    %22 = tpu.iota {dimensions = array<i32: 1>} : vector<72x128xi32>
    %c0_17 = arith.constant 0 : index
    %c0_18 = arith.constant 0 : index
    %23 = vector.load %arg8[%c0_17, %c0_18] : memref<1x128xf32, #tpu.memory_space<vmem>>, vector<1x128xf32>
    %c0_19 = arith.constant 0 : index
    %c0_20 = arith.constant 0 : index
    %24 = vector.load %arg9[%c0_19, %c0_20] : memref<1x128xf32, #tpu.memory_space<vmem>>, vector<1x128xf32>
    %c32_i32 = arith.constant 32 : i32
    %25 = vector.broadcast %c32_i32 : i32 to vector<72x128xi32>
    %26 = arith.cmpi slt, %22, %25 : vector<72x128xi32>
    %27 = arith.extui %26 : vector<72x128xi1> to vector<72x128xi32>
    %28 = arith.sitofp %27 : vector<72x128xi32> to vector<72x128xf32>
    %cst_21 = arith.constant dense<0.000000e+00> : vector<72xf32>
    %29 = vector.multi_reduction <add>, %21, %cst_21 [1] : vector<72x128xf32> to vector<72xf32>
    %30 = vector.shape_cast %29 : vector<72xf32> to vector<72x1xf32>
    %cst_22 = arith.constant 3.125000e-02 : f32
    %31 = vector.broadcast %cst_22 : f32 to vector<72x1xf32>
    %32 = arith.mulf %30, %31 : vector<72x1xf32>
    %33 = vector.broadcast %32 : vector<72x1xf32> to vector<72x128xf32>
    %34 = arith.subf %21, %33 : vector<72x128xf32>
    %35 = arith.mulf %34, %28 : vector<72x128xf32>
    %36 = arith.mulf %35, %35 : vector<72x128xf32>
    %cst_23 = arith.constant dense<0.000000e+00> : vector<72xf32>
    %37 = vector.multi_reduction <add>, %36, %cst_23 [1] : vector<72x128xf32> to vector<72xf32>
    %38 = vector.shape_cast %37 : vector<72xf32> to vector<72x1xf32>
    %cst_24 = arith.constant 3.125000e-02 : f32
    %39 = vector.broadcast %cst_24 : f32 to vector<72x1xf32>
    %40 = arith.mulf %38, %39 : vector<72x1xf32>
    %cst_25 = arith.constant 9.99999974E-6 : f32
    %41 = vector.broadcast %cst_25 : f32 to vector<72x1xf32>
    %42 = arith.addf %40, %41 : vector<72x1xf32>
    %43 = math.rsqrt %42 : vector<72x1xf32>
    %44 = vector.broadcast %43 : vector<72x1xf32> to vector<72x128xf32>
    %45 = arith.mulf %35, %44 : vector<72x128xf32>
    %46 = vector.broadcast %23 : vector<1x128xf32> to vector<72x128xf32>
    %47 = arith.mulf %45, %46 : vector<72x128xf32>
    %48 = vector.broadcast %24 : vector<1x128xf32> to vector<72x128xf32>
    %49 = arith.addf %47, %48 : vector<72x128xf32>
    %c32_i32_26 = arith.constant 32 : i32
    %50 = vector.broadcast %c32_i32_26 : i32 to vector<72x128xi32>
    %51 = arith.cmpi slt, %22, %50 : vector<72x128xi32>
    %52 = arith.extui %51 : vector<72x128xi1> to vector<72x128xi32>
    %53 = arith.sitofp %52 : vector<72x128xi32> to vector<72x128xf32>
    %54 = arith.extf %0 : vector<72x128xbf16> to vector<72x128xf32>
    %55 = arith.mulf %54, %53 : vector<72x128xf32>
    %56 = arith.addf %49, %55 : vector<72x128xf32>
    %57 = arith.truncf %56 : vector<72x128xf32> to vector<72x128xbf16>
    %c0_27 = arith.constant 0 : index
    %c0_28 = arith.constant 0 : index
    %58 = vector.load %arg10[%c0_27, %c0_28] : memref<72x128xbf16, #tpu.memory_space<vmem>>, vector<72x128xbf16>
    tpu.vector_store %arg10[%c0_27, %c0_28], %57 {strides = array<i32>} : memref<72x128xbf16, #tpu.memory_space<vmem>>, vector<72x128xbf16>,
    return
  }
  func.func @transform_0(%arg0: i32) -> (i32, i32) {
    %c0_i32 = arith.constant 0 : i32
    %c0_i32_0 = arith.constant 0 : i32
    return %arg0, %c0_i32 : i32, i32
  }
  func.func @transform_1(%arg0: i32) -> (i32, i32) {
    %c0_i32 = arith.constant 0 : i32
    %c0_i32_0 = arith.constant 0 : i32
    %c0_i32_1 = arith.constant 0 : i32
    return %c0_i32, %c0_i32_0 : i32, i32
  }
  func.func @transform_2(%arg0: i32) -> (i32, i32) {
    %c0_i32 = arith.constant 0 : i32
    %c0_i32_0 = arith.constant 0 : i32
    %c0_i32_1 = arith.constant 0 : i32
    return %c0_i32, %c0_i32_0 : i32, i32
  }
  func.func @transform_3(%arg0: i32) -> (i32, i32) {
    %c0_i32 = arith.constant 0 : i32
    %c0_i32_0 = arith.constant 0 : i32
    %c0_i32_1 = arith.constant 0 : i32
    return %c0_i32, %c0_i32_0 : i32, i32
  }
  func.func @transform_4(%arg0: i32) -> (i32, i32) {
    %c0_i32 = arith.constant 0 : i32
    %c0_i32_0 = arith.constant 0 : i32
    %c0_i32_1 = arith.constant 0 : i32
    return %c0_i32, %c0_i32_0 : i32, i32
  }
  func.func @transform_5(%arg0: i32) -> (i32, i32) {
    %c0_i32 = arith.constant 0 : i32
    %c0_i32_0 = arith.constant 0 : i32
    %c0_i32_1 = arith.constant 0 : i32
    return %c0_i32, %c0_i32_0 : i32, i32
  }
  func.func @transform_6(%arg0: i32) -> (i32, i32) {
    %c0_i32 = arith.constant 0 : i32
    %c0_i32_0 = arith.constant 0 : i32
    %c0_i32_1 = arith.constant 0 : i32
    return %c0_i32, %c0_i32_0 : i32, i32
  }
  func.func @transform_7(%arg0: i32) -> (i32, i32) {
    %c0_i32 = arith.constant 0 : i32
    %c0_i32_0 = arith.constant 0 : i32
    %c0_i32_1 = arith.constant 0 : i32
    return %c0_i32, %c0_i32_0 : i32, i32
  }
  func.func @transform_8(%arg0: i32) -> (i32, i32) {
    %c0_i32 = arith.constant 0 : i32
    %c0_i32_0 = arith.constant 0 : i32
    %c0_i32_1 = arith.constant 0 : i32
    return %c0_i32, %c0_i32_0 : i32, i32
  }
  func.func @transform_9(%arg0: i32) -> (i32, i32) {
    %c0_i32 = arith.constant 0 : i32
    %c0_i32_0 = arith.constant 0 : i32
    return %arg0, %c0_i32 : i32, i32
  }
}

module attributes {stable_mosaic.version = 11 : i64} {
  func.func @_segment_sum_kernel(%arg0: i32, %arg1: i32, %arg2: memref<1x72xi32, #tpu.memory_space<vmem>>, %arg3: memref<72x128xbf16, #tpu.memory_space<vmem>>, %arg4: memref<32x128xbf16, #tpu.memory_space<vmem>>, %arg5: memref<32x128xf32, #tpu.memory_space<vmem>>) attributes {dimension_semantics = [#tpu.dimension_semantics<parallel>, #tpu.dimension_semantics<arbitrary>], iteration_bounds = array<i64: 1, 1>, scalar_prefetch = 0 : i64, scratch_operands = 1 : i64, tpu.core_type = #tpu.core_type<tc>, window_params = [{transform_indices = @transform_0, window_bounds = array<i64: 1, 72>}, {transform_indices = @transform_1, window_bounds = array<i64: 72, 128>}, {transform_indices = @transform_2, window_bounds = array<i64: 32, 128>}]} {
    %c0_i32 = arith.constant 0 : i32
    %0 = arith.cmpi eq, %arg1, %c0_i32 : i32
    %1 = arith.extui %0 : i1 to i32
    %c0_i32_0 = arith.constant 0 : i32
    %2 = arith.cmpi ne, %1, %c0_i32_0 : i32
    scf.if %2 {
      %cst_12 = arith.constant 0.000000e+00 : f32
      %22 = vector.broadcast %cst_12 : f32 to vector<32x128xf32>
      %c0_13 = arith.constant 0 : index
      %c0_14 = arith.constant 0 : index
      %23 = vector.load %arg5[%c0_13, %c0_14] : memref<32x128xf32, #tpu.memory_space<vmem>>, vector<32x128xf32>
      tpu.vector_store %arg5[%c0_13, %c0_14], %22 {strides = array<i32>} : memref<32x128xf32, #tpu.memory_space<vmem>>, vector<32x128xf32>,
    } else {
    }
    %c32_i32 = arith.constant 32 : i32
    %3 = arith.muli %arg0, %c32_i32 : i32
    %4 = tpu.iota {dimensions = array<i32: 0>} : vector<32x72xi32>
    %5 = vector.broadcast %3 : i32 to vector<32x72xi32>
    %6 = arith.addi %5, %4 : vector<32x72xi32>
    %c0 = arith.constant 0 : index
    %c0_1 = arith.constant 0 : index
    %7 = vector.load %arg2[%c0, %c0_1] : memref<1x72xi32, #tpu.memory_space<vmem>>, vector<1x72xi32>
    %8 = vector.broadcast %7 : vector<1x72xi32> to vector<32x72xi32>
    %9 = arith.cmpi eq, %6, %8 : vector<32x72xi32>
    %cst = arith.constant 1.000000e+00 : f32
    %cst_2 = arith.constant 0.000000e+00 : f32
    %10 = vector.broadcast %cst : f32 to vector<32x72xf32>
    %11 = vector.broadcast %cst_2 : f32 to vector<32x72xf32>
    %12 = arith.select %9, %10, %11 : vector<32x72xi1>, vector<32x72xf32>
    %13 = arith.truncf %12 : vector<32x72xf32> to vector<32x72xbf16>
    %c0_3 = arith.constant 0 : index
    %c0_4 = arith.constant 0 : index
    %14 = vector.load %arg5[%c0_3, %c0_4] : memref<32x128xf32, #tpu.memory_space<vmem>>, vector<32x128xf32>
    %c0_5 = arith.constant 0 : index
    %c0_6 = arith.constant 0 : index
    %15 = vector.load %arg3[%c0_5, %c0_6] : memref<72x128xbf16, #tpu.memory_space<vmem>>, vector<72x128xbf16>
    %cst_7 = arith.constant dense<0.000000e+00> : vector<32x128xf32>
    %16 = tpu.matmul %13, %15, %cst_7 {dimension_numbers = #tpu.dot_dimension_numbers<[1], [0], [0], [1], [0, 0, 1, 1], [], []>} : vector<32x72xbf16>, vector<72x128xbf16>, vector<32x128xf32> -> vector<32x128xf32>
    %17 = arith.addf %14, %16 : vector<32x128xf32>
    %c0_8 = arith.constant 0 : index
    %c0_9 = arith.constant 0 : index
    %18 = vector.load %arg5[%c0_8, %c0_9] : memref<32x128xf32, #tpu.memory_space<vmem>>, vector<32x128xf32>
    tpu.vector_store %arg5[%c0_8, %c0_9], %17 {strides = array<i32>} : memref<32x128xf32, #tpu.memory_space<vmem>>, vector<32x128xf32>,
    %c0_i32_10 = arith.constant 0 : i32
    %19 = arith.cmpi eq, %arg1, %c0_i32_10 : i32
    %20 = arith.extui %19 : i1 to i32
    %c0_i32_11 = arith.constant 0 : i32
    %21 = arith.cmpi ne, %20, %c0_i32_11 : i32
    scf.if %21 {
      %c0_12 = arith.constant 0 : index
      %c0_13 = arith.constant 0 : index
      %22 = vector.load %arg5[%c0_12, %c0_13] : memref<32x128xf32, #tpu.memory_space<vmem>>, vector<32x128xf32>
      %23 = arith.truncf %22 : vector<32x128xf32> to vector<32x128xbf16>
      %c0_14 = arith.constant 0 : index
      %c0_15 = arith.constant 0 : index
      %24 = vector.load %arg4[%c0_14, %c0_15] : memref<32x128xbf16, #tpu.memory_space<vmem>>, vector<32x128xbf16>
      tpu.vector_store %arg4[%c0_14, %c0_15], %23 {strides = array<i32>} : memref<32x128xbf16, #tpu.memory_space<vmem>>, vector<32x128xbf16>,
    } else {
    }
    return
  }
  func.func @transform_0(%arg0: i32, %arg1: i32) -> (i32, i32) {
    %c0_i32 = arith.constant 0 : i32
    %c0_i32_0 = arith.constant 0 : i32
    return %c0_i32, %arg1 : i32, i32
  }
  func.func @transform_1(%arg0: i32, %arg1: i32) -> (i32, i32) {
    %c0_i32 = arith.constant 0 : i32
    %c0_i32_0 = arith.constant 0 : i32
    return %arg1, %c0_i32 : i32, i32
  }
  func.func @transform_2(%arg0: i32, %arg1: i32) -> (i32, i32) {
    %c0_i32 = arith.constant 0 : i32
    %c0_i32_0 = arith.constant 0 : i32
    return %arg0, %c0_i32 : i32, i32
  }
}

module attributes {stable_mosaic.version = 11 : i64} {
  func.func @_mlp_kernel(%arg0: i32, %arg1: memref<32x128xbf16, #tpu.memory_space<vmem>>, %arg2: memref<128x128xbf16, #tpu.memory_space<vmem>>, %arg3: memref<1x128xf32, #tpu.memory_space<vmem>>, %arg4: memref<128x128xbf16, #tpu.memory_space<vmem>>, %arg5: memref<1x128xf32, #tpu.memory_space<vmem>>, %arg6: memref<128x128xbf16, #tpu.memory_space<vmem>>, %arg7: memref<1x128xf32, #tpu.memory_space<vmem>>, %arg8: memref<1x128xf32, #tpu.memory_space<vmem>>, %arg9: memref<1x128xf32, #tpu.memory_space<vmem>>, %arg10: memref<32x128xbf16, #tpu.memory_space<vmem>>) attributes {dimension_semantics = [#tpu.dimension_semantics<parallel>], iteration_bounds = array<i64: 1>, scalar_prefetch = 0 : i64, scratch_operands = 0 : i64, tpu.core_type = #tpu.core_type<tc>, window_params = [{transform_indices = @transform_0, window_bounds = array<i64: 32, 128>}, {pipeline_mode = #tpu.pipeline_mode<synchronous>, transform_indices = @transform_1, window_bounds = array<i64: 128, 128>}, {pipeline_mode = #tpu.pipeline_mode<synchronous>, transform_indices = @transform_2, window_bounds = array<i64: 1, 128>}, {pipeline_mode = #tpu.pipeline_mode<synchronous>, transform_indices = @transform_3, window_bounds = array<i64: 128, 128>}, {pipeline_mode = #tpu.pipeline_mode<synchronous>, transform_indices = @transform_4, window_bounds = array<i64: 1, 128>}, {pipeline_mode = #tpu.pipeline_mode<synchronous>, transform_indices = @transform_5, window_bounds = array<i64: 128, 128>}, {pipeline_mode = #tpu.pipeline_mode<synchronous>, transform_indices = @transform_6, window_bounds = array<i64: 1, 128>}, {pipeline_mode = #tpu.pipeline_mode<synchronous>, transform_indices = @transform_7, window_bounds = array<i64: 1, 128>}, {pipeline_mode = #tpu.pipeline_mode<synchronous>, transform_indices = @transform_8, window_bounds = array<i64: 1, 128>}, {transform_indices = @transform_9, window_bounds = array<i64: 32, 128>}]} {
    %c0 = arith.constant 0 : index
    %c0_0 = arith.constant 0 : index
    %0 = vector.load %arg1[%c0, %c0_0] : memref<32x128xbf16, #tpu.memory_space<vmem>>, vector<32x128xbf16>
    %c0_1 = arith.constant 0 : index
    %c0_2 = arith.constant 0 : index
    %1 = vector.load %arg2[%c0_1, %c0_2] : memref<128x128xbf16, #tpu.memory_space<vmem>>, vector<128x128xbf16>
    %cst = arith.constant dense<0.000000e+00> : vector<32x128xf32>
    %2 = tpu.matmul %0, %1, %cst {dimension_numbers = #tpu.dot_dimension_numbers<[1], [0], [0], [1], [0, 0, 1, 1], [], []>} : vector<32x128xbf16>, vector<128x128xbf16>, vector<32x128xf32> -> vector<32x128xf32>
    %c0_3 = arith.constant 0 : index
    %c0_4 = arith.constant 0 : index
    %3 = vector.load %arg3[%c0_3, %c0_4] : memref<1x128xf32, #tpu.memory_space<vmem>>, vector<1x128xf32>
    %4 = vector.broadcast %3 : vector<1x128xf32> to vector<32x128xf32>
    %5 = arith.addf %2, %4 : vector<32x128xf32>
    %cst_5 = arith.constant 0.000000e+00 : f32
    %6 = vector.broadcast %cst_5 : f32 to vector<32x128xf32>
    %7 = arith.maximumf %5, %6 : vector<32x128xf32>
    %8 = arith.truncf %7 : vector<32x128xf32> to vector<32x128xbf16>
    %c0_6 = arith.constant 0 : index
    %c0_7 = arith.constant 0 : index
    %9 = vector.load %arg4[%c0_6, %c0_7] : memref<128x128xbf16, #tpu.memory_space<vmem>>, vector<128x128xbf16>
    %cst_8 = arith.constant dense<0.000000e+00> : vector<32x128xf32>
    %10 = tpu.matmul %8, %9, %cst_8 {dimension_numbers = #tpu.dot_dimension_numbers<[1], [0], [0], [1], [0, 0, 1, 1], [], []>} : vector<32x128xbf16>, vector<128x128xbf16>, vector<32x128xf32> -> vector<32x128xf32>
    %c0_9 = arith.constant 0 : index
    %c0_10 = arith.constant 0 : index
    %11 = vector.load %arg5[%c0_9, %c0_10] : memref<1x128xf32, #tpu.memory_space<vmem>>, vector<1x128xf32>
    %12 = vector.broadcast %11 : vector<1x128xf32> to vector<32x128xf32>
    %13 = arith.addf %10, %12 : vector<32x128xf32>
    %cst_11 = arith.constant 0.000000e+00 : f32
    %14 = vector.broadcast %cst_11 : f32 to vector<32x128xf32>
    %15 = arith.maximumf %13, %14 : vector<32x128xf32>
    %16 = arith.truncf %15 : vector<32x128xf32> to vector<32x128xbf16>
    %c0_12 = arith.constant 0 : index
    %c0_13 = arith.constant 0 : index
    %17 = vector.load %arg6[%c0_12, %c0_13] : memref<128x128xbf16, #tpu.memory_space<vmem>>, vector<128x128xbf16>
    %cst_14 = arith.constant dense<0.000000e+00> : vector<32x128xf32>
    %18 = tpu.matmul %16, %17, %cst_14 {dimension_numbers = #tpu.dot_dimension_numbers<[1], [0], [0], [1], [0, 0, 1, 1], [], []>} : vector<32x128xbf16>, vector<128x128xbf16>, vector<32x128xf32> -> vector<32x128xf32>
    %c0_15 = arith.constant 0 : index
    %c0_16 = arith.constant 0 : index
    %19 = vector.load %arg7[%c0_15, %c0_16] : memref<1x128xf32, #tpu.memory_space<vmem>>, vector<1x128xf32>
    %20 = vector.broadcast %19 : vector<1x128xf32> to vector<32x128xf32>
    %21 = arith.addf %18, %20 : vector<32x128xf32>
    %22 = tpu.iota {dimensions = array<i32: 1>} : vector<32x128xi32>
    %c0_17 = arith.constant 0 : index
    %c0_18 = arith.constant 0 : index
    %23 = vector.load %arg8[%c0_17, %c0_18] : memref<1x128xf32, #tpu.memory_space<vmem>>, vector<1x128xf32>
    %c0_19 = arith.constant 0 : index
    %c0_20 = arith.constant 0 : index
    %24 = vector.load %arg9[%c0_19, %c0_20] : memref<1x128xf32, #tpu.memory_space<vmem>>, vector<1x128xf32>
    %c32_i32 = arith.constant 32 : i32
    %25 = vector.broadcast %c32_i32 : i32 to vector<32x128xi32>
    %26 = arith.cmpi slt, %22, %25 : vector<32x128xi32>
    %27 = arith.extui %26 : vector<32x128xi1> to vector<32x128xi32>
    %28 = arith.sitofp %27 : vector<32x128xi32> to vector<32x128xf32>
    %cst_21 = arith.constant dense<0.000000e+00> : vector<32xf32>
    %29 = vector.multi_reduction <add>, %21, %cst_21 [1] : vector<32x128xf32> to vector<32xf32>
    %30 = vector.shape_cast %29 : vector<32xf32> to vector<32x1xf32>
    %cst_22 = arith.constant 3.125000e-02 : f32
    %31 = vector.broadcast %cst_22 : f32 to vector<32x1xf32>
    %32 = arith.mulf %30, %31 : vector<32x1xf32>
    %33 = vector.broadcast %32 : vector<32x1xf32> to vector<32x128xf32>
    %34 = arith.subf %21, %33 : vector<32x128xf32>
    %35 = arith.mulf %34, %28 : vector<32x128xf32>
    %36 = arith.mulf %35, %35 : vector<32x128xf32>
    %cst_23 = arith.constant dense<0.000000e+00> : vector<32xf32>
    %37 = vector.multi_reduction <add>, %36, %cst_23 [1] : vector<32x128xf32> to vector<32xf32>
    %38 = vector.shape_cast %37 : vector<32xf32> to vector<32x1xf32>
    %cst_24 = arith.constant 3.125000e-02 : f32
    %39 = vector.broadcast %cst_24 : f32 to vector<32x1xf32>
    %40 = arith.mulf %38, %39 : vector<32x1xf32>
    %cst_25 = arith.constant 9.99999974E-6 : f32
    %41 = vector.broadcast %cst_25 : f32 to vector<32x1xf32>
    %42 = arith.addf %40, %41 : vector<32x1xf32>
    %43 = math.rsqrt %42 : vector<32x1xf32>
    %44 = vector.broadcast %43 : vector<32x1xf32> to vector<32x128xf32>
    %45 = arith.mulf %35, %44 : vector<32x128xf32>
    %46 = vector.broadcast %23 : vector<1x128xf32> to vector<32x128xf32>
    %47 = arith.mulf %45, %46 : vector<32x128xf32>
    %48 = vector.broadcast %24 : vector<1x128xf32> to vector<32x128xf32>
    %49 = arith.addf %47, %48 : vector<32x128xf32>
    %c32_i32_26 = arith.constant 32 : i32
    %50 = vector.broadcast %c32_i32_26 : i32 to vector<32x128xi32>
    %51 = arith.cmpi slt, %22, %50 : vector<32x128xi32>
    %52 = arith.extui %51 : vector<32x128xi1> to vector<32x128xi32>
    %53 = arith.sitofp %52 : vector<32x128xi32> to vector<32x128xf32>
    %54 = arith.extf %0 : vector<32x128xbf16> to vector<32x128xf32>
    %55 = arith.mulf %54, %53 : vector<32x128xf32>
    %56 = arith.addf %49, %55 : vector<32x128xf32>
    %57 = arith.truncf %56 : vector<32x128xf32> to vector<32x128xbf16>
    %c0_27 = arith.constant 0 : index
    %c0_28 = arith.constant 0 : index
    %58 = vector.load %arg10[%c0_27, %c0_28] : memref<32x128xbf16, #tpu.memory_space<vmem>>, vector<32x128xbf16>
    tpu.vector_store %arg10[%c0_27, %c0_28], %57 {strides = array<i32>} : memref<32x128xbf16, #tpu.memory_space<vmem>>, vector<32x128xbf16>,
    return
  }
  func.func @transform_0(%arg0: i32) -> (i32, i32) {
    %c0_i32 = arith.constant 0 : i32
    %c0_i32_0 = arith.constant 0 : i32
    return %arg0, %c0_i32 : i32, i32
  }
  func.func @transform_1(%arg0: i32) -> (i32, i32) {
    %c0_i32 = arith.constant 0 : i32
    %c0_i32_0 = arith.constant 0 : i32
    %c0_i32_1 = arith.constant 0 : i32
    return %c0_i32, %c0_i32_0 : i32, i32
  }
  func.func @transform_2(%arg0: i32) -> (i32, i32) {
    %c0_i32 = arith.constant 0 : i32
    %c0_i32_0 = arith.constant 0 : i32
    %c0_i32_1 = arith.constant 0 : i32
    return %c0_i32, %c0_i32_0 : i32, i32
  }
  func.func @transform_3(%arg0: i32) -> (i32, i32) {
    %c0_i32 = arith.constant 0 : i32
    %c0_i32_0 = arith.constant 0 : i32
    %c0_i32_1 = arith.constant 0 : i32
    return %c0_i32, %c0_i32_0 : i32, i32
  }
  func.func @transform_4(%arg0: i32) -> (i32, i32) {
    %c0_i32 = arith.constant 0 : i32
    %c0_i32_0 = arith.constant 0 : i32
    %c0_i32_1 = arith.constant 0 : i32
    return %c0_i32, %c0_i32_0 : i32, i32
  }
  func.func @transform_5(%arg0: i32) -> (i32, i32) {
    %c0_i32 = arith.constant 0 : i32
    %c0_i32_0 = arith.constant 0 : i32
    %c0_i32_1 = arith.constant 0 : i32
    return %c0_i32, %c0_i32_0 : i32, i32
  }
  func.func @transform_6(%arg0: i32) -> (i32, i32) {
    %c0_i32 = arith.constant 0 : i32
    %c0_i32_0 = arith.constant 0 : i32
    %c0_i32_1 = arith.constant 0 : i32
    return %c0_i32, %c0_i32_0 : i32, i32
  }
  func.func @transform_7(%arg0: i32) -> (i32, i32) {
    %c0_i32 = arith.constant 0 : i32
    %c0_i32_0 = arith.constant 0 : i32
    %c0_i32_1 = arith.constant 0 : i32
    return %c0_i32, %c0_i32_0 : i32, i32
  }
  func.func @transform_8(%arg0: i32) -> (i32, i32) {
    %c0_i32 = arith.constant 0 : i32
    %c0_i32_0 = arith.constant 0 : i32
    %c0_i32_1 = arith.constant 0 : i32
    return %c0_i32, %c0_i32_0 : i32, i32
  }
  func.func @transform_9(%arg0: i32) -> (i32, i32) {
    %c0_i32 = arith.constant 0 : i32
    %c0_i32_0 = arith.constant 0 : i32
    return %arg0, %c0_i32 : i32, i32
  }
}

module attributes {stable_mosaic.version = 11 : i64} {
  func.func @_mlp_kernel(%arg0: i32, %arg1: memref<32x128xbf16, #tpu.memory_space<vmem>>, %arg2: memref<128x128xbf16, #tpu.memory_space<vmem>>, %arg3: memref<1x128xf32, #tpu.memory_space<vmem>>, %arg4: memref<128x128xbf16, #tpu.memory_space<vmem>>, %arg5: memref<1x128xf32, #tpu.memory_space<vmem>>, %arg6: memref<128x128xbf16, #tpu.memory_space<vmem>>, %arg7: memref<1x128xf32, #tpu.memory_space<vmem>>, %arg8: memref<32x128xf32, #tpu.memory_space<vmem>>) attributes {dimension_semantics = [#tpu.dimension_semantics<parallel>], iteration_bounds = array<i64: 1>, scalar_prefetch = 0 : i64, scratch_operands = 0 : i64, tpu.core_type = #tpu.core_type<tc>, window_params = [{transform_indices = @transform_0, window_bounds = array<i64: 32, 128>}, {pipeline_mode = #tpu.pipeline_mode<synchronous>, transform_indices = @transform_1, window_bounds = array<i64: 128, 128>}, {pipeline_mode = #tpu.pipeline_mode<synchronous>, transform_indices = @transform_2, window_bounds = array<i64: 1, 128>}, {pipeline_mode = #tpu.pipeline_mode<synchronous>, transform_indices = @transform_3, window_bounds = array<i64: 128, 128>}, {pipeline_mode = #tpu.pipeline_mode<synchronous>, transform_indices = @transform_4, window_bounds = array<i64: 1, 128>}, {pipeline_mode = #tpu.pipeline_mode<synchronous>, transform_indices = @transform_5, window_bounds = array<i64: 128, 128>}, {pipeline_mode = #tpu.pipeline_mode<synchronous>, transform_indices = @transform_6, window_bounds = array<i64: 1, 128>}, {transform_indices = @transform_7, window_bounds = array<i64: 32, 128>}]} {
    %c0 = arith.constant 0 : index
    %c0_0 = arith.constant 0 : index
    %0 = vector.load %arg1[%c0, %c0_0] : memref<32x128xbf16, #tpu.memory_space<vmem>>, vector<32x128xbf16>
    %c0_1 = arith.constant 0 : index
    %c0_2 = arith.constant 0 : index
    %1 = vector.load %arg2[%c0_1, %c0_2] : memref<128x128xbf16, #tpu.memory_space<vmem>>, vector<128x128xbf16>
    %cst = arith.constant dense<0.000000e+00> : vector<32x128xf32>
    %2 = tpu.matmul %0, %1, %cst {dimension_numbers = #tpu.dot_dimension_numbers<[1], [0], [0], [1], [0, 0, 1, 1], [], []>} : vector<32x128xbf16>, vector<128x128xbf16>, vector<32x128xf32> -> vector<32x128xf32>
    %c0_3 = arith.constant 0 : index
    %c0_4 = arith.constant 0 : index
    %3 = vector.load %arg3[%c0_3, %c0_4] : memref<1x128xf32, #tpu.memory_space<vmem>>, vector<1x128xf32>
    %4 = vector.broadcast %3 : vector<1x128xf32> to vector<32x128xf32>
    %5 = arith.addf %2, %4 : vector<32x128xf32>
    %cst_5 = arith.constant 0.000000e+00 : f32
    %6 = vector.broadcast %cst_5 : f32 to vector<32x128xf32>
    %7 = arith.maximumf %5, %6 : vector<32x128xf32>
    %8 = arith.truncf %7 : vector<32x128xf32> to vector<32x128xbf16>
    %c0_6 = arith.constant 0 : index
    %c0_7 = arith.constant 0 : index
    %9 = vector.load %arg4[%c0_6, %c0_7] : memref<128x128xbf16, #tpu.memory_space<vmem>>, vector<128x128xbf16>
    %cst_8 = arith.constant dense<0.000000e+00> : vector<32x128xf32>
    %10 = tpu.matmul %8, %9, %cst_8 {dimension_numbers = #tpu.dot_dimension_numbers<[1], [0], [0], [1], [0, 0, 1, 1], [], []>} : vector<32x128xbf16>, vector<128x128xbf16>, vector<32x128xf32> -> vector<32x128xf32>
    %c0_9 = arith.constant 0 : index
    %c0_10 = arith.constant 0 : index
    %11 = vector.load %arg5[%c0_9, %c0_10] : memref<1x128xf32, #tpu.memory_space<vmem>>, vector<1x128xf32>
    %12 = vector.broadcast %11 : vector<1x128xf32> to vector<32x128xf32>
    %13 = arith.addf %10, %12 : vector<32x128xf32>
    %cst_11 = arith.constant 0.000000e+00 : f32
    %14 = vector.broadcast %cst_11 : f32 to vector<32x128xf32>
    %15 = arith.maximumf %13, %14 : vector<32x128xf32>
    %16 = arith.truncf %15 : vector<32x128xf32> to vector<32x128xbf16>
    %c0_12 = arith.constant 0 : index
    %c0_13 = arith.constant 0 : index
    %17 = vector.load %arg6[%c0_12, %c0_13] : memref<128x128xbf16, #tpu.memory_space<vmem>>, vector<128x128xbf16>
    %cst_14 = arith.constant dense<0.000000e+00> : vector<32x128xf32>
    %18 = tpu.matmul %16, %17, %cst_14 {dimension_numbers = #tpu.dot_dimension_numbers<[1], [0], [0], [1], [0, 0, 1, 1], [], []>} : vector<32x128xbf16>, vector<128x128xbf16>, vector<32x128xf32> -> vector<32x128xf32>
    %c0_15 = arith.constant 0 : index
    %c0_16 = arith.constant 0 : index
    %19 = vector.load %arg7[%c0_15, %c0_16] : memref<1x128xf32, #tpu.memory_space<vmem>>, vector<1x128xf32>
    %20 = vector.broadcast %19 : vector<1x128xf32> to vector<32x128xf32>
    %21 = arith.addf %18, %20 : vector<32x128xf32>
    %c0_17 = arith.constant 0 : index
    %c0_18 = arith.constant 0 : index
    %22 = vector.load %arg8[%c0_17, %c0_18] : memref<32x128xf32, #tpu.memory_space<vmem>>, vector<32x128xf32>
    tpu.vector_store %arg8[%c0_17, %c0_18], %21 {strides = array<i32>} : memref<32x128xf32, #tpu.memory_space<vmem>>, vector<32x128xf32>,
    return
  }
  func.func @transform_0(%arg0: i32) -> (i32, i32) {
    %c0_i32 = arith.constant 0 : i32
    %c0_i32_0 = arith.constant 0 : i32
    return %arg0, %c0_i32 : i32, i32
  }
  func.func @transform_1(%arg0: i32) -> (i32, i32) {
    %c0_i32 = arith.constant 0 : i32
    %c0_i32_0 = arith.constant 0 : i32
    %c0_i32_1 = arith.constant 0 : i32
    return %c0_i32, %c0_i32_0 : i32, i32
  }
  func.func @transform_2(%arg0: i32) -> (i32, i32) {
    %c0_i32 = arith.constant 0 : i32
    %c0_i32_0 = arith.constant 0 : i32
    %c0_i32_1 = arith.constant 0 : i32
    return %c0_i32, %c0_i32_0 : i32, i32
  }
  func.func @transform_3(%arg0: i32) -> (i32, i32) {
    %c0_i32 = arith.constant 0 : i32
    %c0_i32_0 = arith.constant 0 : i32
    %c0_i32_1 = arith.constant 0 : i32
    return %c0_i32, %c0_i32_0 : i32, i32
  }
  func.func @transform_4(%arg0: i32) -> (i32, i32) {
    %c0_i32 = arith.constant 0 : i32
    %c0_i32_0 = arith.constant 0 : i32
    %c0_i32_1 = arith.constant 0 : i32
    return %c0_i32, %c0_i32_0 : i32, i32
  }
  func.func @transform_5(%arg0: i32) -> (i32, i32) {
    %c0_i32 = arith.constant 0 : i32
    %c0_i32_0 = arith.constant 0 : i32
    %c0_i32_1 = arith.constant 0 : i32
    return %c0_i32, %c0_i32_0 : i32, i32
  }
  func.func @transform_6(%arg0: i32) -> (i32, i32) {
    %c0_i32 = arith.constant 0 : i32
    %c0_i32_0 = arith.constant 0 : i32
    %c0_i32_1 = arith.constant 0 : i32
    return %c0_i32, %c0_i32_0 : i32, i32
  }
  func.func @transform_7(%arg0: i32) -> (i32, i32) {
    %c0_i32 = arith.constant 0 : i32
    %c0_i32_0 = arith.constant 0 : i32
    return %arg0, %c0_i32 : i32, i32
  }
}

</mosaic_0001>

<bundles_post_ra>
// kernel: _lambda_.9
= control target key start
LH: loop header
LB: loop body
LE: loop exit
PB: predicated region body
PF: predicated region fallthrough
CT: control target
= control target key end

     0   :  { %s846_s1 = inlined_call_operand.vmem [shape: bf16[128,128], index: 1, kind: input, shape index: {}]   ;;  %s847_s0 = inlined_call_operand.vmem [shape: bf16[32,128], index: 0, kind: input, shape index: {}]   ;;  %s848_s3 = inlined_call_operand.vmem [shape: bf16[128,128], index: 3, kind: input, shape index: {}]   ;;  %s849_s5 = inlined_call_operand.vmem [shape: bf16[128,128], index: 5, kind: input, shape index: {}]   ;;  %s850_s2 = inlined_call_operand.vmem [shape: f32[1,128], index: 2, kind: input, shape index: {}]   ;;  %s851_s4 = inlined_call_operand.vmem [shape: f32[1,128], index: 4, kind: input, shape index: {}]   ;;  %s852_s6 = inlined_call_operand.vmem [shape: f32[1,128], index: 6, kind: input, shape index: {}]   ;;  %s853_s7 = inlined_call_operand.vmem [shape: f32[1,128], index: 7, kind: input, shape index: {}]   ;;  %s854_s8 = inlined_call_operand.vmem [shape: f32[1,128], index: 8, kind: input, shape index: {}]   ;;  %s855_s9 = inlined_call_operand.vmem [shape: bf16[32,128], index: 9, kind: output, shape index: {}]  }
   0x1   :  { %v662_v0 = vld [vmem:[%s846_s1] sm:$0xff]   ;;  %v663_v1 = vld [vmem:[%s846_s1 + $0x8] sm:$0xff]   ;;  %v664_v2 = vld [vmem:[%s846_s1 + $0x10] sm:$0xff]  }
   0x2   :  { %601 = vmatprep.subr.bf16.mxu0 %v662_v0  ;;  %v665_v3 = vld [vmem:[%s846_s1 + $0x18] sm:$0xff]   ;;  %v670_v4 = vld [vmem:[%s847_s0] sm:$0xff]   ;;  %v673_v6 = vld [vmem:[%s848_s3 + $0x8] sm:$0xff]  }
   0x3   :  { %602 = vmatpush3.bf16.msra.mxu0 %v662_v0  ;;  %617 = vmatprep.mubr.bf16.mxu0 %v670_v4  ;;  %v672_v5 = vld [vmem:[%s848_s3] sm:$0xff]   ;;  %v674_v8 = vld [vmem:[%s848_s3 + $0x10] sm:$0xff]   ;;  %v667_v9 = vld [vmem:[%s846_s1 + $0x28] sm:$0xff]  }
   0x4   :  { %603 = vmatprep.subr.bf16.mxu0 %v663_v1  ;;  %v666_v7 = vld [vmem:[%s846_s1 + $0x20] sm:$0xff]   ;;  %621 = vmatprep.subr.bf16.mxu1 %v672_v5  ;;  %v675_v10 = vld [vmem:[%s848_s3 + $0x18] sm:$0xff]   ;;  %v668_v11 = vld [vmem:[%s846_s1 + $0x30] sm:$0xff]  }
   0x5   :  { %622 = vmatpush3.bf16.msra.mxu1 %v672_v5  ;;  %v676_v12 = vld [vmem:[%s848_s3 + $0x20] sm:$0xff]   ;;  %v669_v13 = vld [vmem:[%s846_s1 + $0x38] sm:$0xff]   ;;  %v677_v14 = vld [vmem:[%s848_s3 + $0x28] sm:$0xff]  }
   0x6   :  { %623 = vmatprep.subr.bf16.mxu1 %v673_v6  ;;  %v671_v15 = vld [vmem:[%s847_s0 + $0x8] sm:$0xff]   ;;  %v678_v16 = vld [vmem:[%s848_s3 + $0x30] sm:$0xff]   ;;  %v679_v17 = vld [vmem:[%s848_s3 + $0x38] sm:$0xff]  }
   0x7   :  { %604 = vmatpush3.bf16.msra.mxu0 %v663_v1  ;;  %v680_v18 = vld [vmem:[%s849_s5] sm:$0xff]   ;;  %v681_v19 = vld [vmem:[%s849_s5 + $0x8] sm:$0xff]   ;;  %v682_v20 = vld [vmem:[%s849_s5 + $0x10] sm:$0xff]   ;;  %v421_v1 = vlaneseq }
   0x8   :  { %605 = vmatprep.subr.bf16.mxu0 %v664_v2  ;;  %v683_v21 = vld [vmem:[%s849_s5 + $0x18] sm:$0xff]   ;;  %v684_v22 = vld [vmem:[%s849_s5 + $0x20] sm:$0xff]   ;;  %v685_v23 = vld [vmem:[%s849_s5 + $0x28] sm:$0xff]  }
   0x9   :  { %624 = vmatpush3.bf16.msra.mxu1 %v673_v6  ;;  %v520_v24 = vld [vmem:[%s850_s2] ss:$0 sm:$0xff]  ;;  %v686_v39 = vld [vmem:[%s849_s5 + $0x30] sm:$0xff]   ;;  %v687_v40 = vld [vmem:[%s849_s5 + $0x38] sm:$0xff]  }
   0xa   :  { %625 = vmatprep.subr.bf16.mxu1 %v674_v8  ;;  %v531_v41 = vld [vmem:[%s851_s4] ss:$0 sm:$0xff] }
   0xb   :  { %606 = vmatpush3.bf16.msra.mxu0 %v664_v2  ;;  %v540_v56 = vld [vmem:[%s852_s6] ss:$0 sm:$0xff]  ;;  %v422_v2 = vand.u32 127, %v421_v1 }
   0xc   :  { %607 = vmatprep.subr.bf16.mxu0 %v665_v3 }
   0xd   :  { %626 = vmatpush3.bf16.msra.mxu1 %v674_v8  ;;  %vm425_vm0 = vcmp.lt.s32.totalorder %v422_v2, 32 }
   0xe   :  { %627 = vmatprep.subr.bf16.mxu1 %v675_v10 }
   0xf   :  { %608 = vmatpush3.bf16.msra.mxu0 %v665_v3 }
  0x10   :  { %609 = vmatprep.subr.bf16.mxu0 %v666_v7 }
  0x11   :  { %628 = vmatpush3.bf16.msra.mxu1 %v675_v10 }
  0x12   :  { %629 = vmatprep.subr.bf16.mxu1 %v676_v12 }
  0x13   :  { %610 = vmatpush3.bf16.msra.mxu0 %v666_v7  ;;  %v696_v7 = vmov 0.0  }
  0x14   :  { %611 = vmatprep.subr.bf16.mxu0 %v667_v9  ;;  %v549_v8 = vsel %vm425_vm0, 1.0, %v696_v7 }
  0x15   :  { %630 = vmatpush3.bf16.msra.mxu1 %v676_v12 }
  0x16   :  { %631 = vmatprep.subr.bf16.mxu1 %v677_v14 }
  0x17   :  { %612 = vmatpush3.bf16.msra.mxu0 %v667_v9 }
  0x18   :  { %613 = vmatprep.subr.bf16.mxu0 %v668_v11 }
  0x19   :  { %632 = vmatpush3.bf16.msra.mxu1 %v677_v14 }
  0x1a   :  { %633 = vmatprep.subr.bf16.mxu1 %v678_v16 }
  0x1b   :  { %614 = vmatpush3.bf16.msra.mxu0 %v668_v11 }
  0x1c   :  { %615 = vmatprep.subr.bf16.mxu0 %v669_v13 }
  0x1d   :  { %634 = vmatpush3.bf16.msra.mxu1 %v678_v16 }
  0x1e   :  { %635 = vmatprep.subr.bf16.mxu1 %v679_v17 }
  0x1f   :  { %616 = vmatpush3.bf16.msra.mxu0 %v669_v13 }
  0x20   :  { %641 = vmatprep.subr.bf16.mxu0 %v680_v18 }
  0x21   :  { %636 = vmatpush3.bf16.msra.mxu1 %v679_v17 }
  0x22   :  { %618 = vmatmul.mubr.bf16.vlgmr.msra.gmra.mrb[0].mxu0 %v671_v15 }
  0x23   :  { %642 = vmatpush3.bf16.msra.mxu0 %v680_v18 }
  0x24   :  { %643 = vmatprep.subr.bf16.mxu0 %v681_v19 }
  0x27   :  { %644 = vmatpush3.bf16.msra.mxu0 %v681_v19 }
  0x28   :  { %645 = vmatprep.subr.bf16.mxu0 %v682_v20 }
  0x2b   :  { %646 = vmatpush3.bf16.msra.mxu0 %v682_v20 }
  0x2c   :  { %647 = vmatprep.subr.bf16.mxu0 %v683_v21 }
  0x2f   :  { %648 = vmatpush3.bf16.msra.mxu0 %v683_v21 }
  0x30   :  { %649 = vmatprep.subr.bf16.mxu0 %v684_v22 }
  0x33   :  { %650 = vmatpush3.bf16.msra.mxu0 %v684_v22 }
  0x34   :  { %651 = vmatprep.subr.bf16.mxu0 %v685_v23 }
  0x37   :  { %652 = vmatpush3.bf16.msra.mxu0 %v685_v23 }
  0x38   :  { %653 = vmatprep.subr.bf16.mxu0 %v686_v39 }
  0x3b   :  { %654 = vmatpush3.bf16.msra.mxu0 %v686_v39  ;;  %v550_v39 = vld [vmem:[%s853_s7] ss:$0 sm:$0xff] }
  0x3c   :  { %655 = vmatprep.subr.bf16.mxu0 %v687_v40 }
  0x3f   :  { %656 = vmatpush3.bf16.msra.mxu0 %v687_v40 }
  0xf5   :  { %v619_v25 = vpop.f32.mrb[0].mxu0 }
  0xf6   :  { %v163_v26 = vadd.f32 %v619_v25, %v520_v24  ;;  %v154_v27 = vpop.f32.mrb[1].mxu0 }
  0xf7   :  { %v155_v28 = vadd.f32 %v520_v24, %v154_v27  ;;  %v620_v29 = vpop.f32.mrb[2].mxu0 }
  0xf8   :  { %v166_v30 = vadd.f32 %v620_v29, %v520_v24  ;;  %v157_v31 = vpop.f32.mrb[3].mxu0  ;;  %v171_v33 = vmax.f32 %v163_v26, 0.0 }
  0xf9   :  { %v158_v32 = vadd.f32 %v520_v24, %v157_v31  ;;  %v169_v35 = vmax.f32 %v155_v28, 0.0 }
  0xfa   :  { %v172_v34 = vmax.f32 %v166_v30, 0.0 }
  0xfb   :  { %v170_v36 = vmax.f32 %v158_v32, 0.0 }
  0xfc   :  { %v174_v37 = vpack.c.bf16 %v172_v34, %v171_v33 }
  0xfd   :  { %v173_v38 = vpack.c.bf16 %v170_v36, %v169_v35 }
  0xff   :  { %637 = vmatprep.mubr.bf16.mxu1 %v173_v38 }
 0x100   :  { %638 = vmatmul.mubr.bf16.vlgmr.msra.gmra.mrb[0].mxu1 %v174_v37 }
 0x1d3   :  { %v639_v42 = vpop.f32.mrb[0].mxu1 }
 0x1d4   :  { %v289_v43 = vadd.f32 %v639_v42, %v531_v41  ;;  %v280_v44 = vpop.f32.mrb[1].mxu1 }
 0x1d5   :  { %v281_v45 = vadd.f32 %v531_v41, %v280_v44  ;;  %v640_v46 = vpop.f32.mrb[2].mxu1  ;;  %v551_v44 = vld [vmem:[%s854_s8] ss:$0 sm:$0xff] }
 0x1d6   :  { %v292_v47 = vadd.f32 %v640_v46, %v531_v41  ;;  %v283_v48 = vpop.f32.mrb[3].mxu1  ;;  %v297_v50 = vmax.f32 %v289_v43, 0.0 }
 0x1d7   :  { %v284_v49 = vadd.f32 %v531_v41, %v283_v48  ;;  %v295_v52 = vmax.f32 %v281_v45, 0.0 }
 0x1d8   :  { %v298_v51 = vmax.f32 %v292_v47, 0.0 }
 0x1d9   :  { %v296_v53 = vmax.f32 %v284_v49, 0.0 }
 0x1da   :  { %v300_v54 = vpack.c.bf16 %v298_v51, %v297_v50 }
 0x1db   :  { %v299_v55 = vpack.c.bf16 %v296_v53, %v295_v52 }
 0x1dd   :  { %657 = vmatprep.mubr.bf16.mxu0 %v299_v55 }
 0x1de   :  { %658 = vmatmul.mubr.bf16.vlgmr.msra.gmra.mrb[4].mxu0 %v300_v54 }
 0x2b1   :  { %v659_v57 = vpop.f32.mrb[4].mxu0 }
 0x2b2   :  { %v415_v58 = vadd.f32 %v659_v57, %v540_v56  ;;  %v406_v59 = vpop.f32.mrb[5].mxu0 }
 0x2b3   :  { %v407_v60 = vadd.f32 %v540_v56, %v406_v59  ;;  %v660_v61 = vpop.f32.mrb[6].mxu0 }
 0x2b4   :  { %432 = vadd.xlane.f32.xlu1 %v415_v58  ;;  %v409_v62 = vpop.f32.mrb[7].mxu0  ;;  %v418_v63 = vadd.f32 %v660_v61, %v540_v56 }
 0x2b5   :  { %428 = vadd.xlane.f32.xlu0 %v407_v60  ;;  %v410_v0 = vadd.f32 %v540_v56, %v409_v62 }
 0x2b8   :  { %434 = vadd.xlane.f32.xlu1 %v418_v63 }
 0x2b9   :  { %430 = vadd.xlane.f32.xlu0 %v410_v0 }
 0x341   :  { %v433_v3 = vpop.xlane.xlu1 %432 }
 0x342   :  { %v438_v4 = vmul.f32 0.03125, %v433_v3  ;;  %v429_v5 = vpop.xlane.xlu0 %428 }
 0x343   :  { %v436_v6 = vmul.f32 0.03125, %v429_v5 }
 0x344   :  { %v442_v9 = vsub.f32 %v415_v58, %v438_v4 }
 0x345   :  { %v440_v10 = vsub.f32 %v407_v60, %v436_v6  ;;  %v435_v11 = vpop.xlane.xlu1 %434 }
 0x346   :  { %v439_v12 = vmul.f32 0.03125, %v435_v11  ;;  %v431_v13 = vpop.xlane.xlu0 %430  ;;  %v446_v19 = vmul.f32 %v549_v8, %v442_v9 }
 0x347   :  { %v437_v14 = vmul.f32 0.03125, %v431_v13  ;;  %v444_v15 = vmul.f32 %v549_v8, %v440_v10 }
 0x348   :  { %v443_v16 = vsub.f32 %v418_v63, %v439_v12  ;;  %v450_v21 = vmul.f32 %v446_v19, %v446_v19 }
 0x349   :  { %v441_v17 = vsub.f32 %v410_v0, %v437_v14  ;;  %v448_v18 = vmul.f32 %v444_v15, %v444_v15 }
 0x34a   :  { %v447_v23 = vmul.f32 %v549_v8, %v443_v16 }
 0x34b   :  { %452 = vadd.xlane.f32.xlu0 %v448_v18  ;;  %v445_v20 = vmul.f32 %v549_v8, %v441_v17 }
 0x34c   :  { %v451_v24 = vmul.f32 %v447_v23, %v447_v23 }
 0x34d   :  { %v449_v22 = vmul.f32 %v445_v20, %v445_v20 }
 0x34f   :  { %456 = vadd.xlane.f32.xlu0 %v450_v21  ;;  %454 = vadd.xlane.f32.xlu1 %v449_v22 }
 0x353   :  { %458 = vadd.xlane.f32.xlu1 %v451_v24 }
 0x3d8   :  { %v453_v25 = vpop.xlane.xlu0 %452 }
 0x3d9   :  { %v460_v26 = vmul.f32 0.03125, %v453_v25 }
 0x3db   :  { %v464_v27 = vadd.f32 1e-05, %v460_v26 }
 0x3dc   :  { %v455_v28 = vpop.xlane.xlu1 %454  ;;  %v457_v29 = vpop.xlane.xlu0 %456 }
 0x3dd   :  { %688 = vrsqrt.f32 %v464_v27  ;;  %v461_v30 = vmul.f32 0.03125, %v455_v28  ;;  %v462_v31 = vmul.f32 0.03125, %v457_v29 }
 0x3df   :  { %v465_v32 = vadd.f32 1e-05, %v461_v30  ;;  %v466_v33 = vadd.f32 1e-05, %v462_v31 }
 0x3e0   :  { %v459_v34 = vpop.xlane.xlu1 %458 }
 0x3e1   :  { %690 = vrsqrt.f32 %v465_v32  ;;  %v463_v35 = vmul.f32 0.03125, %v459_v34 }
 0x3e2   :  { %692 = vrsqrt.f32 %v466_v33 }
 0x3e3   :  { %v467_v36 = vadd.f32 1e-05, %v463_v35 }
 0x3e5   :  { %694 = vrsqrt.f32 %v467_v36 }
 0x3e7   :  { %v689_v37 = vpop.eup %688 }
 0x3e8   :  { %v472_v38 = vmul.f32 %v689_v37, %v444_v15 }
 0x3ea   :  { %v482_v42 = vmul.f32 %v550_v39, %v472_v38 }
 0x3eb   :  { %v691_v40 = vpop.eup %690 }
 0x3ec   :  { %v693_v41 = vpop.eup %692  ;;  %v473_v43 = vmul.f32 %v691_v40, %v445_v20  ;;  %v492_v48 = vadd.f32 %v551_v44, %v482_v42 }
 0x3ed   :  { %v474_v45 = vmul.f32 %v693_v41, %v446_v19 }
 0x3ee   :  { %v483_v46 = vmul.f32 %v550_v39, %v473_v43 }
 0x3ef   :  { %v695_v47 = vpop.eup %694  ;;  %v484_v50 = vmul.f32 %v550_v39, %v474_v45 }
 0x3f0   :  { %v493_v49 = vadd.f32 %v551_v44, %v483_v46  ;;  %v475_v51 = vmul.f32 %v695_v47, %v447_v23 }
 0x3f1   :  { %v494_v54 = vadd.f32 %v551_v44, %v484_v50 }
 0x3f2   :  { %v563_v52 = vpack.c.bf16 %v493_v49, %v492_v48  ;;  %v485_v53 = vmul.f32 %v550_v39, %v475_v51 }
 0x3f4   :  { %564 = vst [vmem:[%s855_s9] sm:$0xff] %v563_v52   ;;  %v495_v55 = vadd.f32 %v551_v44, %v485_v53 }
 0x3f6   :  { %v568_v56 = vpack.c.bf16 %v495_v55, %v494_v54 }
 0x3f8   :  { %570 = vst [vmem:[%s855_s9 + $0x8] sm:$0xff] %v568_v56  }

// kernel: _lambda_.12
= control target key start
LH: loop header
LB: loop body
LE: loop exit
PB: predicated region body
PF: predicated region fallthrough
CT: control target
= control target key end

     0   :  { %v21_v0 = vlaneseq  ;;  %v240_v7 = vmov 0.0   ;;  %vm86_vm2 = vcmask 588800   ;;  %vm93_vm5 = vcmask 1043456   ;;  %s282_s1 = inlined_call_operand.vmem [shape: bf16[72,128], index: 1, kind: input, shape index: {}]   ;;  %s283_s0 = inlined_call_operand.vmem [shape: s32[1,72], index: 0, kind: input, shape index: {}]   ;;  %s284_s2 = inlined_call_operand.vmem [shape: bf16[32,128], index: 2, kind: output, shape index: {}]  }
   0x1   :  { %v235_v1 = vld [vmem:[%s282_s1] sm:$0xff]   ;;  %v236_v2 = vld [vmem:[%s282_s1 + $0x8] sm:$0xff]   ;;  %v237_v5 = vld [vmem:[%s282_s1 + $0x10] sm:$0xff]  }
   0x2   :  { %v22_v3 = vshrl.u32 %v21_v0, 7  ;;  %219 = vmatprep.subr.bf16.mxu0 %v235_v1  ;;  %v185_v6 = vld [vmem:[%s283_s0] ss:$0 sm:$0xff]  ;;  %v238_v11 = vld [vmem:[%s282_s1 + $0x18] sm:$0xff]  }
   0x3   :  { %220 = vmatpush3.bf16.msra.mxu0 %v235_v1  ;;  %v239_v14 = vld [vmem:[%s282_s1 + $0x20] ss:$0 sps:$4 sm:$0xff]  }
   0x4   :  { %v23_v4 = vadd.s32 8, %v22_v3  ;;  %221 = vmatprep.subr.bf16.mxu0 %v236_v2  ;;  %vm36_vm0 = vcmp.eq.s32.totalorder %v22_v3, %v185_v6  ;;  %v24_v12 = vadd.s32 16, %v22_v3  ;;  %v25_v13 = vadd.s32 24, %v22_v3 }
   0x5   :  { %v40_v8 = vsel %vm36_vm0, 1.0, %v240_v7  ;;  %v95_v17 = vsel %vm93_vm5, %v239_v14, 0 }
   0x6   :  { %vm37_vm1 = vcmp.eq.s32.totalorder %v23_v4, %v185_v6  ;;  %vm38_vm3 = vcmp.eq.s32.totalorder %v24_v12, %v185_v6  ;;  %vm39_vm4 = vcmp.eq.s32.totalorder %v25_v13, %v185_v6 }
   0x7   :  { %v41_v9 = vsel %vm37_vm1, 1.0, %v240_v7  ;;  %222 = vmatpush3.bf16.msra.mxu0 %v236_v2  ;;  %v42_v15 = vsel %vm38_vm3, 1.0, %v240_v7  ;;  %v43_v16 = vsel %vm39_vm4, 1.0, %v240_v7 }
   0x8   :  { %v44_v10 = vpack.c.bf16 %v41_v9, %v40_v8  ;;  %223 = vmatprep.subr.bf16.mxu0 %v237_v5  ;;  %v45_v18 = vpack.c.bf16 %v43_v16, %v42_v15 }
   0xa   :  { %229 = vmatprep.mubr.msk.bf16.mxu0 %vm86_vm2, %v44_v10 }
   0xb   :  { %224 = vmatpush3.bf16.msra.mxu0 %v237_v5 }
   0xc   :  { %225 = vmatprep.subr.bf16.mxu0 %v238_v11 }
   0xf   :  { %226 = vmatpush3.bf16.msra.mxu0 %v238_v11 }
  0x10   :  { %233 = vmatprep.subr.msk.bf16.mxu0 %vm93_vm5, %v239_v14 }
  0x13   :  { %228 = vmatpush3.bf16.msra.mxu0 %v95_v17 }
  0x16   :  { %230 = vmatmul.mubr.msk.bf16.vlgmr.msra.gmra.mrb[0].mxu0 %vm86_vm2, %v45_v18 }
  0xe9   :  { %v231_v19 = vpop.f32.mrb[0].mxu0 }
  0xea   :  { %v131_v20 = vpop.f32.mrb[1].mxu0 }
  0xeb   :  { %v232_v21 = vpop.f32.mrb[2].mxu0 }
  0xec   :  { %v209_v22 = vpack.c.bf16 %v232_v21, %v231_v19  ;;  %v134_v23 = vpop.f32.mrb[3].mxu0 }
  0xed   :  { %v204_v24 = vpack.c.bf16 %v134_v23, %v131_v20 }
  0xee   :  { %211 = vst [vmem:[%s284_s2 + $0x8] sm:$0xff] %v209_v22  }
  0xef   :  { %205 = vst [vmem:[%s284_s2] sm:$0xff] %v204_v24  }

// kernel: _lambda_.10
= control target key start
LH: loop header
LB: loop body
LE: loop exit
PB: predicated region body
PF: predicated region fallthrough
CT: control target
= control target key end

     0   :  { %v1010_v0 = vmov 0.0   ;;  %vm1011_vm0 = vmmov 0   ;;  %s1298_s1 = inlined_call_operand.vmem [shape: bf16[128,128], index: 1, kind: input, shape index: {}]   ;;  %s1299_s0 = inlined_call_operand.vmem [shape: bf16[72,128], index: 0, kind: input, shape index: {}]   ;;  %s1300_s3 = inlined_call_operand.vmem [shape: bf16[128,128], index: 3, kind: input, shape index: {}]   ;;  %s1301_s5 = inlined_call_operand.vmem [shape: bf16[128,128], index: 5, kind: input, shape index: {}]   ;;  %s1302_s2 = inlined_call_operand.vmem [shape: f32[1,128], index: 2, kind: input, shape index: {}]   ;;  %s1303_s4 = inlined_call_operand.vmem [shape: f32[1,128], index: 4, kind: input, shape index: {}]   ;;  %s1304_s6 = inlined_call_operand.vmem [shape: f32[1,128], index: 6, kind: input, shape index: {}]   ;;  %s1305_s7 = inlined_call_operand.vmem [shape: f32[1,128], index: 7, kind: input, shape index: {}]   ;;  %s1306_s8 = inlined_call_operand.vmem [shape: f32[1,128], index: 8, kind: input, shape index: {}]   ;;  %s1307_s9 = inlined_call_operand.vmem [shape: bf16[72,128], index: 9, kind: output, shape index: {}]  }
   0x1   :  { %837 = vmatprep.subr.bf16.mxu0 %v1010_v0  ;;  %v963_v1 = vld [vmem:[%s1298_s1] sm:$0xff]   ;;  %853 = vmatprep.mubr.msk.bf16.mxu0 %vm1011_vm0, %v1010_v0  ;;  %v964_v2 = vld [vmem:[%s1298_s1 + $0x8] sm:$0xff]   ;;  %v965_v3 = vld [vmem:[%s1298_s1 + $0x10] sm:$0xff]  }
   0x2   :  { %873 = vmatprep.subr.bf16.mxu1 %v1010_v0  ;;  %889 = vmatprep.mubr.msk.bf16.mxu1 %vm1011_vm0, %v1010_v0  ;;  %v966_v4 = vld [vmem:[%s1298_s1 + $0x18] sm:$0xff]   ;;  %v976_v5 = vld [vmem:[%s1300_s3] sm:$0xff]   ;;  %v977_v7 = vld [vmem:[%s1300_s3 + $0x8] sm:$0xff]  }
   0x3   :  { %838 = vmatpush3.bf16.msra.mxu0 %v963_v1  ;;  %v967_v6 = vld [vmem:[%s1298_s1 + $0x20] sm:$0xff]   ;;  %874 = vmatpush3.bf16.msra.mxu1 %v976_v5  ;;  %v968_v8 = vld [vmem:[%s1298_s1 + $0x28] sm:$0xff]   ;;  %v978_v9 = vld [vmem:[%s1300_s3 + $0x10] sm:$0xff]  }
   0x4   :  { %839 = vmatprep.subr.bf16.mxu0 %v1010_v0  ;;  %875 = vmatprep.subr.bf16.mxu1 %v1010_v0  ;;  %v969_v10 = vld [vmem:[%s1298_s1 + $0x30] sm:$0xff]   ;;  %v979_v11 = vld [vmem:[%s1300_s3 + $0x18] sm:$0xff]   ;;  %v980_v13 = vld [vmem:[%s1300_s3 + $0x20] sm:$0xff]  }
   0x5   :  { %v970_v12 = vld [vmem:[%s1298_s1 + $0x38] sm:$0xff]   ;;  %v971_v14 = vld [vmem:[%s1299_s0] sm:$0xff]   ;;  %v981_v15 = vld [vmem:[%s1300_s3 + $0x28] sm:$0xff]  }
   0x6   :  { %v972_v16 = vld [vmem:[%s1299_s0 + $0x8] sm:$0xff]   ;;  %v973_v17 = vld [vmem:[%s1299_s0 + $0x10] sm:$0xff]   ;;  %v974_v18 = vld [vmem:[%s1299_s0 + $0x18] sm:$0xff]  }
   0x7   :  { %840 = vmatpush3.bf16.msra.mxu0 %v964_v2  ;;  %876 = vmatpush3.bf16.msra.mxu1 %v977_v7  ;;  %v975_v19 = vld [vmem:[%s1299_s0 + $0x20] ss:$0 sps:$4 sm:$0xff]   ;;  %v982_v20 = vld [vmem:[%s1300_s3 + $0x30] sm:$0xff]   ;;  %v983_v21 = vld [vmem:[%s1300_s3 + $0x38] sm:$0xff]  }
   0x8   :  { %841 = vmatprep.subr.bf16.mxu0 %v1010_v0  ;;  %877 = vmatprep.subr.bf16.mxu1 %v1010_v0  ;;  %v984_v22 = vld [vmem:[%s1301_s5] sm:$0xff]   ;;  %v985_v23 = vld [vmem:[%s1301_s5 + $0x8] sm:$0xff]   ;;  %v986_v24 = vld [vmem:[%s1301_s5 + $0x10] sm:$0xff]  }
   0x9   :  { %v987_v25 = vld [vmem:[%s1301_s5 + $0x18] sm:$0xff]   ;;  %v988_v26 = vld [vmem:[%s1301_s5 + $0x20] sm:$0xff]   ;;  %v989_v27 = vld [vmem:[%s1301_s5 + $0x28] sm:$0xff]  }
   0xa   :  { %v722_v28 = vld [vmem:[%s1302_s2] ss:$0 sm:$0xff] }
   0xb   :  { %842 = vmatpush3.bf16.msra.mxu0 %v965_v3  ;;  %878 = vmatpush3.bf16.msra.mxu1 %v978_v9  ;;  %v990_v9 = vld [vmem:[%s1301_s5 + $0x30] sm:$0xff]  }
   0xc   :  { %843 = vmatprep.subr.bf16.mxu0 %v1010_v0  ;;  %879 = vmatprep.subr.bf16.mxu1 %v1010_v0 }
   0xf   :  { %844 = vmatpush3.bf16.msra.mxu0 %v966_v4  ;;  %880 = vmatpush3.bf16.msra.mxu1 %v979_v11  ;;  %v736_v11 = vld [vmem:[%s1303_s4] ss:$0 sm:$0xff] }
  0x10   :  { %845 = vmatprep.subr.bf16.mxu0 %v1010_v0  ;;  %881 = vmatprep.subr.bf16.mxu1 %v1010_v0 }
  0x13   :  { %846 = vmatpush3.bf16.msra.mxu0 %v967_v6  ;;  %882 = vmatpush3.bf16.msra.mxu1 %v980_v13 }
  0x14   :  { %847 = vmatprep.subr.bf16.mxu0 %v1010_v0  ;;  %883 = vmatprep.subr.bf16.mxu1 %v1010_v0 }
  0x17   :  { %848 = vmatpush3.bf16.msra.mxu0 %v968_v8  ;;  %884 = vmatpush3.bf16.msra.mxu1 %v981_v15 }
  0x18   :  { %849 = vmatprep.subr.bf16.mxu0 %v1010_v0  ;;  %885 = vmatprep.subr.bf16.mxu1 %v1010_v0 }
  0x1b   :  { %850 = vmatpush3.bf16.msra.mxu0 %v969_v10  ;;  %886 = vmatpush3.bf16.msra.mxu1 %v982_v20  ;;  %v991_v10 = vld [vmem:[%s1301_s5 + $0x38] sm:$0xff]  }
  0x1c   :  { %851 = vmatprep.subr.bf16.mxu0 %v1010_v0  ;;  %887 = vmatprep.subr.bf16.mxu1 %v1010_v0 }
  0x1f   :  { %852 = vmatpush3.bf16.msra.mxu0 %v970_v12  ;;  %888 = vmatpush3.bf16.msra.mxu1 %v983_v21 }
  0x20   :  { %909 = vmatprep.subr.bf16.mxu0 %v1010_v0  ;;  %945 = vmatprep.subr.bf16.mxu1 %v1010_v0 }
  0x22   :  { %854 = vmatmul.mubr.bf16.vlgmr.msra.gmra.mrb[0].mxu0 %v971_v14 }
  0x23   :  { %857 = vmatprep.mubr.msk.bf16.mxu0 %vm1011_vm0, %v1010_v0  ;;  %910 = vmatpush3.bf16.msra.mxu0 %v984_v22 }
  0x24   :  { %911 = vmatprep.subr.bf16.mxu0 %v1010_v0 }
  0x27   :  { %912 = vmatpush3.bf16.msra.mxu0 %v985_v23 }
  0x28   :  { %913 = vmatprep.subr.bf16.mxu0 %v1010_v0 }
  0x2a   :  { %858 = vmatmul.mubr.bf16.gmra.mrb[4].mxu0 %v972_v16 }
  0x2b   :  { %861 = vmatprep.mubr.msk.bf16.mxu0 %vm1011_vm0, %v1010_v0  ;;  %914 = vmatpush3.bf16.msra.mxu0 %v986_v24 }
  0x2c   :  { %915 = vmatprep.subr.bf16.mxu0 %v1010_v0 }
  0x2f   :  { %916 = vmatpush3.bf16.msra.mxu0 %v987_v25 }
  0x30   :  { %917 = vmatprep.subr.bf16.mxu0 %v1010_v0 }
  0x32   :  { %862 = vmatmul.mubr.bf16.gmra.mrb[8].mxu0 %v973_v17 }
  0x33   :  { %865 = vmatprep.mubr.msk.bf16.mxu0 %vm1011_vm0, %v1010_v0  ;;  %918 = vmatpush3.bf16.msra.mxu0 %v988_v26 }
  0x34   :  { %919 = vmatprep.subr.bf16.mxu0 %v1010_v0 }
  0x37   :  { %920 = vmatpush3.bf16.msra.mxu0 %v989_v27 }
  0x38   :  { %921 = vmatprep.subr.bf16.mxu0 %v1010_v0 }
  0x3a   :  { %866 = vmatmul.mubr.bf16.gmra.mrb[12].mxu0 %v974_v18 }
  0x3b   :  { %869 = vmatprep.mubr.msk.bf16.mxu0 %vm1011_vm0, %v1010_v0  ;;  %922 = vmatpush3.bf16.msra.mxu0 %v990_v9 }
  0x3c   :  { %923 = vmatprep.subr.bf16.mxu0 %v1010_v0 }
  0x3f   :  { %924 = vmatpush3.bf16.msra.mxu0 %v991_v10 }
  0x42   :  { %870 = vmatmul.mubr.bf16.gmra.mrb[16].mxu0 %v975_v19 }
  0x43   :  { %925 = vmatprep.mubr.msk.bf16.mxu0 %vm1011_vm0, %v1010_v0 }
  0xf5   :  { %v175_v29 = vpop.f32.mrb[0].mxu0 }
  0xf6   :  { %v176_v30 = vadd.f32 %v722_v28, %v175_v29  ;;  %v855_v31 = vpop.f32.mrb[1].mxu0 }
  0xf7   :  { %v178_v32 = vpop.f32.mrb[2].mxu0 }
  0xf8   :  { %v179_v33 = vadd.f32 %v722_v28, %v178_v32  ;;  %v856_v34 = vpop.f32.mrb[3].mxu0  ;;  %v213_v35 = vmax.f32 %v176_v30, 0.0 }
  0xfa   :  { %v214_v36 = vmax.f32 %v179_v33, 0.0 }
  0xfc   :  { %v222_v37 = vpack.c.bf16 %v214_v36, %v213_v35 }
  0xfd   :  { %v183_v38 = vpop.f32.mrb[4].mxu0 }
  0xfe   :  { %v184_v39 = vadd.f32 %v722_v28, %v183_v38  ;;  %v859_v40 = vpop.f32.mrb[5].mxu0  ;;  %890 = vmatmul.mubr.bf16.vlgmr.msra.gmra.mrb[0].mxu1 %v222_v37 }
  0xff   :  { %v186_v41 = vpop.f32.mrb[6].mxu0  ;;  %893 = vmatprep.mubr.msk.bf16.mxu1 %vm1011_vm0, %v1010_v0  ;;  %953 = vmatpush3.bf16.msra.mxu1 %v984_v22 }
 0x100   :  { %v187_v42 = vadd.f32 %v722_v28, %v186_v41  ;;  %v860_v43 = vpop.f32.mrb[7].mxu0  ;;  %946 = vmatprep.subr.bf16.mxu1 %v1010_v0  ;;  %v215_v44 = vmax.f32 %v184_v39, 0.0 }
 0x102   :  { %v216_v45 = vmax.f32 %v187_v42, 0.0 }
 0x103   :  { %954 = vmatpush3.bf16.msra.mxu1 %v985_v23 }
 0x104   :  { %v223_v46 = vpack.c.bf16 %v216_v45, %v215_v44  ;;  %947 = vmatprep.subr.bf16.mxu1 %v1010_v0 }
 0x105   :  { %v191_v47 = vpop.f32.mrb[8].mxu0 }
 0x106   :  { %v192_v48 = vadd.f32 %v722_v28, %v191_v47  ;;  %v863_v49 = vpop.f32.mrb[9].mxu0  ;;  %894 = vmatmul.mubr.bf16.gmra.mrb[4].mxu1 %v223_v46 }
 0x107   :  { %v194_v50 = vpop.f32.mrb[10].mxu0  ;;  %897 = vmatprep.mubr.msk.bf16.mxu1 %vm1011_vm0, %v1010_v0  ;;  %955 = vmatpush3.bf16.msra.mxu1 %v986_v24 }
 0x108   :  { %v195_v51 = vadd.f32 %v722_v28, %v194_v50  ;;  %v864_v52 = vpop.f32.mrb[11].mxu0  ;;  %948 = vmatprep.subr.bf16.mxu1 %v1010_v0  ;;  %v217_v53 = vmax.f32 %v192_v48, 0.0 }
 0x10a   :  { %v218_v54 = vmax.f32 %v195_v51, 0.0 }
 0x10b   :  { %956 = vmatpush3.bf16.msra.mxu1 %v987_v25 }
 0x10c   :  { %v224_v55 = vpack.c.bf16 %v218_v54, %v217_v53  ;;  %949 = vmatprep.subr.bf16.mxu1 %v1010_v0 }
 0x10d   :  { %v199_v56 = vpop.f32.mrb[12].mxu0 }
 0x10e   :  { %v200_v57 = vadd.f32 %v722_v28, %v199_v56  ;;  %v867_v58 = vpop.f32.mrb[13].mxu0  ;;  %898 = vmatmul.mubr.bf16.gmra.mrb[8].mxu1 %v224_v55  ;;  %v745_v55 = vld [vmem:[%s1304_s6] ss:$0 sm:$0xff] }
 0x10f   :  { %v202_v59 = vpop.f32.mrb[14].mxu0  ;;  %901 = vmatprep.mubr.msk.bf16.mxu1 %vm1011_vm0, %v1010_v0  ;;  %957 = vmatpush3.bf16.msra.mxu1 %v988_v26 }
 0x110   :  { %v203_v60 = vadd.f32 %v722_v28, %v202_v59  ;;  %v868_v61 = vpop.f32.mrb[15].mxu0  ;;  %950 = vmatprep.subr.bf16.mxu1 %v1010_v0  ;;  %v219_v62 = vmax.f32 %v200_v57, 0.0 }
 0x112   :  { %v220_v63 = vmax.f32 %v203_v60, 0.0 }
 0x113   :  { %958 = vmatpush3.bf16.msra.mxu1 %v989_v27 }
 0x114   :  { %v225_v1 = vpack.c.bf16 %v220_v63, %v219_v62  ;;  %951 = vmatprep.subr.bf16.mxu1 %v1010_v0 }
 0x115   :  { %v207_v2 = vpop.f32.mrb[16].mxu0 }
 0x116   :  { %v208_v3 = vadd.f32 %v722_v28, %v207_v2  ;;  %902 = vmatmul.mubr.bf16.gmra.mrb[12].mxu1 %v225_v1  ;;  %v871_v4 = vpop.f32.mrb[17].mxu0 }
 0x117   :  { %v210_v5 = vpop.f32.mrb[18].mxu0  ;;  %905 = vmatprep.mubr.msk.bf16.mxu1 %vm1011_vm0, %v1010_v0  ;;  %959 = vmatpush3.bf16.msra.mxu1 %v990_v9 }
 0x118   :  { %v221_v6 = vmax.f32 %v208_v3, 0.0  ;;  %v872_v7 = vpop.f32.mrb[19].mxu0  ;;  %952 = vmatprep.subr.bf16.mxu1 %v1010_v0 }
 0x11a   :  { %v226_v8 = vpack.c.bf16 %v221_v6, %v221_v6 }
 0x11b   :  { %960 = vmatpush3.bf16.msra.mxu1 %v991_v10 }
 0x11e   :  { %906 = vmatmul.mubr.bf16.gmra.mrb[16].mxu1 %v226_v8 }
 0x11f   :  { %937 = vmatprep.mubr.msk.bf16.mxu1 %vm1011_vm0, %v1010_v0 }
 0x1d1   :  { %v332_v12 = vpop.f32.mrb[0].mxu1 }
 0x1d2   :  { %v333_v13 = vadd.f32 %v736_v11, %v332_v12  ;;  %v891_v14 = vpop.f32.mrb[1].mxu1 }
 0x1d3   :  { %v335_v15 = vpop.f32.mrb[2].mxu1 }
 0x1d4   :  { %v336_v16 = vadd.f32 %v736_v11, %v335_v15  ;;  %v892_v17 = vpop.f32.mrb[3].mxu1  ;;  %v370_v18 = vmax.f32 %v333_v13, 0.0 }
 0x1d6   :  { %v371_v19 = vmax.f32 %v336_v16, 0.0 }
 0x1d8   :  { %v379_v20 = vpack.c.bf16 %v371_v19, %v370_v18 }
 0x1d9   :  { %v340_v21 = vpop.f32.mrb[4].mxu1 }
 0x1da   :  { %v341_v22 = vadd.f32 %v736_v11, %v340_v21  ;;  %v895_v23 = vpop.f32.mrb[5].mxu1  ;;  %926 = vmatmul.mubr.bf16.vlgmr.msra.gmra.mrb[20].mxu0 %v379_v20 }
 0x1db   :  { %v343_v24 = vpop.f32.mrb[6].mxu1  ;;  %929 = vmatprep.mubr.msk.bf16.mxu0 %vm1011_vm0, %v1010_v0 }
 0x1dc   :  { %v344_v25 = vadd.f32 %v736_v11, %v343_v24  ;;  %v896_v26 = vpop.f32.mrb[7].mxu1  ;;  %v372_v27 = vmax.f32 %v341_v22, 0.0  ;;  %v527_v22 = vlaneseq }
 0x1de   :  { %v373_v28 = vmax.f32 %v344_v25, 0.0  ;;  %v528_v23 = vand.u32 127, %v527_v22 }
 0x1e0   :  { %v380_v29 = vpack.c.bf16 %v373_v28, %v372_v27  ;;  %vm531_vm1 = vcmp.lt.s32.totalorder %v528_v23, 32 }
 0x1e1   :  { %v348_v30 = vpop.f32.mrb[8].mxu1  ;;  %v754_v26 = vsel %vm531_vm1, 1.0, %v1010_v0 }
 0x1e2   :  { %v349_v31 = vadd.f32 %v736_v11, %v348_v30  ;;  %v899_v32 = vpop.f32.mrb[9].mxu1  ;;  %930 = vmatmul.mubr.bf16.gmra.mrb[24].mxu0 %v380_v29 }
 0x1e3   :  { %v351_v33 = vpop.f32.mrb[10].mxu1  ;;  %933 = vmatprep.mubr.msk.bf16.mxu0 %vm1011_vm0, %v1010_v0 }
 0x1e4   :  { %v352_v34 = vadd.f32 %v736_v11, %v351_v33  ;;  %v900_v35 = vpop.f32.mrb[11].mxu1  ;;  %v374_v36 = vmax.f32 %v349_v31, 0.0 }
 0x1e6   :  { %v375_v37 = vmax.f32 %v352_v34, 0.0 }
 0x1e8   :  { %v381_v38 = vpack.c.bf16 %v375_v37, %v374_v36 }
 0x1e9   :  { %v356_v39 = vpop.f32.mrb[12].mxu1 }
 0x1ea   :  { %v357_v40 = vadd.f32 %v736_v11, %v356_v39  ;;  %v903_v41 = vpop.f32.mrb[13].mxu1  ;;  %934 = vmatmul.mubr.bf16.gmra.mrb[28].mxu0 %v381_v38 }
 0x1eb   :  { %v359_v42 = vpop.f32.mrb[14].mxu1 }
 0x1ec   :  { %v360_v43 = vadd.f32 %v736_v11, %v359_v42  ;;  %v904_v44 = vpop.f32.mrb[15].mxu1  ;;  %v376_v45 = vmax.f32 %v357_v40, 0.0 }
 0x1ee   :  { %v377_v46 = vmax.f32 %v360_v43, 0.0 }
 0x1f0   :  { %v382_v47 = vpack.c.bf16 %v377_v46, %v376_v45 }
 0x1f1   :  { %v364_v48 = vpop.f32.mrb[16].mxu1 }
 0x1f2   :  { %v365_v49 = vadd.f32 %v736_v11, %v364_v48  ;;  %v907_v50 = vpop.f32.mrb[17].mxu1  ;;  %938 = vmatmul.mubr.bf16.vlgmr.msra.gmra.mrb[20].mxu1 %v382_v47 }
 0x1f3   :  { %v367_v51 = vpop.f32.mrb[18].mxu1  ;;  %941 = vmatprep.mubr.msk.bf16.mxu1 %vm1011_vm0, %v1010_v0 }
 0x1f4   :  { %v378_v52 = vmax.f32 %v365_v49, 0.0  ;;  %v908_v53 = vpop.f32.mrb[19].mxu1 }
 0x1f6   :  { %v383_v54 = vpack.c.bf16 %v378_v52, %v378_v52 }
 0x1fa   :  { %942 = vmatmul.mubr.bf16.gmra.mrb[24].mxu1 %v383_v54 }
 0x2ad   :  { %v489_v56 = vpop.f32.mrb[20].mxu0 }
 0x2ae   :  { %v490_v57 = vadd.f32 %v745_v55, %v489_v56  ;;  %v927_v58 = vpop.f32.mrb[21].mxu0 }
 0x2af   :  { %v492_v59 = vpop.f32.mrb[22].mxu0 }
 0x2b0   :  { %534 = vadd.xlane.f32.xlu0 %v490_v57  ;;  %v928_v60 = vpop.f32.mrb[23].mxu0  ;;  %v493_v61 = vadd.f32 %v745_v55, %v492_v59 }
 0x2b4   :  { %536 = vadd.xlane.f32.xlu0 %v493_v61 }
 0x2b5   :  { %v497_v62 = vpop.f32.mrb[24].mxu0 }
 0x2b6   :  { %v498_v63 = vadd.f32 %v745_v55, %v497_v62  ;;  %v931_v1 = vpop.f32.mrb[25].mxu0 }
 0x2b7   :  { %v500_v2 = vpop.f32.mrb[26].mxu0 }
 0x2b8   :  { %538 = vadd.xlane.f32.xlu1 %v498_v63  ;;  %v932_v3 = vpop.f32.mrb[27].mxu0  ;;  %v501_v4 = vadd.f32 %v745_v55, %v500_v2 }
 0x2bc   :  { %540 = vadd.xlane.f32.xlu1 %v501_v4 }
 0x2bd   :  { %v505_v5 = vpop.f32.mrb[28].mxu0 }
 0x2be   :  { %v506_v6 = vadd.f32 %v745_v55, %v505_v5  ;;  %v935_v7 = vpop.f32.mrb[29].mxu0 }
 0x2bf   :  { %v508_v8 = vpop.f32.mrb[30].mxu0 }
 0x2c0   :  { %v509_v9 = vadd.f32 %v745_v55, %v508_v8  ;;  %542 = vadd.xlane.f32.xlu0 %v506_v6  ;;  %v936_v10 = vpop.f32.mrb[31].mxu0 }
 0x2c2   :  { %544 = vadd.xlane.f32.xlu1 %v509_v9 }
 0x2c5   :  { %v513_v11 = vpop.f32.mrb[20].mxu1 }
 0x2c6   :  { %v514_v12 = vadd.f32 %v745_v55, %v513_v11  ;;  %v939_v13 = vpop.f32.mrb[21].mxu1 }
 0x2c7   :  { %v516_v14 = vpop.f32.mrb[22].mxu1 }
 0x2c8   :  { %v517_v15 = vadd.f32 %v745_v55, %v516_v14  ;;  %v940_v16 = vpop.f32.mrb[23].mxu1  ;;  %546 = vadd.xlane.f32.xlu0 %v514_v12 }
 0x2ca   :  { %548 = vadd.xlane.f32.xlu1 %v517_v15 }
 0x2cd   :  { %v521_v17 = vpop.f32.mrb[24].mxu1 }
 0x2ce   :  { %v522_v18 = vadd.f32 %v745_v55, %v521_v17  ;;  %v943_v19 = vpop.f32.mrb[25].mxu1 }
 0x2cf   :  { %v524_v20 = vpop.f32.mrb[26].mxu1 }
 0x2d0   :  { %v944_v21 = vpop.f32.mrb[27].mxu1  ;;  %550 = vadd.xlane.f32.xlu0 %v522_v18 }
 0x2d1   :  { %v1261_v21 = vld [vmem:[%s1305_s7] ss:$0 sm:$0xff] }
 0x33d   :  { %v535_v24 = vpop.xlane.xlu0 %534 }
 0x33e   :  { %v552_v25 = vmul.f32 0.03125, %v535_v24 }
 0x340   :  { %v561_v27 = vsub.f32 %v490_v57, %v552_v25 }
 0x341   :  { %v537_v28 = vpop.xlane.xlu0 %536 }
 0x342   :  { %v553_v29 = vmul.f32 0.03125, %v537_v28  ;;  %v1221_v30 = vmul.f32 %v754_v26, %v561_v27 }
 0x344   :  { %v562_v31 = vsub.f32 %v493_v61, %v553_v29  ;;  %v579_v32 = vmul.f32 %v1221_v30, %v1221_v30  ;;  %v756_v29 = vld [vmem:[%s1306_s8] ss:$0 sm:$0xff] }
 0x345   :  { %v539_v33 = vpop.xlane.xlu1 %538 }
 0x346   :  { %v554_v34 = vmul.f32 0.03125, %v539_v33  ;;  %588 = vadd.xlane.f32.xlu1 %v579_v32  ;;  %v1225_v35 = vmul.f32 %v754_v26, %v562_v31 }
 0x348   :  { %v563_v36 = vsub.f32 %v498_v63, %v554_v34  ;;  %v580_v37 = vmul.f32 %v1225_v35, %v1225_v35 }
 0x349   :  { %v541_v38 = vpop.xlane.xlu1 %540 }
 0x34a   :  { %v555_v0 = vmul.f32 0.03125, %v541_v38  ;;  %590 = vadd.xlane.f32.xlu0 %v580_v37  ;;  %v1229_v39 = vmul.f32 %v754_v26, %v563_v36 }
 0x34c   :  { %v564_v40 = vsub.f32 %v501_v4, %v555_v0  ;;  %v581_v41 = vmul.f32 %v1229_v39, %v1229_v39 }
 0x34d   :  { %v543_v42 = vpop.xlane.xlu0 %542 }
 0x34e   :  { %v556_v43 = vmul.f32 0.03125, %v543_v42  ;;  %592 = vadd.xlane.f32.xlu1 %v581_v41  ;;  %v1233_v44 = vmul.f32 %v754_v26, %v564_v40 }
 0x34f   :  { %v545_v45 = vpop.xlane.xlu1 %544 }
 0x350   :  { %v565_v46 = vsub.f32 %v506_v6, %v556_v43  ;;  %v557_v47 = vmul.f32 0.03125, %v545_v45  ;;  %v582_v48 = vmul.f32 %v1233_v44, %v1233_v44 }
 0x352   :  { %v566_v49 = vsub.f32 %v509_v9, %v557_v47  ;;  %594 = vadd.xlane.f32.xlu0 %v582_v48  ;;  %v1237_v50 = vmul.f32 %v754_v26, %v565_v46 }
 0x354   :  { %v583_v51 = vmul.f32 %v1237_v50, %v1237_v50  ;;  %v1241_v52 = vmul.f32 %v754_v26, %v566_v49 }
 0x355   :  { %v547_v53 = vpop.xlane.xlu0 %546 }
 0x356   :  { %v558_v54 = vmul.f32 0.03125, %v547_v53  ;;  %596 = vadd.xlane.f32.xlu1 %v583_v51  ;;  %v584_v55 = vmul.f32 %v1241_v52, %v1241_v52 }
 0x357   :  { %v549_v56 = vpop.xlane.xlu1 %548 }
 0x358   :  { %v567_v57 = vsub.f32 %v514_v12, %v558_v54  ;;  %v559_v58 = vmul.f32 0.03125, %v549_v56  ;;  %598 = vadd.xlane.f32.xlu0 %v584_v55 }
 0x35a   :  { %v568_v59 = vsub.f32 %v517_v15, %v559_v58  ;;  %v1245_v60 = vmul.f32 %v754_v26, %v567_v57 }
 0x35c   :  { %v585_v61 = vmul.f32 %v1245_v60, %v1245_v60  ;;  %v1249_v62 = vmul.f32 %v754_v26, %v568_v59 }
 0x35d   :  { %v551_v63 = vpop.xlane.xlu0 %550 }
 0x35e   :  { %v560_v1 = vmul.f32 0.03125, %v551_v63  ;;  %600 = vadd.xlane.f32.xlu1 %v585_v61  ;;  %v586_v2 = vmul.f32 %v1249_v62, %v1249_v62 }
 0x360   :  { %v569_v3 = vsub.f32 %v522_v18, %v560_v1  ;;  %602 = vadd.xlane.f32.xlu0 %v586_v2 }
 0x362   :  { %v1253_v4 = vmul.f32 %v754_v26, %v569_v3 }
 0x364   :  { %v587_v5 = vmul.f32 %v1253_v4, %v1253_v4 }
 0x366   :  { %604 = vadd.xlane.f32.xlu1 %v587_v5 }
 0x3d3   :  { %v589_v6 = vpop.xlane.xlu1 %588 }
 0x3d4   :  { %v606_v7 = vmul.f32 0.03125, %v589_v6 }
 0x3d6   :  { %v615_v8 = vadd.f32 1e-05, %v606_v7 }
 0x3d7   :  { %v591_v9 = vpop.xlane.xlu0 %590 }
 0x3d8   :  { %992 = vrsqrt.f32 %v615_v8  ;;  %v607_v10 = vmul.f32 0.03125, %v591_v9 }
 0x3da   :  { %v616_v11 = vadd.f32 1e-05, %v607_v10 }
 0x3db   :  { %v593_v12 = vpop.xlane.xlu1 %592 }
 0x3dc   :  { %994 = vrsqrt.f32 %v616_v11  ;;  %v608_v13 = vmul.f32 0.03125, %v593_v12 }
 0x3de   :  { %v617_v14 = vadd.f32 1e-05, %v608_v13 }
 0x3df   :  { %v595_v15 = vpop.xlane.xlu0 %594 }
 0x3e0   :  { %996 = vrsqrt.f32 %v617_v14  ;;  %v609_v16 = vmul.f32 0.03125, %v595_v15 }
 0x3e2   :  { %v993_v17 = vpop.eup %992  ;;  %v618_v18 = vadd.f32 1e-05, %v609_v16 }
 0x3e3   :  { %v633_v19 = vmul.f32 %v993_v17, %v1221_v30  ;;  %v597_v20 = vpop.xlane.xlu1 %596 }
 0x3e4   :  { %998 = vrsqrt.f32 %v618_v18  ;;  %v610_v22 = vmul.f32 0.03125, %v597_v20 }
 0x3e5   :  { %v599_v23 = vpop.xlane.xlu0 %598  ;;  %v648_v27 = vmul.f32 %v1261_v21, %v633_v19 }
 0x3e6   :  { %v995_v24 = vpop.eup %994  ;;  %v619_v25 = vadd.f32 1e-05, %v610_v22  ;;  %v611_v26 = vmul.f32 0.03125, %v599_v23 }
 0x3e7   :  { %v634_v28 = vmul.f32 %v995_v24, %v1225_v35  ;;  %v663_v33 = vadd.f32 %v756_v29, %v648_v27 }
 0x3e8   :  { %1000 = vrsqrt.f32 %v619_v25  ;;  %v620_v30 = vadd.f32 1e-05, %v611_v26 }
 0x3e9   :  { %v649_v31 = vmul.f32 %v1261_v21, %v634_v28 }
 0x3ea   :  { %v997_v32 = vpop.eup %996  ;;  %1002 = vrsqrt.f32 %v620_v30 }
 0x3eb   :  { %v664_v34 = vadd.f32 %v756_v29, %v649_v31  ;;  %v635_v36 = vmul.f32 %v997_v32, %v1229_v39  ;;  %v601_v37 = vpop.xlane.xlu1 %600 }
 0x3ec   :  { %v612_v38 = vmul.f32 0.03125, %v601_v37 }
 0x3ed   :  { %v778_v0 = vpack.c.bf16 %v664_v34, %v663_v33  ;;  %v603_v40 = vpop.xlane.xlu0 %602  ;;  %v650_v43 = vmul.f32 %v1261_v21, %v635_v36 }
 0x3ee   :  { %v999_v41 = vpop.eup %998  ;;  %v621_v35 = vadd.f32 1e-05, %v612_v38  ;;  %v613_v42 = vmul.f32 0.03125, %v603_v40 }
 0x3ef   :  { %779 = vst [vmem:[%s1307_s9] sm:$0xff] %v778_v0   ;;  %v636_v45 = vmul.f32 %v999_v41, %v1233_v44  ;;  %v665_v48 = vadd.f32 %v756_v29, %v650_v43 }
 0x3f0   :  { %1004 = vrsqrt.f32 %v621_v35  ;;  %v622_v46 = vadd.f32 1e-05, %v613_v42 }
 0x3f1   :  { %v651_v47 = vmul.f32 %v1261_v21, %v636_v45 }
 0x3f2   :  { %v1001_v39 = vpop.eup %1000  ;;  %1006 = vrsqrt.f32 %v622_v46 }
 0x3f3   :  { %v666_v49 = vadd.f32 %v756_v29, %v651_v47  ;;  %v637_v51 = vmul.f32 %v1001_v39, %v1237_v50  ;;  %v605_v53 = vpop.xlane.xlu1 %604 }
 0x3f4   :  { %v1003_v54 = vpop.eup %1002  ;;  %v614_v55 = vmul.f32 0.03125, %v605_v53 }
 0x3f5   :  { %v783_v56 = vpack.c.bf16 %v666_v49, %v665_v48  ;;  %v652_v57 = vmul.f32 %v1261_v21, %v637_v51  ;;  %v638_v58 = vmul.f32 %v1003_v54, %v1241_v52 }
 0x3f6   :  { %v623_v59 = vadd.f32 1e-05, %v614_v55 }
 0x3f7   :  { %795 = vst [vmem:[%s1307_s9 + $0x8] sm:$0xff] %v783_v56   ;;  %v653_v44 = vmul.f32 %v1261_v21, %v638_v58  ;;  %v667_v61 = vadd.f32 %v756_v29, %v652_v57 }
 0x3f8   :  { %1008 = vrsqrt.f32 %v623_v59 }
 0x3f9   :  { %v668_v63 = vadd.f32 %v756_v29, %v653_v44 }
 0x3fa   :  { %v1005_v1 = vpop.eup %1004 }
 0x3fb   :  { %v788_v50 = vpack.c.bf16 %v668_v63, %v667_v61  ;;  %v639_v2 = vmul.f32 %v1005_v1, %v1245_v60 }
 0x3fc   :  { %v1007_v3 = vpop.eup %1006 }
 0x3fd   :  { %796 = vst [vmem:[%s1307_s9 + $0x10] sm:$0xff] %v788_v50   ;;  %v654_v52 = vmul.f32 %v1261_v21, %v639_v2  ;;  %v640_v5 = vmul.f32 %v1007_v3, %v1249_v62 }
 0x3ff   :  { %v655_v6 = vmul.f32 %v1261_v21, %v640_v5  ;;  %v669_v7 = vadd.f32 %v756_v29, %v654_v52 }
 0x401   :  { %v670_v8 = vadd.f32 %v756_v29, %v655_v6 }
 0x402   :  { %v1009_v9 = vpop.eup %1008 }
 0x403   :  { %v793_v10 = vpack.c.bf16 %v670_v8, %v669_v7  ;;  %v641_v11 = vmul.f32 %v1009_v9, %v1253_v4 }
 0x405   :  { %797 = vst [vmem:[%s1307_s9 + $0x18] sm:$0xff] %v793_v10   ;;  %v656_v60 = vmul.f32 %v1261_v21, %v641_v11 }
 0x407   :  { %v671_v12 = vadd.f32 %v756_v29, %v656_v60 }
 0x409   :  { %v774_v13 = vpack.c.bf16 %v671_v12, %v671_v12 }
 0x40b   :  { %717 = vst [vmem:[%s1307_s9 + $0x20] sm:$0xf] %v774_v13 }

// kernel: _lambda_.11
= control target key start
LH: loop header
LB: loop body
LE: loop exit
PB: predicated region body
PF: predicated region fallthrough
CT: control target
= control target key end

     0   :  { %v1041_v0 = vmov 0.0   ;;  %vm1042_vm0 = vmmov 0   ;;  %s1385_s1 = inlined_call_operand.vmem [shape: bf16[128,128], index: 1, kind: input, shape index: {}]   ;;  %s1386_s3 = inlined_call_operand.vmem [shape: bf16[128,128], index: 3, kind: input, shape index: {}]   ;;  %s1387_s0 = inlined_call_operand.vmem [shape: bf16[72,128], index: 0, kind: input, shape index: {}]   ;;  %s1388_s5 = inlined_call_operand.vmem [shape: bf16[128,128], index: 5, kind: input, shape index: {}]   ;;  %s1389_s2 = inlined_call_operand.vmem [shape: f32[1,128], index: 2, kind: input, shape index: {}]   ;;  %s1390_s4 = inlined_call_operand.vmem [shape: f32[1,128], index: 4, kind: input, shape index: {}]   ;;  %s1391_s6 = inlined_call_operand.vmem [shape: f32[1,128], index: 6, kind: input, shape index: {}]   ;;  %s1392_s7 = inlined_call_operand.vmem [shape: f32[1,128], index: 7, kind: input, shape index: {}]   ;;  %s1393_s8 = inlined_call_operand.vmem [shape: f32[1,128], index: 8, kind: input, shape index: {}]   ;;  %s1394_s9 = inlined_call_operand.vmem [shape: bf16[72,128], index: 9, kind: output, shape index: {}]  }
   0x1   :  { %864 = vmatprep.subr.bf16.mxu0 %v1041_v0  ;;  %v990_v1 = vld [vmem:[%s1385_s1] sm:$0xff]   ;;  %880 = vmatprep.mubr.msk.bf16.mxu0 %vm1042_vm0, %v1041_v0  ;;  %v991_v2 = vld [vmem:[%s1385_s1 + $0x8] sm:$0xff]   ;;  %v992_v3 = vld [vmem:[%s1385_s1 + $0x10] sm:$0xff]  }
   0x2   :  { %900 = vmatprep.subr.bf16.mxu1 %v1041_v0  ;;  %916 = vmatprep.mubr.msk.bf16.mxu1 %vm1042_vm0, %v1041_v0  ;;  %v993_v4 = vld [vmem:[%s1385_s1 + $0x18] sm:$0xff]   ;;  %v1003_v5 = vld [vmem:[%s1386_s3] sm:$0xff]   ;;  %v1004_v6 = vld [vmem:[%s1386_s3 + $0x8] sm:$0xff]  }
   0x3   :  { %865 = vmatpush3.bf16.msra.mxu0 %v990_v1  ;;  %901 = vmatpush3.bf16.msra.mxu1 %v1003_v5  ;;  %v994_v7 = vld [vmem:[%s1385_s1 + $0x20] sm:$0xff]   ;;  %v1005_v8 = vld [vmem:[%s1386_s3 + $0x10] sm:$0xff]   ;;  %v995_v9 = vld [vmem:[%s1385_s1 + $0x28] sm:$0xff]  }
   0x4   :  { %866 = vmatprep.subr.bf16.mxu0 %v1041_v0  ;;  %902 = vmatprep.subr.bf16.mxu1 %v1041_v0  ;;  %v1006_v10 = vld [vmem:[%s1386_s3 + $0x18] sm:$0xff]   ;;  %v996_v11 = vld [vmem:[%s1385_s1 + $0x30] sm:$0xff]   ;;  %v1007_v12 = vld [vmem:[%s1386_s3 + $0x20] sm:$0xff]  }
   0x5   :  { %v997_v13 = vld [vmem:[%s1385_s1 + $0x38] sm:$0xff]   ;;  %v1151_v14 = vld [vmem:[%s1387_s0] sm:$0xff]   ;;  %v1008_v15 = vld [vmem:[%s1386_s3 + $0x28] sm:$0xff]  }
   0x6   :  { %v1166_v16 = vld [vmem:[%s1387_s0 + $0x8] sm:$0xff]   ;;  %v1174_v17 = vld [vmem:[%s1387_s0 + $0x10] sm:$0xff]   ;;  %v1182_v18 = vld [vmem:[%s1387_s0 + $0x18] sm:$0xff]  }
   0x7   :  { %867 = vmatpush3.bf16.msra.mxu0 %v991_v2  ;;  %903 = vmatpush3.bf16.msra.mxu1 %v1004_v6  ;;  %v1190_v19 = vld [vmem:[%s1387_s0 + $0x20] sm:$0xf]  ;;  %v1009_v21 = vld [vmem:[%s1386_s3 + $0x30] sm:$0xff]   ;;  %v1010_v22 = vld [vmem:[%s1386_s3 + $0x38] sm:$0xff]  }
   0x8   :  { %868 = vmatprep.subr.bf16.mxu0 %v1041_v0  ;;  %904 = vmatprep.subr.bf16.mxu1 %v1041_v0  ;;  %v754_v20 = vcombine.low %v1190_v19, %v1190_v19  ;;  %v1011_v23 = vld [vmem:[%s1388_s5] sm:$0xff]   ;;  %v1012_v24 = vld [vmem:[%s1388_s5 + $0x8] sm:$0xff]   ;;  %v1013_v25 = vld [vmem:[%s1388_s5 + $0x10] sm:$0xff]  }
   0x9   :  { %v1014_v26 = vld [vmem:[%s1388_s5 + $0x18] sm:$0xff]   ;;  %v1015_v27 = vld [vmem:[%s1388_s5 + $0x20] sm:$0xff]   ;;  %v1016_v28 = vld [vmem:[%s1388_s5 + $0x28] sm:$0xff]  }
   0xa   :  { %v749_v29 = vld [vmem:[%s1389_s2] ss:$0 sm:$0xff] }
   0xb   :  { %869 = vmatpush3.bf16.msra.mxu0 %v992_v3  ;;  %905 = vmatpush3.bf16.msra.mxu1 %v1005_v8 }
   0xc   :  { %870 = vmatprep.subr.bf16.mxu0 %v1041_v0  ;;  %906 = vmatprep.subr.bf16.mxu1 %v1041_v0 }
   0xf   :  { %871 = vmatpush3.bf16.msra.mxu0 %v993_v4  ;;  %907 = vmatpush3.bf16.msra.mxu1 %v1006_v10  ;;  %v1017_v10 = vld [vmem:[%s1388_s5 + $0x30] sm:$0xff]  }
  0x10   :  { %872 = vmatprep.subr.bf16.mxu0 %v1041_v0  ;;  %908 = vmatprep.subr.bf16.mxu1 %v1041_v0 }
  0x13   :  { %873 = vmatpush3.bf16.msra.mxu0 %v994_v7  ;;  %909 = vmatpush3.bf16.msra.mxu1 %v1007_v12  ;;  %v763_v12 = vld [vmem:[%s1390_s4] ss:$0 sm:$0xff] }
  0x14   :  { %874 = vmatprep.subr.bf16.mxu0 %v1041_v0  ;;  %910 = vmatprep.subr.bf16.mxu1 %v1041_v0 }
  0x17   :  { %875 = vmatpush3.bf16.msra.mxu0 %v995_v9  ;;  %911 = vmatpush3.bf16.msra.mxu1 %v1008_v15 }
  0x18   :  { %876 = vmatprep.subr.bf16.mxu0 %v1041_v0  ;;  %912 = vmatprep.subr.bf16.mxu1 %v1041_v0 }
  0x1b   :  { %877 = vmatpush3.bf16.msra.mxu0 %v996_v11  ;;  %913 = vmatpush3.bf16.msra.mxu1 %v1009_v21  ;;  %v1018_v11 = vld [vmem:[%s1388_s5 + $0x38] sm:$0xff]  }
  0x1c   :  { %878 = vmatprep.subr.bf16.mxu0 %v1041_v0  ;;  %914 = vmatprep.subr.bf16.mxu1 %v1041_v0 }
  0x1f   :  { %879 = vmatpush3.bf16.msra.mxu0 %v997_v13  ;;  %915 = vmatpush3.bf16.msra.mxu1 %v1010_v22 }
  0x20   :  { %936 = vmatprep.subr.bf16.mxu0 %v1041_v0  ;;  %972 = vmatprep.subr.bf16.mxu1 %v1041_v0 }
  0x22   :  { %881 = vmatmul.mubr.bf16.vlgmr.msra.gmra.mrb[0].mxu0 %v1151_v14 }
  0x23   :  { %884 = vmatprep.mubr.msk.bf16.mxu0 %vm1042_vm0, %v1041_v0  ;;  %937 = vmatpush3.bf16.msra.mxu0 %v1011_v23 }
  0x24   :  { %938 = vmatprep.subr.bf16.mxu0 %v1041_v0 }
  0x27   :  { %939 = vmatpush3.bf16.msra.mxu0 %v1012_v24 }
  0x28   :  { %940 = vmatprep.subr.bf16.mxu0 %v1041_v0 }
  0x2a   :  { %885 = vmatmul.mubr.bf16.gmra.mrb[4].mxu0 %v1166_v16 }
  0x2b   :  { %888 = vmatprep.mubr.msk.bf16.mxu0 %vm1042_vm0, %v1041_v0  ;;  %941 = vmatpush3.bf16.msra.mxu0 %v1013_v25 }
  0x2c   :  { %942 = vmatprep.subr.bf16.mxu0 %v1041_v0 }
  0x2f   :  { %943 = vmatpush3.bf16.msra.mxu0 %v1014_v26 }
  0x30   :  { %944 = vmatprep.subr.bf16.mxu0 %v1041_v0 }
  0x32   :  { %889 = vmatmul.mubr.bf16.gmra.mrb[8].mxu0 %v1174_v17 }
  0x33   :  { %892 = vmatprep.mubr.msk.bf16.mxu0 %vm1042_vm0, %v1041_v0  ;;  %945 = vmatpush3.bf16.msra.mxu0 %v1015_v27 }
  0x34   :  { %946 = vmatprep.subr.bf16.mxu0 %v1041_v0 }
  0x37   :  { %947 = vmatpush3.bf16.msra.mxu0 %v1016_v28 }
  0x38   :  { %948 = vmatprep.subr.bf16.mxu0 %v1041_v0 }
  0x3a   :  { %893 = vmatmul.mubr.bf16.gmra.mrb[12].mxu0 %v1182_v18 }
  0x3b   :  { %896 = vmatprep.mubr.msk.bf16.mxu0 %vm1042_vm0, %v1041_v0  ;;  %949 = vmatpush3.bf16.msra.mxu0 %v1017_v10 }
  0x3c   :  { %950 = vmatprep.subr.bf16.mxu0 %v1041_v0 }
  0x3f   :  { %951 = vmatpush3.bf16.msra.mxu0 %v1018_v11 }
  0x42   :  { %897 = vmatmul.mubr.bf16.gmra.mrb[16].mxu0 %v754_v20 }
  0x43   :  { %952 = vmatprep.mubr.msk.bf16.mxu0 %vm1042_vm0, %v1041_v0 }
  0xf5   :  { %v175_v30 = vpop.f32.mrb[0].mxu0 }
  0xf6   :  { %v176_v31 = vadd.f32 %v749_v29, %v175_v30  ;;  %v882_v32 = vpop.f32.mrb[1].mxu0 }
  0xf7   :  { %v178_v33 = vpop.f32.mrb[2].mxu0 }
  0xf8   :  { %v179_v34 = vadd.f32 %v749_v29, %v178_v33  ;;  %v883_v35 = vpop.f32.mrb[3].mxu0  ;;  %v213_v36 = vmax.f32 %v176_v31, 0.0 }
  0xfa   :  { %v214_v37 = vmax.f32 %v179_v34, 0.0 }
  0xfc   :  { %v222_v38 = vpack.c.bf16 %v214_v37, %v213_v36 }
  0xfd   :  { %v183_v39 = vpop.f32.mrb[4].mxu0 }
  0xfe   :  { %v184_v40 = vadd.f32 %v749_v29, %v183_v39  ;;  %v886_v41 = vpop.f32.mrb[5].mxu0  ;;  %917 = vmatmul.mubr.bf16.vlgmr.msra.gmra.mrb[0].mxu1 %v222_v38 }
  0xff   :  { %v186_v42 = vpop.f32.mrb[6].mxu0  ;;  %920 = vmatprep.mubr.msk.bf16.mxu1 %vm1042_vm0, %v1041_v0  ;;  %980 = vmatpush3.bf16.msra.mxu1 %v1011_v23 }
 0x100   :  { %v187_v43 = vadd.f32 %v749_v29, %v186_v42  ;;  %v887_v44 = vpop.f32.mrb[7].mxu0  ;;  %973 = vmatprep.subr.bf16.mxu1 %v1041_v0  ;;  %v215_v45 = vmax.f32 %v184_v40, 0.0 }
 0x102   :  { %v216_v46 = vmax.f32 %v187_v43, 0.0 }
 0x103   :  { %981 = vmatpush3.bf16.msra.mxu1 %v1012_v24 }
 0x104   :  { %v223_v47 = vpack.c.bf16 %v216_v46, %v215_v45  ;;  %974 = vmatprep.subr.bf16.mxu1 %v1041_v0 }
 0x105   :  { %v191_v48 = vpop.f32.mrb[8].mxu0 }
 0x106   :  { %v192_v49 = vadd.f32 %v749_v29, %v191_v48  ;;  %v890_v50 = vpop.f32.mrb[9].mxu0  ;;  %921 = vmatmul.mubr.bf16.gmra.mrb[4].mxu1 %v223_v47 }
 0x107   :  { %v194_v51 = vpop.f32.mrb[10].mxu0  ;;  %924 = vmatprep.mubr.msk.bf16.mxu1 %vm1042_vm0, %v1041_v0  ;;  %982 = vmatpush3.bf16.msra.mxu1 %v1013_v25 }
 0x108   :  { %v195_v52 = vadd.f32 %v749_v29, %v194_v51  ;;  %v891_v53 = vpop.f32.mrb[11].mxu0  ;;  %975 = vmatprep.subr.bf16.mxu1 %v1041_v0  ;;  %v217_v54 = vmax.f32 %v192_v49, 0.0 }
 0x10a   :  { %v218_v55 = vmax.f32 %v195_v52, 0.0 }
 0x10b   :  { %983 = vmatpush3.bf16.msra.mxu1 %v1014_v26 }
 0x10c   :  { %v224_v56 = vpack.c.bf16 %v218_v55, %v217_v54  ;;  %976 = vmatprep.subr.bf16.mxu1 %v1041_v0 }
 0x10d   :  { %v199_v57 = vpop.f32.mrb[12].mxu0 }
 0x10e   :  { %v200_v58 = vadd.f32 %v749_v29, %v199_v57  ;;  %v894_v59 = vpop.f32.mrb[13].mxu0  ;;  %925 = vmatmul.mubr.bf16.gmra.mrb[8].mxu1 %v224_v56 }
 0x10f   :  { %v202_v60 = vpop.f32.mrb[14].mxu0  ;;  %928 = vmatprep.mubr.msk.bf16.mxu1 %vm1042_vm0, %v1041_v0  ;;  %984 = vmatpush3.bf16.msra.mxu1 %v1015_v27 }
 0x110   :  { %v203_v61 = vadd.f32 %v749_v29, %v202_v60  ;;  %v895_v62 = vpop.f32.mrb[15].mxu0  ;;  %977 = vmatprep.subr.bf16.mxu1 %v1041_v0  ;;  %v219_v63 = vmax.f32 %v200_v58, 0.0 }
 0x112   :  { %v220_v1 = vmax.f32 %v203_v61, 0.0  ;;  %v772_v61 = vld [vmem:[%s1391_s6] ss:$0 sm:$0xff] }
 0x113   :  { %985 = vmatpush3.bf16.msra.mxu1 %v1016_v28 }
 0x114   :  { %v225_v2 = vpack.c.bf16 %v220_v1, %v219_v63  ;;  %978 = vmatprep.subr.bf16.mxu1 %v1041_v0 }
 0x115   :  { %v207_v3 = vpop.f32.mrb[16].mxu0 }
 0x116   :  { %v208_v4 = vadd.f32 %v749_v29, %v207_v3  ;;  %929 = vmatmul.mubr.bf16.gmra.mrb[12].mxu1 %v225_v2  ;;  %v898_v5 = vpop.f32.mrb[17].mxu0 }
 0x117   :  { %v210_v6 = vpop.f32.mrb[18].mxu0  ;;  %932 = vmatprep.mubr.msk.bf16.mxu1 %vm1042_vm0, %v1041_v0  ;;  %986 = vmatpush3.bf16.msra.mxu1 %v1017_v10 }
 0x118   :  { %v221_v7 = vmax.f32 %v208_v4, 0.0  ;;  %v899_v8 = vpop.f32.mrb[19].mxu0  ;;  %979 = vmatprep.subr.bf16.mxu1 %v1041_v0 }
 0x11a   :  { %v226_v9 = vpack.c.bf16 %v221_v7, %v221_v7 }
 0x11b   :  { %987 = vmatpush3.bf16.msra.mxu1 %v1018_v11 }
 0x11e   :  { %933 = vmatmul.mubr.bf16.gmra.mrb[16].mxu1 %v226_v9 }
 0x11f   :  { %964 = vmatprep.mubr.msk.bf16.mxu1 %vm1042_vm0, %v1041_v0 }
 0x1d1   :  { %v332_v13 = vpop.f32.mrb[0].mxu1 }
 0x1d2   :  { %v333_v15 = vadd.f32 %v763_v12, %v332_v13  ;;  %v918_v20 = vpop.f32.mrb[1].mxu1 }
 0x1d3   :  { %v335_v21 = vpop.f32.mrb[2].mxu1 }
 0x1d4   :  { %v336_v22 = vadd.f32 %v763_v12, %v335_v21  ;;  %v919_v23 = vpop.f32.mrb[3].mxu1  ;;  %v370_v24 = vmax.f32 %v333_v15, 0.0 }
 0x1d6   :  { %v371_v25 = vmax.f32 %v336_v22, 0.0 }
 0x1d8   :  { %v379_v26 = vpack.c.bf16 %v371_v25, %v370_v24 }
 0x1d9   :  { %v340_v27 = vpop.f32.mrb[4].mxu1 }
 0x1da   :  { %v341_v28 = vadd.f32 %v763_v12, %v340_v27  ;;  %v922_v29 = vpop.f32.mrb[5].mxu1  ;;  %953 = vmatmul.mubr.bf16.vlgmr.msra.gmra.mrb[20].mxu0 %v379_v26 }
 0x1db   :  { %v343_v30 = vpop.f32.mrb[6].mxu1  ;;  %956 = vmatprep.mubr.msk.bf16.mxu0 %vm1042_vm0, %v1041_v0 }
 0x1dc   :  { %v344_v31 = vadd.f32 %v763_v12, %v343_v30  ;;  %v923_v32 = vpop.f32.mrb[7].mxu1  ;;  %v372_v33 = vmax.f32 %v341_v28, 0.0 }
 0x1de   :  { %v373_v34 = vmax.f32 %v344_v31, 0.0 }
 0x1e0   :  { %v380_v35 = vpack.c.bf16 %v373_v34, %v372_v33  ;;  %v527_v33 = vlaneseq }
 0x1e1   :  { %v348_v36 = vpop.f32.mrb[8].mxu1 }
 0x1e2   :  { %v349_v37 = vadd.f32 %v763_v12, %v348_v36  ;;  %v926_v38 = vpop.f32.mrb[9].mxu1  ;;  %957 = vmatmul.mubr.bf16.gmra.mrb[24].mxu0 %v380_v35  ;;  %v528_v34 = vand.u32 127, %v527_v33 }
 0x1e3   :  { %v351_v39 = vpop.f32.mrb[10].mxu1  ;;  %960 = vmatprep.mubr.msk.bf16.mxu0 %vm1042_vm0, %v1041_v0 }
 0x1e4   :  { %v352_v40 = vadd.f32 %v763_v12, %v351_v39  ;;  %v927_v41 = vpop.f32.mrb[11].mxu1  ;;  %v374_v42 = vmax.f32 %v349_v37, 0.0  ;;  %vm531_vm1 = vcmp.lt.s32.totalorder %v528_v34, 32  ;;  %v1318_v34 = vld [vmem:[%s1392_s7] ss:$0 sm:$0xff] }
 0x1e5   :  { %v1268_v37 = vsel %vm531_vm1, 1.0, %v1041_v0 }
 0x1e6   :  { %v375_v43 = vmax.f32 %v352_v40, 0.0 }
 0x1e8   :  { %v381_v44 = vpack.c.bf16 %v375_v43, %v374_v42 }
 0x1e9   :  { %v356_v45 = vpop.f32.mrb[12].mxu1 }
 0x1ea   :  { %v357_v46 = vadd.f32 %v763_v12, %v356_v45  ;;  %v930_v47 = vpop.f32.mrb[13].mxu1  ;;  %961 = vmatmul.mubr.bf16.gmra.mrb[28].mxu0 %v381_v44 }
 0x1eb   :  { %v359_v48 = vpop.f32.mrb[14].mxu1 }
 0x1ec   :  { %v360_v49 = vadd.f32 %v763_v12, %v359_v48  ;;  %v931_v50 = vpop.f32.mrb[15].mxu1  ;;  %v376_v51 = vmax.f32 %v357_v46, 0.0 }
 0x1ee   :  { %v377_v52 = vmax.f32 %v360_v49, 0.0 }
 0x1f0   :  { %v382_v53 = vpack.c.bf16 %v377_v52, %v376_v51 }
 0x1f1   :  { %v364_v54 = vpop.f32.mrb[16].mxu1 }
 0x1f2   :  { %v365_v55 = vadd.f32 %v763_v12, %v364_v54  ;;  %v934_v56 = vpop.f32.mrb[17].mxu1  ;;  %965 = vmatmul.mubr.bf16.vlgmr.msra.gmra.mrb[20].mxu1 %v382_v53 }
 0x1f3   :  { %v367_v57 = vpop.f32.mrb[18].mxu1  ;;  %968 = vmatprep.mubr.msk.bf16.mxu1 %vm1042_vm0, %v1041_v0 }
 0x1f4   :  { %v378_v58 = vmax.f32 %v365_v55, 0.0  ;;  %v935_v59 = vpop.f32.mrb[19].mxu1 }
 0x1f6   :  { %v383_v60 = vpack.c.bf16 %v378_v58, %v378_v58 }
 0x1fa   :  { %969 = vmatmul.mubr.bf16.gmra.mrb[24].mxu1 %v383_v60 }
 0x2ad   :  { %v489_v62 = vpop.f32.mrb[20].mxu0 }
 0x2ae   :  { %v490_v63 = vadd.f32 %v772_v61, %v489_v62  ;;  %v954_v1 = vpop.f32.mrb[21].mxu0 }
 0x2af   :  { %v492_v2 = vpop.f32.mrb[22].mxu0 }
 0x2b0   :  { %534 = vadd.xlane.f32.xlu0 %v490_v63  ;;  %v955_v3 = vpop.f32.mrb[23].mxu0  ;;  %v493_v4 = vadd.f32 %v772_v61, %v492_v2 }
 0x2b4   :  { %536 = vadd.xlane.f32.xlu0 %v493_v4 }
 0x2b5   :  { %v497_v5 = vpop.f32.mrb[24].mxu0 }
 0x2b6   :  { %v498_v6 = vadd.f32 %v772_v61, %v497_v5  ;;  %v958_v7 = vpop.f32.mrb[25].mxu0 }
 0x2b7   :  { %v500_v8 = vpop.f32.mrb[26].mxu0 }
 0x2b8   :  { %538 = vadd.xlane.f32.xlu1 %v498_v6  ;;  %v959_v9 = vpop.f32.mrb[27].mxu0  ;;  %v501_v10 = vadd.f32 %v772_v61, %v500_v8 }
 0x2bc   :  { %540 = vadd.xlane.f32.xlu1 %v501_v10 }
 0x2bd   :  { %v505_v11 = vpop.f32.mrb[28].mxu0 }
 0x2be   :  { %v506_v12 = vadd.f32 %v772_v61, %v505_v11  ;;  %v962_v13 = vpop.f32.mrb[29].mxu0 }
 0x2bf   :  { %v508_v15 = vpop.f32.mrb[30].mxu0 }
 0x2c0   :  { %v509_v20 = vadd.f32 %v772_v61, %v508_v15  ;;  %542 = vadd.xlane.f32.xlu0 %v506_v12  ;;  %v963_v21 = vpop.f32.mrb[31].mxu0 }
 0x2c2   :  { %544 = vadd.xlane.f32.xlu1 %v509_v20 }
 0x2c5   :  { %v513_v22 = vpop.f32.mrb[20].mxu1 }
 0x2c6   :  { %v514_v23 = vadd.f32 %v772_v61, %v513_v22  ;;  %v966_v24 = vpop.f32.mrb[21].mxu1 }
 0x2c7   :  { %v516_v25 = vpop.f32.mrb[22].mxu1 }
 0x2c8   :  { %v517_v26 = vadd.f32 %v772_v61, %v516_v25  ;;  %v967_v27 = vpop.f32.mrb[23].mxu1  ;;  %546 = vadd.xlane.f32.xlu0 %v514_v23 }
 0x2ca   :  { %548 = vadd.xlane.f32.xlu1 %v517_v26 }
 0x2cd   :  { %v521_v28 = vpop.f32.mrb[24].mxu1 }
 0x2ce   :  { %v522_v29 = vadd.f32 %v772_v61, %v521_v28  ;;  %v970_v30 = vpop.f32.mrb[25].mxu1 }
 0x2cf   :  { %v524_v31 = vpop.f32.mrb[26].mxu1 }
 0x2d0   :  { %v971_v32 = vpop.f32.mrb[27].mxu1  ;;  %550 = vadd.xlane.f32.xlu0 %v522_v29 }
 0x33d   :  { %v535_v35 = vpop.xlane.xlu0 %534 }
 0x33e   :  { %v552_v36 = vmul.f32 0.03125, %v535_v35 }
 0x340   :  { %v561_v38 = vsub.f32 %v490_v63, %v552_v36 }
 0x341   :  { %v537_v39 = vpop.xlane.xlu0 %536 }
 0x342   :  { %v553_v40 = vmul.f32 0.03125, %v537_v39  ;;  %v1271_v41 = vmul.f32 %v1268_v37, %v561_v38 }
 0x344   :  { %v562_v42 = vsub.f32 %v493_v4, %v553_v40  ;;  %v579_v43 = vmul.f32 %v1271_v41, %v1271_v41  ;;  %v672_v40 = vunpack.c.l.bf16 %v1151_v14 }
 0x345   :  { %v539_v44 = vpop.xlane.xlu1 %538 }
 0x346   :  { %v554_v45 = vmul.f32 0.03125, %v539_v44  ;;  %588 = vadd.xlane.f32.xlu1 %v579_v43  ;;  %v1276_v46 = vmul.f32 %v1268_v37, %v562_v42  ;;  %v673_v42 = vunpack.c.h.bf16 %v1151_v14 }
 0x348   :  { %v563_v47 = vsub.f32 %v498_v6, %v554_v45  ;;  %v580_v0 = vmul.f32 %v1276_v46, %v1276_v46 }
 0x349   :  { %v541_v48 = vpop.xlane.xlu1 %540 }
 0x34a   :  { %v555_v49 = vmul.f32 0.03125, %v541_v48  ;;  %590 = vadd.xlane.f32.xlu0 %v580_v0  ;;  %v1281_v50 = vmul.f32 %v1268_v37, %v563_v47  ;;  %v1327_v47 = vld [vmem:[%s1393_s8] ss:$0 sm:$0xff] }
 0x34c   :  { %v564_v51 = vsub.f32 %v501_v10, %v555_v49  ;;  %v581_v52 = vmul.f32 %v1281_v50, %v1281_v50 }
 0x34d   :  { %v543_v53 = vpop.xlane.xlu0 %542 }
 0x34e   :  { %v556_v54 = vmul.f32 0.03125, %v543_v53  ;;  %592 = vadd.xlane.f32.xlu1 %v581_v52  ;;  %v1286_v55 = vmul.f32 %v1268_v37, %v564_v51  ;;  %v681_v51 = vmul.f32 %v1268_v37, %v672_v40  ;;  %v682_v52 = vmul.f32 %v1268_v37, %v673_v42 }
 0x34f   :  { %v545_v56 = vpop.xlane.xlu1 %544 }
 0x350   :  { %v565_v57 = vsub.f32 %v506_v12, %v556_v54  ;;  %v557_v58 = vmul.f32 0.03125, %v545_v56  ;;  %v582_v59 = vmul.f32 %v1286_v55, %v1286_v55 }
 0x352   :  { %v566_v60 = vsub.f32 %v509_v20, %v557_v58  ;;  %594 = vadd.xlane.f32.xlu0 %v582_v59  ;;  %v1291_v61 = vmul.f32 %v1268_v37, %v565_v57  ;;  %v674_v59 = vunpack.c.l.bf16 %v1166_v16 }
 0x354   :  { %v583_v62 = vmul.f32 %v1291_v61, %v1291_v61  ;;  %v1296_v63 = vmul.f32 %v1268_v37, %v566_v60  ;;  %v675_v60 = vunpack.c.h.bf16 %v1166_v16 }
 0x355   :  { %v547_v1 = vpop.xlane.xlu0 %546 }
 0x356   :  { %v558_v2 = vmul.f32 0.03125, %v547_v1  ;;  %596 = vadd.xlane.f32.xlu1 %v583_v62  ;;  %v584_v3 = vmul.f32 %v1296_v63, %v1296_v63 }
 0x357   :  { %v549_v4 = vpop.xlane.xlu1 %548 }
 0x358   :  { %v567_v5 = vsub.f32 %v514_v23, %v558_v2  ;;  %v559_v6 = vmul.f32 0.03125, %v549_v4  ;;  %598 = vadd.xlane.f32.xlu0 %v584_v3 }
 0x35a   :  { %v568_v7 = vsub.f32 %v517_v26, %v559_v6  ;;  %v1301_v8 = vmul.f32 %v1268_v37, %v567_v5 }
 0x35c   :  { %v585_v9 = vmul.f32 %v1301_v8, %v1301_v8  ;;  %v1306_v10 = vmul.f32 %v1268_v37, %v568_v7 }
 0x35d   :  { %v551_v11 = vpop.xlane.xlu0 %550 }
 0x35e   :  { %v560_v12 = vmul.f32 0.03125, %v551_v11  ;;  %600 = vadd.xlane.f32.xlu1 %v585_v9  ;;  %v586_v13 = vmul.f32 %v1306_v10, %v1306_v10 }
 0x360   :  { %v569_v15 = vsub.f32 %v522_v29, %v560_v12  ;;  %602 = vadd.xlane.f32.xlu0 %v586_v13  ;;  %v684_v12 = vmul.f32 %v1268_v37, %v675_v60 }
 0x362   :  { %v1311_v20 = vmul.f32 %v1268_v37, %v569_v15 }
 0x364   :  { %v587_v21 = vmul.f32 %v1311_v20, %v1311_v20 }
 0x366   :  { %604 = vadd.xlane.f32.xlu1 %v587_v21  ;;  %v676_v21 = vunpack.c.l.bf16 %v1174_v17 }
 0x3d3   :  { %v589_v22 = vpop.xlane.xlu1 %588 }
 0x3d4   :  { %v606_v23 = vmul.f32 0.03125, %v589_v22 }
 0x3d6   :  { %v615_v24 = vadd.f32 1e-05, %v606_v23 }
 0x3d7   :  { %v591_v25 = vpop.xlane.xlu0 %590 }
 0x3d8   :  { %1023 = vrsqrt.f32 %v615_v24  ;;  %v607_v26 = vmul.f32 0.03125, %v591_v25 }
 0x3da   :  { %v616_v27 = vadd.f32 1e-05, %v607_v26 }
 0x3db   :  { %v593_v28 = vpop.xlane.xlu1 %592 }
 0x3dc   :  { %1025 = vrsqrt.f32 %v616_v27  ;;  %v608_v30 = vmul.f32 0.03125, %v593_v28 }
 0x3de   :  { %v617_v31 = vadd.f32 1e-05, %v608_v30 }
 0x3df   :  { %v595_v29 = vpop.xlane.xlu0 %594 }
 0x3e0   :  { %1027 = vrsqrt.f32 %v617_v31  ;;  %v609_v32 = vmul.f32 0.03125, %v595_v29  ;;  %v685_v29 = vmul.f32 %v1268_v37, %v676_v21 }
 0x3e2   :  { %v1024_v33 = vpop.eup %1023  ;;  %v618_v35 = vadd.f32 1e-05, %v609_v32 }
 0x3e3   :  { %v633_v36 = vmul.f32 %v1024_v33, %v1271_v41  ;;  %v597_v38 = vpop.xlane.xlu1 %596 }
 0x3e4   :  { %1029 = vrsqrt.f32 %v618_v35  ;;  %v610_v39 = vmul.f32 0.03125, %v597_v38 }
 0x3e5   :  { %v648_v43 = vmul.f32 %v1318_v34, %v633_v36  ;;  %v599_v44 = vpop.xlane.xlu0 %598 }
 0x3e6   :  { %v1026_v45 = vpop.eup %1025  ;;  %v619_v0 = vadd.f32 1e-05, %v610_v39  ;;  %v611_v48 = vmul.f32 0.03125, %v599_v44  ;;  %v679_v39 = vunpack.c.h.bf16 %v1182_v18 }
 0x3e7   :  { %v634_v41 = vmul.f32 %v1026_v45, %v1276_v46  ;;  %v663_v14 = vadd.f32 %v1327_v47, %v648_v43 }
 0x3e8   :  { %1031 = vrsqrt.f32 %v619_v0  ;;  %v620_v49 = vadd.f32 1e-05, %v611_v48 }
 0x3e9   :  { %v649_v53 = vmul.f32 %v1318_v34, %v634_v41  ;;  %v690_v62 = vadd.f32 %v681_v51, %v663_v14 }
 0x3ea   :  { %v1028_v54 = vpop.eup %1027  ;;  %1033 = vrsqrt.f32 %v620_v49  ;;  %v688_v49 = vmul.f32 %v1268_v37, %v679_v39 }
 0x3eb   :  { %v664_v56 = vadd.f32 %v1327_v47, %v649_v53  ;;  %v635_v57 = vmul.f32 %v1028_v54, %v1281_v50  ;;  %v601_v58 = vpop.xlane.xlu1 %600  ;;  %v683_v50 = vmul.f32 %v1268_v37, %v674_v59 }
 0x3ec   :  { %v612_v46 = vmul.f32 0.03125, %v601_v58 }
 0x3ed   :  { %v691_v1 = vadd.f32 %v682_v52, %v664_v56  ;;  %v650_v2 = vmul.f32 %v1318_v34, %v635_v57  ;;  %v603_v3 = vpop.xlane.xlu0 %602 }
 0x3ee   :  { %v1030_v4 = vpop.eup %1029  ;;  %v621_v5 = vadd.f32 1e-05, %v612_v46  ;;  %v613_v6 = vmul.f32 0.03125, %v603_v3 }
 0x3ef   :  { %v805_v7 = vpack.c.bf16 %v691_v1, %v690_v62  ;;  %v636_v9 = vmul.f32 %v1030_v4, %v1286_v55  ;;  %v665_v16 = vadd.f32 %v1327_v47, %v650_v2  ;;  %v677_v55 = vunpack.c.h.bf16 %v1174_v17 }
 0x3f0   :  { %1035 = vrsqrt.f32 %v621_v5  ;;  %v622_v11 = vadd.f32 1e-05, %v613_v6 }
 0x3f1   :  { %806 = vst [vmem:[%s1394_s9] sm:$0xff] %v805_v7   ;;  %v651_v13 = vmul.f32 %v1318_v34, %v636_v9  ;;  %v692_v27 = vadd.f32 %v683_v50, %v665_v16  ;;  %v686_v33 = vmul.f32 %v1268_v37, %v677_v55 }
 0x3f2   :  { %v1032_v15 = vpop.eup %1031  ;;  %1037 = vrsqrt.f32 %v622_v11 }
 0x3f3   :  { %v666_v22 = vadd.f32 %v1327_v47, %v651_v13  ;;  %v637_v23 = vmul.f32 %v1032_v15, %v1291_v61  ;;  %v605_v24 = vpop.xlane.xlu1 %604 }
 0x3f4   :  { %v1034_v25 = vpop.eup %1033  ;;  %v614_v26 = vmul.f32 0.03125, %v605_v24 }
 0x3f5   :  { %v693_v28 = vadd.f32 %v684_v12, %v666_v22  ;;  %v652_v30 = vmul.f32 %v1318_v34, %v637_v23  ;;  %v638_v31 = vmul.f32 %v1034_v25, %v1296_v63  ;;  %v678_v63 = vunpack.c.l.bf16 %v1182_v18 }
 0x3f6   :  { %v623_v32 = vadd.f32 1e-05, %v614_v26 }
 0x3f7   :  { %v810_v35 = vpack.c.bf16 %v693_v28, %v692_v27  ;;  %v667_v17 = vadd.f32 %v1327_v47, %v652_v30  ;;  %v653_v36 = vmul.f32 %v1318_v34, %v638_v31  ;;  %v687_v41 = vmul.f32 %v1268_v37, %v678_v63 }
 0x3f8   :  { %1039 = vrsqrt.f32 %v623_v32 }
 0x3f9   :  { %822 = vst [vmem:[%s1394_s9 + $0x8] sm:$0xff] %v810_v35   ;;  %v668_v61 = vadd.f32 %v1327_v47, %v653_v36  ;;  %v694_v40 = vadd.f32 %v685_v29, %v667_v17 }
 0x3fa   :  { %v1036_v38 = vpop.eup %1035 }
 0x3fb   :  { %v695_v42 = vadd.f32 %v686_v33, %v668_v61  ;;  %v639_v43 = vmul.f32 %v1036_v38, %v1301_v8  ;;  %v680_v8 = vunpack.c.l.bf16 %v1190_v19 }
 0x3fc   :  { %v1038_v44 = vpop.eup %1037 }
 0x3fd   :  { %v815_v45 = vpack.c.bf16 %v695_v42, %v694_v40  ;;  %v654_v0 = vmul.f32 %v1318_v34, %v639_v43  ;;  %v640_v48 = vmul.f32 %v1038_v44, %v1306_v10  ;;  %v689_v56 = vmul.f32 %v1268_v37, %v680_v8 }
 0x3ff   :  { %823 = vst [vmem:[%s1394_s9 + $0x10] sm:$0xff] %v815_v45   ;;  %v669_v18 = vadd.f32 %v1327_v47, %v654_v0  ;;  %v655_v51 = vmul.f32 %v1318_v34, %v640_v48 }
 0x401   :  { %v670_v52 = vadd.f32 %v1327_v47, %v655_v51  ;;  %v696_v53 = vadd.f32 %v687_v41, %v669_v18 }
 0x402   :  { %v1040_v14 = vpop.eup %1039 }
 0x403   :  { %v697_v54 = vadd.f32 %v688_v49, %v670_v52  ;;  %v641_v10 = vmul.f32 %v1040_v14, %v1311_v20 }
 0x405   :  { %v820_v57 = vpack.c.bf16 %v697_v54, %v696_v53  ;;  %v656_v58 = vmul.f32 %v1318_v34, %v641_v10 }
 0x407   :  { %824 = vst [vmem:[%s1394_s9 + $0x18] sm:$0xff] %v820_v57   ;;  %v671_v59 = vadd.f32 %v1327_v47, %v656_v58 }
 0x409   :  { %v698_v46 = vadd.f32 %v689_v56, %v671_v59 }
 0x40b   :  { %v801_v19 = vpack.c.bf16 %v698_v46, %v698_v46 }
 0x40d   :  { %744 = vst [vmem:[%s1394_s9 + $0x20] sm:$0xf] %v801_v19 }

// kernel: _lambda_.17
= control target key start
LH: loop header
LB: loop body
LE: loop exit
PB: predicated region body
PF: predicated region fallthrough
CT: control target
= control target key end

     0   :  { %s707_s1 = inlined_call_operand.vmem [shape: bf16[128,128], index: 1, kind: input, shape index: {}]   ;;  %s708_s0 = inlined_call_operand.vmem [shape: bf16[32,128], index: 0, kind: input, shape index: {}]   ;;  %s709_s3 = inlined_call_operand.vmem [shape: bf16[128,128], index: 3, kind: input, shape index: {}]   ;;  %s710_s5 = inlined_call_operand.vmem [shape: bf16[128,128], index: 5, kind: input, shape index: {}]   ;;  %s711_s2 = inlined_call_operand.vmem [shape: f32[1,128], index: 2, kind: input, shape index: {}]   ;;  %s712_s4 = inlined_call_operand.vmem [shape: f32[1,128], index: 4, kind: input, shape index: {}]   ;;  %s713_s6 = inlined_call_operand.vmem [shape: f32[1,128], index: 6, kind: input, shape index: {}]   ;;  %s714_s7 = inlined_call_operand.vmem [shape: f32[32,128], index: 7, kind: output, shape index: {}]  }
   0x1   :  { %v542_v0 = vld [vmem:[%s707_s1] sm:$0xff]   ;;  %v543_v1 = vld [vmem:[%s707_s1 + $0x8] sm:$0xff]   ;;  %v544_v2 = vld [vmem:[%s707_s1 + $0x10] sm:$0xff]  }
   0x2   :  { %482 = vmatprep.subr.bf16.mxu0 %v542_v0  ;;  %v545_v3 = vld [vmem:[%s707_s1 + $0x18] sm:$0xff]   ;;  %v550_v4 = vld [vmem:[%s708_s0] sm:$0xff]   ;;  %v553_v6 = vld [vmem:[%s709_s3 + $0x8] sm:$0xff]  }
   0x3   :  { %483 = vmatpush3.bf16.msra.mxu0 %v542_v0  ;;  %498 = vmatprep.mubr.bf16.mxu0 %v550_v4  ;;  %v552_v5 = vld [vmem:[%s709_s3] sm:$0xff]   ;;  %v554_v8 = vld [vmem:[%s709_s3 + $0x10] sm:$0xff]   ;;  %v547_v9 = vld [vmem:[%s707_s1 + $0x28] sm:$0xff]  }
   0x4   :  { %484 = vmatprep.subr.bf16.mxu0 %v543_v1  ;;  %v546_v7 = vld [vmem:[%s707_s1 + $0x20] sm:$0xff]   ;;  %502 = vmatprep.subr.bf16.mxu1 %v552_v5  ;;  %v555_v10 = vld [vmem:[%s709_s3 + $0x18] sm:$0xff]   ;;  %v548_v11 = vld [vmem:[%s707_s1 + $0x30] sm:$0xff]  }
   0x5   :  { %503 = vmatpush3.bf16.msra.mxu1 %v552_v5  ;;  %v556_v12 = vld [vmem:[%s709_s3 + $0x20] sm:$0xff]   ;;  %v549_v13 = vld [vmem:[%s707_s1 + $0x38] sm:$0xff]   ;;  %v557_v14 = vld [vmem:[%s709_s3 + $0x28] sm:$0xff]  }
   0x6   :  { %504 = vmatprep.subr.bf16.mxu1 %v553_v6  ;;  %v551_v15 = vld [vmem:[%s708_s0 + $0x8] sm:$0xff]   ;;  %v558_v16 = vld [vmem:[%s709_s3 + $0x30] sm:$0xff]   ;;  %v559_v17 = vld [vmem:[%s709_s3 + $0x38] sm:$0xff]  }
   0x7   :  { %485 = vmatpush3.bf16.msra.mxu0 %v543_v1  ;;  %v560_v18 = vld [vmem:[%s710_s5] sm:$0xff]   ;;  %v561_v19 = vld [vmem:[%s710_s5 + $0x8] sm:$0xff]   ;;  %v562_v20 = vld [vmem:[%s710_s5 + $0x10] sm:$0xff]  }
   0x8   :  { %486 = vmatprep.subr.bf16.mxu0 %v544_v2  ;;  %v563_v21 = vld [vmem:[%s710_s5 + $0x18] sm:$0xff]   ;;  %v564_v22 = vld [vmem:[%s710_s5 + $0x20] sm:$0xff]   ;;  %v565_v23 = vld [vmem:[%s710_s5 + $0x28] sm:$0xff]  }
   0x9   :  { %505 = vmatpush3.bf16.msra.mxu1 %v553_v6  ;;  %v423_v24 = vld [vmem:[%s711_s2] ss:$0 sm:$0xff]  ;;  %v566_v39 = vld [vmem:[%s710_s5 + $0x30] sm:$0xff]   ;;  %v567_v40 = vld [vmem:[%s710_s5 + $0x38] sm:$0xff]  }
   0xa   :  { %506 = vmatprep.subr.bf16.mxu1 %v554_v8  ;;  %v434_v41 = vld [vmem:[%s712_s4] ss:$0 sm:$0xff] }
   0xb   :  { %487 = vmatpush3.bf16.msra.mxu0 %v544_v2  ;;  %v443_v56 = vld [vmem:[%s713_s6] ss:$0 sm:$0xff] }
   0xc   :  { %488 = vmatprep.subr.bf16.mxu0 %v545_v3 }
   0xd   :  { %507 = vmatpush3.bf16.msra.mxu1 %v554_v8 }
   0xe   :  { %508 = vmatprep.subr.bf16.mxu1 %v555_v10 }
   0xf   :  { %489 = vmatpush3.bf16.msra.mxu0 %v545_v3 }
  0x10   :  { %490 = vmatprep.subr.bf16.mxu0 %v546_v7 }
  0x11   :  { %509 = vmatpush3.bf16.msra.mxu1 %v555_v10 }
  0x12   :  { %510 = vmatprep.subr.bf16.mxu1 %v556_v12 }
  0x13   :  { %491 = vmatpush3.bf16.msra.mxu0 %v546_v7 }
  0x14   :  { %492 = vmatprep.subr.bf16.mxu0 %v547_v9 }
  0x15   :  { %511 = vmatpush3.bf16.msra.mxu1 %v556_v12 }
  0x16   :  { %512 = vmatprep.subr.bf16.mxu1 %v557_v14 }
  0x17   :  { %493 = vmatpush3.bf16.msra.mxu0 %v547_v9 }
  0x18   :  { %494 = vmatprep.subr.bf16.mxu0 %v548_v11 }
  0x19   :  { %513 = vmatpush3.bf16.msra.mxu1 %v557_v14 }
  0x1a   :  { %514 = vmatprep.subr.bf16.mxu1 %v558_v16 }
  0x1b   :  { %495 = vmatpush3.bf16.msra.mxu0 %v548_v11 }
  0x1c   :  { %496 = vmatprep.subr.bf16.mxu0 %v549_v13 }
  0x1d   :  { %515 = vmatpush3.bf16.msra.mxu1 %v558_v16 }
  0x1e   :  { %516 = vmatprep.subr.bf16.mxu1 %v559_v17 }
  0x1f   :  { %497 = vmatpush3.bf16.msra.mxu0 %v549_v13 }
  0x20   :  { %522 = vmatprep.subr.bf16.mxu0 %v560_v18 }
  0x21   :  { %517 = vmatpush3.bf16.msra.mxu1 %v559_v17 }
  0x22   :  { %499 = vmatmul.mubr.bf16.vlgmr.msra.gmra.mrb[0].mxu0 %v551_v15 }
  0x23   :  { %523 = vmatpush3.bf16.msra.mxu0 %v560_v18 }
  0x24   :  { %524 = vmatprep.subr.bf16.mxu0 %v561_v19 }
  0x27   :  { %525 = vmatpush3.bf16.msra.mxu0 %v561_v19 }
  0x28   :  { %526 = vmatprep.subr.bf16.mxu0 %v562_v20 }
  0x2b   :  { %527 = vmatpush3.bf16.msra.mxu0 %v562_v20 }
  0x2c   :  { %528 = vmatprep.subr.bf16.mxu0 %v563_v21 }
  0x2f   :  { %529 = vmatpush3.bf16.msra.mxu0 %v563_v21 }
  0x30   :  { %530 = vmatprep.subr.bf16.mxu0 %v564_v22 }
  0x33   :  { %531 = vmatpush3.bf16.msra.mxu0 %v564_v22 }
  0x34   :  { %532 = vmatprep.subr.bf16.mxu0 %v565_v23 }
  0x37   :  { %533 = vmatpush3.bf16.msra.mxu0 %v565_v23 }
  0x38   :  { %534 = vmatprep.subr.bf16.mxu0 %v566_v39 }
  0x3b   :  { %535 = vmatpush3.bf16.msra.mxu0 %v566_v39 }
  0x3c   :  { %536 = vmatprep.subr.bf16.mxu0 %v567_v40 }
  0x3f   :  { %537 = vmatpush3.bf16.msra.mxu0 %v567_v40 }
  0xf5   :  { %v500_v25 = vpop.f32.mrb[0].mxu0 }
  0xf6   :  { %v157_v26 = vadd.f32 %v500_v25, %v423_v24  ;;  %v148_v27 = vpop.f32.mrb[1].mxu0 }
  0xf7   :  { %v149_v28 = vadd.f32 %v423_v24, %v148_v27  ;;  %v501_v29 = vpop.f32.mrb[2].mxu0 }
  0xf8   :  { %v160_v30 = vadd.f32 %v501_v29, %v423_v24  ;;  %v151_v31 = vpop.f32.mrb[3].mxu0  ;;  %v165_v33 = vmax.f32 %v157_v26, 0.0 }
  0xf9   :  { %v152_v32 = vadd.f32 %v423_v24, %v151_v31  ;;  %v163_v35 = vmax.f32 %v149_v28, 0.0 }
  0xfa   :  { %v166_v34 = vmax.f32 %v160_v30, 0.0 }
  0xfb   :  { %v164_v36 = vmax.f32 %v152_v32, 0.0 }
  0xfc   :  { %v168_v37 = vpack.c.bf16 %v166_v34, %v165_v33 }
  0xfd   :  { %v167_v38 = vpack.c.bf16 %v164_v36, %v163_v35 }
  0xff   :  { %518 = vmatprep.mubr.bf16.mxu1 %v167_v38 }
 0x100   :  { %519 = vmatmul.mubr.bf16.vlgmr.msra.gmra.mrb[0].mxu1 %v168_v37 }
 0x1d3   :  { %v520_v42 = vpop.f32.mrb[0].mxu1 }
 0x1d4   :  { %v283_v43 = vadd.f32 %v520_v42, %v434_v41  ;;  %v274_v44 = vpop.f32.mrb[1].mxu1 }
 0x1d5   :  { %v275_v45 = vadd.f32 %v434_v41, %v274_v44  ;;  %v521_v46 = vpop.f32.mrb[2].mxu1 }
 0x1d6   :  { %v286_v47 = vadd.f32 %v521_v46, %v434_v41  ;;  %v277_v48 = vpop.f32.mrb[3].mxu1  ;;  %v291_v50 = vmax.f32 %v283_v43, 0.0 }
 0x1d7   :  { %v278_v49 = vadd.f32 %v434_v41, %v277_v48  ;;  %v289_v52 = vmax.f32 %v275_v45, 0.0 }
 0x1d8   :  { %v292_v51 = vmax.f32 %v286_v47, 0.0 }
 0x1d9   :  { %v290_v53 = vmax.f32 %v278_v49, 0.0 }
 0x1da   :  { %v294_v54 = vpack.c.bf16 %v292_v51, %v291_v50 }
 0x1db   :  { %v293_v55 = vpack.c.bf16 %v290_v53, %v289_v52 }
 0x1dd   :  { %538 = vmatprep.mubr.bf16.mxu0 %v293_v55 }
 0x1de   :  { %539 = vmatmul.mubr.bf16.vlgmr.msra.gmra.mrb[4].mxu0 %v294_v54 }
 0x2b1   :  { %v540_v57 = vpop.f32.mrb[4].mxu0 }
 0x2b2   :  { %v409_v58 = vadd.f32 %v540_v57, %v443_v56  ;;  %v400_v59 = vpop.f32.mrb[5].mxu0 }
 0x2b3   :  { %v401_v60 = vadd.f32 %v443_v56, %v400_v59  ;;  %v541_v61 = vpop.f32.mrb[6].mxu0 }
 0x2b4   :  { %417 = vst [vmem:[%s714_s7 + $0x10] sm:$0xff] %v409_v58  ;;  %v412_v62 = vadd.f32 %v541_v61, %v443_v56  ;;  %v403_v63 = vpop.f32.mrb[7].mxu0 }
 0x2b5   :  { %415 = vst [vmem:[%s714_s7] sm:$0xff] %v401_v60  ;;  %v404_v0 = vadd.f32 %v443_v56, %v403_v63 }
 0x2b6   :  { %418 = vst [vmem:[%s714_s7 + $0x18] sm:$0xff] %v412_v62 }
 0x2b7   :  { %416 = vst [vmem:[%s714_s7 + $0x8] sm:$0xff] %v404_v0 }

// kernel: _lambda_.13
= control target key start
LH: loop header
LB: loop body
LE: loop exit
PB: predicated region body
PF: predicated region fallthrough
CT: control target
= control target key end

     0   :  { %s870_s1 = inlined_call_operand.vmem [shape: bf16[128,128], index: 1, kind: input, shape index: {}]   ;;  %s871_s0 = inlined_call_operand.vmem [shape: bf16[32,128], index: 0, kind: input, shape index: {}]   ;;  %s872_s3 = inlined_call_operand.vmem [shape: bf16[128,128], index: 3, kind: input, shape index: {}]   ;;  %s873_s5 = inlined_call_operand.vmem [shape: bf16[128,128], index: 5, kind: input, shape index: {}]   ;;  %s874_s2 = inlined_call_operand.vmem [shape: f32[1,128], index: 2, kind: input, shape index: {}]   ;;  %s875_s4 = inlined_call_operand.vmem [shape: f32[1,128], index: 4, kind: input, shape index: {}]   ;;  %s876_s6 = inlined_call_operand.vmem [shape: f32[1,128], index: 6, kind: input, shape index: {}]   ;;  %s877_s7 = inlined_call_operand.vmem [shape: f32[1,128], index: 7, kind: input, shape index: {}]   ;;  %s878_s8 = inlined_call_operand.vmem [shape: f32[1,128], index: 8, kind: input, shape index: {}]   ;;  %s879_s9 = inlined_call_operand.vmem [shape: bf16[32,128], index: 9, kind: output, shape index: {}]  }
   0x1   :  { %v674_v0 = vld [vmem:[%s870_s1] sm:$0xff]   ;;  %v675_v1 = vld [vmem:[%s870_s1 + $0x8] sm:$0xff]   ;;  %v676_v2 = vld [vmem:[%s870_s1 + $0x10] sm:$0xff]  }
   0x2   :  { %613 = vmatprep.subr.bf16.mxu0 %v674_v0  ;;  %v677_v3 = vld [vmem:[%s870_s1 + $0x18] sm:$0xff]   ;;  %v776_v4 = vld [vmem:[%s871_s0] sm:$0xff]   ;;  %v685_v6 = vld [vmem:[%s872_s3 + $0x8] sm:$0xff]  }
   0x3   :  { %614 = vmatpush3.bf16.msra.mxu0 %v674_v0  ;;  %v684_v5 = vld [vmem:[%s872_s3] sm:$0xff]   ;;  %629 = vmatprep.mubr.bf16.mxu0 %v776_v4  ;;  %v686_v8 = vld [vmem:[%s872_s3 + $0x10] sm:$0xff]   ;;  %v679_v9 = vld [vmem:[%s870_s1 + $0x28] sm:$0xff]  }
   0x4   :  { %615 = vmatprep.subr.bf16.mxu0 %v675_v1  ;;  %v678_v7 = vld [vmem:[%s870_s1 + $0x20] sm:$0xff]   ;;  %633 = vmatprep.subr.bf16.mxu1 %v684_v5  ;;  %v687_v10 = vld [vmem:[%s872_s3 + $0x18] sm:$0xff]   ;;  %v680_v11 = vld [vmem:[%s870_s1 + $0x30] sm:$0xff]  }
   0x5   :  { %634 = vmatpush3.bf16.msra.mxu1 %v684_v5  ;;  %v688_v12 = vld [vmem:[%s872_s3 + $0x20] sm:$0xff]   ;;  %v681_v13 = vld [vmem:[%s870_s1 + $0x38] sm:$0xff]   ;;  %v689_v14 = vld [vmem:[%s872_s3 + $0x28] sm:$0xff]  }
   0x6   :  { %635 = vmatprep.subr.bf16.mxu1 %v685_v6  ;;  %v812_v15 = vld [vmem:[%s871_s0 + $0x8] sm:$0xff]   ;;  %v690_v16 = vld [vmem:[%s872_s3 + $0x30] sm:$0xff]   ;;  %v691_v17 = vld [vmem:[%s872_s3 + $0x38] sm:$0xff]  }
   0x7   :  { %616 = vmatpush3.bf16.msra.mxu0 %v675_v1  ;;  %v692_v18 = vld [vmem:[%s873_s5] sm:$0xff]   ;;  %v693_v19 = vld [vmem:[%s873_s5 + $0x8] sm:$0xff]   ;;  %v694_v20 = vld [vmem:[%s873_s5 + $0x10] sm:$0xff]   ;;  %v421_v1 = vlaneseq }
   0x8   :  { %617 = vmatprep.subr.bf16.mxu0 %v676_v2  ;;  %v695_v21 = vld [vmem:[%s873_s5 + $0x18] sm:$0xff]   ;;  %v696_v22 = vld [vmem:[%s873_s5 + $0x20] sm:$0xff]   ;;  %v697_v23 = vld [vmem:[%s873_s5 + $0x28] sm:$0xff]  }
   0x9   :  { %636 = vmatpush3.bf16.msra.mxu1 %v685_v6  ;;  %v532_v24 = vld [vmem:[%s874_s2] ss:$0 sm:$0xff]  ;;  %v698_v39 = vld [vmem:[%s873_s5 + $0x30] sm:$0xff]   ;;  %v699_v40 = vld [vmem:[%s873_s5 + $0x38] sm:$0xff]  }
   0xa   :  { %637 = vmatprep.subr.bf16.mxu1 %v686_v8  ;;  %v543_v41 = vld [vmem:[%s875_s4] ss:$0 sm:$0xff] }
   0xb   :  { %618 = vmatpush3.bf16.msra.mxu0 %v676_v2  ;;  %v552_v56 = vld [vmem:[%s876_s6] ss:$0 sm:$0xff]  ;;  %v422_v2 = vand.u32 127, %v421_v1 }
   0xc   :  { %619 = vmatprep.subr.bf16.mxu0 %v677_v3 }
   0xd   :  { %638 = vmatpush3.bf16.msra.mxu1 %v686_v8  ;;  %vm425_vm0 = vcmp.lt.s32.totalorder %v422_v2, 32  ;;  %v710_v8 = vmov 0.0  }
   0xe   :  { %639 = vmatprep.subr.bf16.mxu1 %v687_v10 }
   0xf   :  { %620 = vmatpush3.bf16.msra.mxu0 %v677_v3 }
  0x10   :  { %621 = vmatprep.subr.bf16.mxu0 %v678_v7 }
  0x11   :  { %640 = vmatpush3.bf16.msra.mxu1 %v687_v10 }
  0x12   :  { %641 = vmatprep.subr.bf16.mxu1 %v688_v12 }
  0x13   :  { %622 = vmatpush3.bf16.msra.mxu0 %v678_v7 }
  0x14   :  { %623 = vmatprep.subr.bf16.mxu0 %v679_v9 }
  0x15   :  { %642 = vmatpush3.bf16.msra.mxu1 %v688_v12 }
  0x16   :  { %643 = vmatprep.subr.bf16.mxu1 %v689_v14 }
  0x17   :  { %624 = vmatpush3.bf16.msra.mxu0 %v679_v9  ;;  %v561_v9 = vsel %vm425_vm0, 1.0, %v710_v8 }
  0x18   :  { %625 = vmatprep.subr.bf16.mxu0 %v680_v11 }
  0x19   :  { %644 = vmatpush3.bf16.msra.mxu1 %v689_v14 }
  0x1a   :  { %645 = vmatprep.subr.bf16.mxu1 %v690_v16 }
  0x1b   :  { %626 = vmatpush3.bf16.msra.mxu0 %v680_v11 }
  0x1c   :  { %627 = vmatprep.subr.bf16.mxu0 %v681_v13 }
  0x1d   :  { %646 = vmatpush3.bf16.msra.mxu1 %v690_v16 }
  0x1e   :  { %647 = vmatprep.subr.bf16.mxu1 %v691_v17 }
  0x1f   :  { %628 = vmatpush3.bf16.msra.mxu0 %v681_v13 }
  0x20   :  { %653 = vmatprep.subr.bf16.mxu0 %v692_v18 }
  0x21   :  { %648 = vmatpush3.bf16.msra.mxu1 %v691_v17 }
  0x22   :  { %630 = vmatmul.mubr.bf16.vlgmr.msra.gmra.mrb[0].mxu0 %v812_v15 }
  0x23   :  { %654 = vmatpush3.bf16.msra.mxu0 %v692_v18 }
  0x24   :  { %655 = vmatprep.subr.bf16.mxu0 %v693_v19 }
  0x27   :  { %656 = vmatpush3.bf16.msra.mxu0 %v693_v19 }
  0x28   :  { %657 = vmatprep.subr.bf16.mxu0 %v694_v20 }
  0x2b   :  { %658 = vmatpush3.bf16.msra.mxu0 %v694_v20 }
  0x2c   :  { %659 = vmatprep.subr.bf16.mxu0 %v695_v21 }
  0x2f   :  { %660 = vmatpush3.bf16.msra.mxu0 %v695_v21 }
  0x30   :  { %661 = vmatprep.subr.bf16.mxu0 %v696_v22 }
  0x33   :  { %662 = vmatpush3.bf16.msra.mxu0 %v696_v22 }
  0x34   :  { %663 = vmatprep.subr.bf16.mxu0 %v697_v23 }
  0x37   :  { %664 = vmatpush3.bf16.msra.mxu0 %v697_v23 }
  0x38   :  { %665 = vmatprep.subr.bf16.mxu0 %v698_v39 }
  0x3b   :  { %666 = vmatpush3.bf16.msra.mxu0 %v698_v39 }
  0x3c   :  { %667 = vmatprep.subr.bf16.mxu0 %v699_v40 }
  0x3f   :  { %668 = vmatpush3.bf16.msra.mxu0 %v699_v40  ;;  %v562_v40 = vld [vmem:[%s877_s7] ss:$0 sm:$0xff] }
  0xf5   :  { %v631_v25 = vpop.f32.mrb[0].mxu0 }
  0xf6   :  { %v163_v26 = vadd.f32 %v631_v25, %v532_v24  ;;  %v154_v27 = vpop.f32.mrb[1].mxu0 }
  0xf7   :  { %v155_v28 = vadd.f32 %v532_v24, %v154_v27  ;;  %v632_v29 = vpop.f32.mrb[2].mxu0 }
  0xf8   :  { %v166_v30 = vadd.f32 %v632_v29, %v532_v24  ;;  %v157_v31 = vpop.f32.mrb[3].mxu0  ;;  %v171_v33 = vmax.f32 %v163_v26, 0.0 }
  0xf9   :  { %v158_v32 = vadd.f32 %v532_v24, %v157_v31  ;;  %v169_v35 = vmax.f32 %v155_v28, 0.0 }
  0xfa   :  { %v172_v34 = vmax.f32 %v166_v30, 0.0 }
  0xfb   :  { %v170_v36 = vmax.f32 %v158_v32, 0.0 }
  0xfc   :  { %v174_v37 = vpack.c.bf16 %v172_v34, %v171_v33 }
  0xfd   :  { %v173_v38 = vpack.c.bf16 %v170_v36, %v169_v35 }
  0xff   :  { %649 = vmatprep.mubr.bf16.mxu1 %v173_v38 }
 0x100   :  { %650 = vmatmul.mubr.bf16.vlgmr.msra.gmra.mrb[0].mxu1 %v174_v37 }
 0x1d3   :  { %v651_v42 = vpop.f32.mrb[0].mxu1 }
 0x1d4   :  { %v289_v43 = vadd.f32 %v651_v42, %v543_v41  ;;  %v280_v44 = vpop.f32.mrb[1].mxu1  ;;  %v496_v42 = vunpack.c.l.bf16 %v776_v4 }
 0x1d5   :  { %v281_v45 = vadd.f32 %v543_v41, %v280_v44  ;;  %v652_v46 = vpop.f32.mrb[2].mxu1 }
 0x1d6   :  { %v292_v47 = vadd.f32 %v652_v46, %v543_v41  ;;  %v283_v48 = vpop.f32.mrb[3].mxu1  ;;  %v297_v50 = vmax.f32 %v289_v43, 0.0  ;;  %v497_v43 = vunpack.c.h.bf16 %v776_v4  ;;  %v563_v46 = vld [vmem:[%s878_s8] ss:$0 sm:$0xff] }
 0x1d7   :  { %v284_v49 = vadd.f32 %v543_v41, %v283_v48  ;;  %v295_v52 = vmax.f32 %v281_v45, 0.0 }
 0x1d8   :  { %v298_v51 = vmax.f32 %v292_v47, 0.0 }
 0x1d9   :  { %v296_v53 = vmax.f32 %v284_v49, 0.0  ;;  %v498_v49 = vunpack.c.l.bf16 %v812_v15 }
 0x1da   :  { %v300_v54 = vpack.c.bf16 %v298_v51, %v297_v50  ;;  %v499_v50 = vunpack.c.h.bf16 %v812_v15 }
 0x1db   :  { %v299_v55 = vpack.c.bf16 %v296_v53, %v295_v52  ;;  %v500_v52 = vmul.f32 %v561_v9, %v496_v42  ;;  %v501_v53 = vmul.f32 %v561_v9, %v497_v43 }
 0x1dd   :  { %669 = vmatprep.mubr.bf16.mxu0 %v299_v55 }
 0x1de   :  { %670 = vmatmul.mubr.bf16.vlgmr.msra.gmra.mrb[4].mxu0 %v300_v54 }
 0x2b1   :  { %v671_v57 = vpop.f32.mrb[4].mxu0 }
 0x2b2   :  { %v415_v58 = vadd.f32 %v671_v57, %v552_v56  ;;  %v406_v59 = vpop.f32.mrb[5].mxu0 }
 0x2b3   :  { %v407_v60 = vadd.f32 %v552_v56, %v406_v59  ;;  %v672_v61 = vpop.f32.mrb[6].mxu0  ;;  %v502_v59 = vmul.f32 %v561_v9, %v498_v49 }
 0x2b4   :  { %432 = vadd.xlane.f32.xlu1 %v415_v58  ;;  %v409_v62 = vpop.f32.mrb[7].mxu0  ;;  %v418_v63 = vadd.f32 %v672_v61, %v552_v56 }
 0x2b5   :  { %428 = vadd.xlane.f32.xlu0 %v407_v60  ;;  %v410_v0 = vadd.f32 %v552_v56, %v409_v62 }
 0x2b8   :  { %434 = vadd.xlane.f32.xlu1 %v418_v63 }
 0x2b9   :  { %430 = vadd.xlane.f32.xlu0 %v410_v0 }
 0x341   :  { %v433_v3 = vpop.xlane.xlu1 %432 }
 0x342   :  { %v438_v5 = vmul.f32 0.03125, %v433_v3  ;;  %v429_v6 = vpop.xlane.xlu0 %428 }
 0x343   :  { %v436_v7 = vmul.f32 0.03125, %v429_v6 }
 0x344   :  { %v442_v10 = vsub.f32 %v415_v58, %v438_v5 }
 0x345   :  { %v440_v11 = vsub.f32 %v407_v60, %v436_v7  ;;  %v435_v12 = vpop.xlane.xlu1 %434  ;;  %v503_v60 = vmul.f32 %v561_v9, %v499_v50 }
 0x346   :  { %v439_v13 = vmul.f32 0.03125, %v435_v12  ;;  %v431_v14 = vpop.xlane.xlu0 %430  ;;  %v446_v21 = vmul.f32 %v561_v9, %v442_v10 }
 0x347   :  { %v437_v16 = vmul.f32 0.03125, %v431_v14  ;;  %v444_v17 = vmul.f32 %v561_v9, %v440_v11 }
 0x348   :  { %v443_v18 = vsub.f32 %v418_v63, %v439_v13  ;;  %v450_v23 = vmul.f32 %v446_v21, %v446_v21 }
 0x349   :  { %v441_v19 = vsub.f32 %v410_v0, %v437_v16  ;;  %v448_v20 = vmul.f32 %v444_v17, %v444_v17 }
 0x34a   :  { %v447_v25 = vmul.f32 %v561_v9, %v443_v18 }
 0x34b   :  { %452 = vadd.xlane.f32.xlu0 %v448_v20  ;;  %v445_v22 = vmul.f32 %v561_v9, %v441_v19 }
 0x34c   :  { %v451_v26 = vmul.f32 %v447_v25, %v447_v25 }
 0x34d   :  { %v449_v24 = vmul.f32 %v445_v22, %v445_v22 }
 0x34f   :  { %456 = vadd.xlane.f32.xlu0 %v450_v23  ;;  %454 = vadd.xlane.f32.xlu1 %v449_v24 }
 0x353   :  { %458 = vadd.xlane.f32.xlu1 %v451_v26 }
 0x3d8   :  { %v453_v27 = vpop.xlane.xlu0 %452 }
 0x3d9   :  { %v460_v28 = vmul.f32 0.03125, %v453_v27 }
 0x3db   :  { %v464_v29 = vadd.f32 1e-05, %v460_v28 }
 0x3dc   :  { %v455_v30 = vpop.xlane.xlu1 %454  ;;  %v457_v31 = vpop.xlane.xlu0 %456 }
 0x3dd   :  { %702 = vrsqrt.f32 %v464_v29  ;;  %v461_v32 = vmul.f32 0.03125, %v455_v30  ;;  %v462_v33 = vmul.f32 0.03125, %v457_v31 }
 0x3df   :  { %v465_v34 = vadd.f32 1e-05, %v461_v32  ;;  %v466_v35 = vadd.f32 1e-05, %v462_v33 }
 0x3e0   :  { %v459_v36 = vpop.xlane.xlu1 %458 }
 0x3e1   :  { %704 = vrsqrt.f32 %v465_v34  ;;  %v463_v37 = vmul.f32 0.03125, %v459_v36 }
 0x3e2   :  { %706 = vrsqrt.f32 %v466_v35 }
 0x3e3   :  { %v467_v38 = vadd.f32 1e-05, %v463_v37 }
 0x3e5   :  { %708 = vrsqrt.f32 %v467_v38 }
 0x3e7   :  { %v703_v39 = vpop.eup %702 }
 0x3e8   :  { %v472_v41 = vmul.f32 %v703_v39, %v444_v17 }
 0x3ea   :  { %v482_v44 = vmul.f32 %v562_v40, %v472_v41 }
 0x3eb   :  { %v705_v45 = vpop.eup %704 }
 0x3ec   :  { %v707_v47 = vpop.eup %706  ;;  %v473_v48 = vmul.f32 %v705_v45, %v445_v22  ;;  %v492_v54 = vadd.f32 %v563_v46, %v482_v44 }
 0x3ed   :  { %v474_v51 = vmul.f32 %v707_v47, %v446_v21 }
 0x3ee   :  { %v483_v55 = vmul.f32 %v562_v40, %v473_v48  ;;  %v504_v61 = vadd.f32 %v500_v52, %v492_v54 }
 0x3ef   :  { %v709_v56 = vpop.eup %708  ;;  %v484_v57 = vmul.f32 %v562_v40, %v474_v51 }
 0x3f0   :  { %v493_v4 = vadd.f32 %v563_v46, %v483_v55  ;;  %v475_v58 = vmul.f32 %v709_v56, %v447_v25 }
 0x3f1   :  { %v494_v63 = vadd.f32 %v563_v46, %v484_v57 }
 0x3f2   :  { %v505_v62 = vadd.f32 %v501_v53, %v493_v4  ;;  %v485_v0 = vmul.f32 %v562_v40, %v475_v58 }
 0x3f3   :  { %v506_v15 = vadd.f32 %v502_v59, %v494_v63 }
 0x3f4   :  { %v575_v1 = vpack.c.bf16 %v505_v62, %v504_v61  ;;  %v495_v2 = vadd.f32 %v563_v46, %v485_v0 }
 0x3f6   :  { %576 = vst [vmem:[%s879_s9] sm:$0xff] %v575_v1   ;;  %v507_v3 = vadd.f32 %v503_v60, %v495_v2 }
 0x3f8   :  { %v580_v5 = vpack.c.bf16 %v507_v3, %v506_v15 }
 0x3fa   :  { %582 = vst [vmem:[%s879_s9 + $0x8] sm:$0xff] %v580_v5  }

</bundles_post_ra>
